<compile_context>
chip_gen: v7x
topology: tpu7x:2x2x1
jax: 0.10.0
libtpu: 0.0.40
codegen_flags: <defaults>
</compile_context>

<pallas_src>
import functools

import jax
import jax.numpy as jnp
from jax.experimental import pallas as pl
from jax.experimental.pallas import tpu as pltpu


# ------------------------- helpers -------------------------

def _round_up(x, m):
    return ((x + m - 1) // m) * m


def _pick_tile(dim, candidates):
    for c in candidates:
        if dim % c == 0:
            return c
    return dim


# ------------------------- Pallas kernels -------------------------

def _matmul_bias_kernel(a_ref, w_ref, b_ref, o_ref, acc_ref, *, leaky_slope):
    # a: (tm, tk) bf16, w: (tk, tn) bf16, b: (1, tn) f32, acc: (tm, tn) f32
    k = pl.program_id(2)

    @pl.when(k == 0)
    def _():
        acc_ref[...] = jnp.zeros_like(acc_ref)

    acc_ref[...] += jnp.dot(a_ref[...], w_ref[...],
                            preferred_element_type=jnp.float32)

    @pl.when(k == pl.num_programs(2) - 1)
    def _():
        out = acc_ref[...] + b_ref[...]            # f32 epilogue (VPU)
        if leaky_slope is not None:
            out = jnp.where(out >= 0, out, leaky_slope * out)
        o_ref[...] = out.astype(o_ref.dtype)


def _inorm_lrelu_kernel(x_ref, o_ref, *, eps, leaky_slope):
    # x: (1, HW, tc) -- InstanceNorm2d (biased var, eps=1e-5, affine=False)
    # per (instance, channel): reduce over the spatial axis (axis=1) in f32,
    # channels stay on the lane axis.  Followed by LeakyReLU(0.2).
    x = x_ref[...].astype(jnp.float32)
    mean = jnp.mean(x, axis=1, keepdims=True)
    var = jnp.mean(jnp.square(x - mean), axis=1, keepdims=True)
    y = (x - mean) * jax.lax.rsqrt(var + eps)
    y = jnp.where(y >= 0, y, leaky_slope * y)
    o_ref[...] = y.astype(o_ref.dtype)


# ------------------------- Pallas wrappers -------------------------

def pallas_matmul_bias(a, w, b, *, leaky_slope=None, out_dtype=jnp.bfloat16):
    """(M,K) @ (K,N) + b, optional fused LeakyReLU.  Tiled, bf16 in / f32 acc."""
    M, K = a.shape
    K2, N = w.shape
    assert K == K2

    K_pad = _round_up(K, 128)
    N_pad = _round_up(N, 128)
    tk = _pick_tile(K_pad, (512, 384, 256, 128))
    tn = _pick_tile(N_pad, (256, 128))
    if M >= 256:
        tm = 256
        M_pad = _round_up(M, tm)
    else:
        tm = _round_up(M, 8)
        M_pad = tm

    # Zero padding is exact for the matmul; padded output cols are sliced off.
    a_p = jnp.pad(a.astype(jnp.bfloat16), ((0, M_pad - M), (0, K_pad - K)))
    w_p = jnp.pad(w.astype(jnp.bfloat16), ((0, K_pad - K), (0, N_pad - N)))
    b_p = jnp.pad(b.astype(jnp.float32), (0, N_pad - N)).reshape(1, N_pad)

    kern = functools.partial(_matmul_bias_kernel, leaky_slope=leaky_slope)
    out = pl.pallas_call(
        kern,
        out_shape=jax.ShapeDtypeStruct((M_pad, N_pad), out_dtype),
        grid_spec=pltpu.PrefetchScalarGridSpec(
            num_scalar_prefetch=0,
            grid=(M_pad // tm, N_pad // tn, K_pad // tk),
            in_specs=[
                pl.BlockSpec((tm, tk), lambda i, j, k: (i, k)),
                pl.BlockSpec((tk, tn), lambda i, j, k: (k, j)),
                pl.BlockSpec((1, tn), lambda i, j, k: (0, j)),
            ],
            out_specs=pl.BlockSpec((tm, tn), lambda i, j, k: (i, j)),
            scratch_shapes=[pltpu.VMEM((tm, tn), jnp.float32)],
        ),
        compiler_params=pltpu.CompilerParams(
            dimension_semantics=("parallel", "parallel", "arbitrary"),
            vmem_limit_bytes=32 * 1024 * 1024,
        ),
    )(a_p, w_p, b_p)
    return out[:M, :N]


def pallas_instnorm_lrelu(x, *, eps=1e-5, leaky_slope=0.2):
    """x: (N, HW, C), channels-last (lane-dense). Stats over HW stay in-block."""
    N, HW, C = x.shape
    tc = _pick_tile(C, (256, 128))
    kern = functools.partial(_inorm_lrelu_kernel, eps=eps, leaky_slope=leaky_slope)
    return pl.pallas_call(
        kern,
        out_shape=jax.ShapeDtypeStruct(x.shape, x.dtype),
        grid_spec=pltpu.PrefetchScalarGridSpec(
            num_scalar_prefetch=0,
            grid=(N, C // tc),
            in_specs=[pl.BlockSpec((1, HW, tc), lambda n, c: (n, 0, c))],
            out_specs=pl.BlockSpec((1, HW, tc), lambda n, c: (n, 0, c)),
        ),
        compiler_params=pltpu.CompilerParams(
            dimension_semantics=("parallel", "parallel"),
        ),
    )(x)


# ------------------------- glue (plain JAX) -------------------------

def im2col(x, kh, kw, stride, pad):
    # x: (N, H, W, C) bf16 -> (N*OH*OW, KH*KW*C); patch channel order (kh,kw,cin)
    if pad:
        x = jnp.pad(x, ((0, 0), (pad, pad), (pad, pad), (0, 0)))
    N, Hp, Wp, C = x.shape
    oh = (Hp - kh) // stride + 1
    ow = (Wp - kw) // stride + 1
    cols = []
    for i in range(kh):
        for j in range(kw):
            sl = jax.lax.slice(
                x,
                (0, i, j, 0),
                (N, i + stride * (oh - 1) + 1, j + stride * (ow - 1) + 1, C),
                (1, stride, stride, 1),
            )
            cols.append(sl)  # (N, oh, ow, C)
    patches = jnp.stack(cols, axis=3)  # (N, oh, ow, kh*kw, C)
    return patches.reshape(N * oh * ow, kh * kw * C), oh, ow


def conv2d(x, w_ocikk, b, *, stride, pad, leaky=None, out_dtype=jnp.bfloat16):
    # x: (N,H,W,Cin) bf16, w_ocikk: (Cout,Cin,KH,KW) [PyTorch layout], b: (Cout,)
    Cout, Cin, KH, KW = w_ocikk.shape
    patches, oh, ow = im2col(x, KH, KW, stride, pad)
    w2d = jnp.transpose(w_ocikk, (2, 3, 1, 0)).reshape(KH * KW * Cin, Cout)
    out = pallas_matmul_bias(patches, w2d, b, leaky_slope=leaky,
                             out_dtype=out_dtype)
    return out.reshape(x.shape[0], oh, ow, Cout)


def init_params(key, input_channels=3):
    dims = [(64, input_channels), (128, 64), (256, 128), (512, 256), (1, 512)]
    params = {}
    for idx, (cout, cin) in enumerate(dims, start=1):
        key, kw_, kb_ = jax.random.split(key, 3)
        fan_in = cin * 4 * 4
        bound = 1.0 / jnp.sqrt(fan_in)
        params[f"w{idx}"] = jax.random.uniform(
            kw_, (cout, cin, 4, 4), jnp.float32, -bound, bound)
        params[f"b{idx}"] = jax.random.uniform(
            kb_, (cout,), jnp.float32, -bound, bound)
    return params


def discriminator_forward(x_nchw, params):
    x = jnp.transpose(x_nchw, (0, 2, 3, 1)).astype(jnp.bfloat16)  # -> NHWC bf16

    # block 1: conv + LeakyReLU (no norm), LeakyReLU fused into matmul epilogue
    x = conv2d(x, params["w1"], params["b1"], stride=2, pad=1, leaky=0.2)

    # blocks 2-4: conv -> InstanceNorm2d -> LeakyReLU (channels-last, no transposes)
    for i in (2, 3, 4):
        x = conv2d(x, params[f"w{i}"], params[f"b{i}"], stride=2, pad=1)
        N, H, W, C = x.shape
        x = pallas_instnorm_lrelu(x.reshape(N, H * W, C)).reshape(N, H, W, C)

    # ZeroPad2d((left=1, right=0, top=1, bottom=0))
    x = jnp.pad(x, ((0, 0), (1, 0), (1, 0), (0, 0)))
    # final conv 512 -> 1, k=4, s=1, p=1.  Cout is padded to a lane-dense 128
    # inside pallas_matmul_bias and sliced back; final output kept in f32.
    x = conv2d(x, params["w5"], params["b5"], stride=1, pad=1,
               out_dtype=jnp.float32)

    return jnp.transpose(x, (0, 3, 1, 2))  # back to NCHW


if __name__ == "__main__":
    key = jax.random.PRNGKey(0)
    kp, kx = jax.random.split(key)
    params = init_params(kp, input_channels=3)

    # small but structurally meaningful input: (N=2, C=3, H=W=32)
    x = jax.random.normal(kx, (2, 3, 32, 32), jnp.float32)

    fwd = jax.jit(discriminator_forward)
    out = fwd(x, params)
    out = jax.block_until_ready(out)
    assert out.shape == (2, 1, 2, 2), out.shape
    assert out.dtype == jnp.float32, out.dtype
    print("KERNEL_OK")
</pallas_src>

<mosaic_0001>
module attributes {stable_mosaic.version = 11 : i64} {
  func.func @_matmul_bias_kernel(%arg0: i32, %arg1: i32, %arg2: i32, %arg3: memref<256x128xbf16, #tpu.memory_space<vmem>>, %arg4: memref<128x128xbf16, #tpu.memory_space<vmem>>, %arg5: memref<1x128xf32, #tpu.memory_space<vmem>>, %arg6: memref<256x128xbf16, #tpu.memory_space<vmem>>, %arg7: memref<256x128xf32, #tpu.memory_space<vmem>>) attributes {dimension_semantics = [#tpu.dimension_semantics<parallel>, #tpu.dimension_semantics<parallel>, #tpu.dimension_semantics<arbitrary>], iteration_bounds = array<i64: 2, 1, 1>, scalar_prefetch = 0 : i64, scratch_operands = 1 : i64, tpu.core_type = #tpu.core_type<tc>, window_params = [{transform_indices = @transform_0, window_bounds = array<i64: 256, 128>}, {transform_indices = @transform_1, window_bounds = array<i64: 128, 128>}, {transform_indices = @transform_2, window_bounds = array<i64: 1, 128>}, {transform_indices = @transform_3, window_bounds = array<i64: 256, 128>}]} {
    %c0_i32 = arith.constant 0 : i32
    %0 = arith.cmpi eq, %arg2, %c0_i32 : i32
    %1 = arith.extui %0 : i1 to i32
    %c0_i32_0 = arith.constant 0 : i32
    %2 = arith.cmpi ne, %1, %c0_i32_0 : i32
    scf.if %2 {
      %cst_10 = arith.constant 0.000000e+00 : f32
      %12 = vector.broadcast %cst_10 : f32 to vector<256x128xf32>
      %c0_11 = arith.constant 0 : index
      %c0_12 = arith.constant 0 : index
      %13 = vector.load %arg7[%c0_11, %c0_12] : memref<256x128xf32, #tpu.memory_space<vmem>>, vector<256x128xf32>
      tpu.vector_store %arg7[%c0_11, %c0_12], %12 {strides = array<i32>} : memref<256x128xf32, #tpu.memory_space<vmem>>, vector<256x128xf32>,
    } else {
    }
    %c0 = arith.constant 0 : index
    %c0_1 = arith.constant 0 : index
    %3 = vector.load %arg7[%c0, %c0_1] : memref<256x128xf32, #tpu.memory_space<vmem>>, vector<256x128xf32>
    %c0_2 = arith.constant 0 : index
    %c0_3 = arith.constant 0 : index
    %4 = vector.load %arg3[%c0_2, %c0_3] : memref<256x128xbf16, #tpu.memory_space<vmem>>, vector<256x128xbf16>
    %c0_4 = arith.constant 0 : index
    %c0_5 = arith.constant 0 : index
    %5 = vector.load %arg4[%c0_4, %c0_5] : memref<128x128xbf16, #tpu.memory_space<vmem>>, vector<128x128xbf16>
    %cst = arith.constant dense<0.000000e+00> : vector<256x128xf32>
    %6 = tpu.matmul %4, %5, %cst {dimension_numbers = #tpu.dot_dimension_numbers<[1], [0], [0], [1], [0, 0, 1, 1], [], []>} : vector<256x128xbf16>, vector<128x128xbf16>, vector<256x128xf32> -> vector<256x128xf32>
    %7 = arith.addf %3, %6 : vector<256x128xf32>
    %c0_6 = arith.constant 0 : index
    %c0_7 = arith.constant 0 : index
    %8 = vector.load %arg7[%c0_6, %c0_7] : memref<256x128xf32, #tpu.memory_space<vmem>>, vector<256x128xf32>
    tpu.vector_store %arg7[%c0_6, %c0_7], %7 {strides = array<i32>} : memref<256x128xf32, #tpu.memory_space<vmem>>, vector<256x128xf32>,
    %c0_i32_8 = arith.constant 0 : i32
    %9 = arith.cmpi eq, %arg2, %c0_i32_8 : i32
    %10 = arith.extui %9 : i1 to i32
    %c0_i32_9 = arith.constant 0 : i32
    %11 = arith.cmpi ne, %10, %c0_i32_9 : i32
    scf.if %11 {
      %c0_10 = arith.constant 0 : index
      %c0_11 = arith.constant 0 : index
      %12 = vector.load %arg7[%c0_10, %c0_11] : memref<256x128xf32, #tpu.memory_space<vmem>>, vector<256x128xf32>
      %c0_12 = arith.constant 0 : index
      %c0_13 = arith.constant 0 : index
      %13 = vector.load %arg5[%c0_12, %c0_13] : memref<1x128xf32, #tpu.memory_space<vmem>>, vector<1x128xf32>
      %14 = vector.broadcast %13 : vector<1x128xf32> to vector<256x128xf32>
      %15 = arith.addf %12, %14 : vector<256x128xf32>
      %cst_14 = arith.constant 0.000000e+00 : f32
      %16 = vector.broadcast %cst_14 : f32 to vector<256x128xf32>
      %17 = arith.cmpf oge, %15, %16 : vector<256x128xf32>
      %cst_15 = arith.constant 2.000000e-01 : f32
      %18 = vector.broadcast %cst_15 : f32 to vector<256x128xf32>
      %19 = arith.mulf %18, %15 : vector<256x128xf32>
      %20 = arith.select %17, %15, %19 : vector<256x128xi1>, vector<256x128xf32>
      %21 = arith.truncf %20 : vector<256x128xf32> to vector<256x128xbf16>
      %c0_16 = arith.constant 0 : index
      %c0_17 = arith.constant 0 : index
      %22 = vector.load %arg6[%c0_16, %c0_17] : memref<256x128xbf16, #tpu.memory_space<vmem>>, vector<256x128xbf16>
      tpu.vector_store %arg6[%c0_16, %c0_17], %21 {strides = array<i32>} : memref<256x128xbf16, #tpu.memory_space<vmem>>, vector<256x128xbf16>,
    } else {
    }
    return
  }
  func.func @transform_0(%arg0: i32, %arg1: i32, %arg2: i32) -> (i32, i32) {
    %c0_i32 = arith.constant 0 : i32
    return %arg0, %arg2 : i32, i32
  }
  func.func @transform_1(%arg0: i32, %arg1: i32, %arg2: i32) -> (i32, i32) {
    %c0_i32 = arith.constant 0 : i32
    return %arg2, %arg1 : i32, i32
  }
  func.func @transform_2(%arg0: i32, %arg1: i32, %arg2: i32) -> (i32, i32) {
    %c0_i32 = arith.constant 0 : i32
    %c0_i32_0 = arith.constant 0 : i32
    return %c0_i32, %arg1 : i32, i32
  }
  func.func @transform_3(%arg0: i32, %arg1: i32, %arg2: i32) -> (i32, i32) {
    %c0_i32 = arith.constant 0 : i32
    return %arg0, %arg1 : i32, i32
  }
}

module attributes {stable_mosaic.version = 11 : i64} {
  func.func @_matmul_bias_kernel(%arg0: i32, %arg1: i32, %arg2: i32, %arg3: memref<128x512xbf16, #tpu.memory_space<vmem>>, %arg4: memref<512x128xbf16, #tpu.memory_space<vmem>>, %arg5: memref<1x128xf32, #tpu.memory_space<vmem>>, %arg6: memref<128x128xbf16, #tpu.memory_space<vmem>>, %arg7: memref<128x128xf32, #tpu.memory_space<vmem>>) attributes {dimension_semantics = [#tpu.dimension_semantics<parallel>, #tpu.dimension_semantics<parallel>, #tpu.dimension_semantics<arbitrary>], iteration_bounds = array<i64: 1, 1, 2>, scalar_prefetch = 0 : i64, scratch_operands = 1 : i64, tpu.core_type = #tpu.core_type<tc>, window_params = [{transform_indices = @transform_0, window_bounds = array<i64: 128, 512>}, {transform_indices = @transform_1, window_bounds = array<i64: 512, 128>}, {transform_indices = @transform_2, window_bounds = array<i64: 1, 128>}, {transform_indices = @transform_3, window_bounds = array<i64: 128, 128>}]} {
    %c0_i32 = arith.constant 0 : i32
    %0 = arith.cmpi eq, %arg2, %c0_i32 : i32
    %1 = arith.extui %0 : i1 to i32
    %c0_i32_0 = arith.constant 0 : i32
    %2 = arith.cmpi ne, %1, %c0_i32_0 : i32
    scf.if %2 {
      %cst_9 = arith.constant 0.000000e+00 : f32
      %12 = vector.broadcast %cst_9 : f32 to vector<128x128xf32>
      %c0_10 = arith.constant 0 : index
      %c0_11 = arith.constant 0 : index
      %13 = vector.load %arg7[%c0_10, %c0_11] : memref<128x128xf32, #tpu.memory_space<vmem>>, vector<128x128xf32>
      tpu.vector_store %arg7[%c0_10, %c0_11], %12 {strides = array<i32>} : memref<128x128xf32, #tpu.memory_space<vmem>>, vector<128x128xf32>,
    } else {
    }
    %c0 = arith.constant 0 : index
    %c0_1 = arith.constant 0 : index
    %3 = vector.load %arg7[%c0, %c0_1] : memref<128x128xf32, #tpu.memory_space<vmem>>, vector<128x128xf32>
    %c0_2 = arith.constant 0 : index
    %c0_3 = arith.constant 0 : index
    %4 = vector.load %arg3[%c0_2, %c0_3] : memref<128x512xbf16, #tpu.memory_space<vmem>>, vector<128x512xbf16>
    %c0_4 = arith.constant 0 : index
    %c0_5 = arith.constant 0 : index
    %5 = vector.load %arg4[%c0_4, %c0_5] : memref<512x128xbf16, #tpu.memory_space<vmem>>, vector<512x128xbf16>
    %cst = arith.constant dense<0.000000e+00> : vector<128x128xf32>
    %6 = tpu.matmul %4, %5, %cst {dimension_numbers = #tpu.dot_dimension_numbers<[1], [0], [0], [1], [0, 0, 1, 1], [], []>} : vector<128x512xbf16>, vector<512x128xbf16>, vector<128x128xf32> -> vector<128x128xf32>
    %7 = arith.addf %3, %6 : vector<128x128xf32>
    %c0_6 = arith.constant 0 : index
    %c0_7 = arith.constant 0 : index
    %8 = vector.load %arg7[%c0_6, %c0_7] : memref<128x128xf32, #tpu.memory_space<vmem>>, vector<128x128xf32>
    tpu.vector_store %arg7[%c0_6, %c0_7], %7 {strides = array<i32>} : memref<128x128xf32, #tpu.memory_space<vmem>>, vector<128x128xf32>,
    %c1_i32 = arith.constant 1 : i32
    %9 = arith.cmpi eq, %arg2, %c1_i32 : i32
    %10 = arith.extui %9 : i1 to i32
    %c0_i32_8 = arith.constant 0 : i32
    %11 = arith.cmpi ne, %10, %c0_i32_8 : i32
    scf.if %11 {
      %c0_9 = arith.constant 0 : index
      %c0_10 = arith.constant 0 : index
      %12 = vector.load %arg7[%c0_9, %c0_10] : memref<128x128xf32, #tpu.memory_space<vmem>>, vector<128x128xf32>
      %c0_11 = arith.constant 0 : index
      %c0_12 = arith.constant 0 : index
      %13 = vector.load %arg5[%c0_11, %c0_12] : memref<1x128xf32, #tpu.memory_space<vmem>>, vector<1x128xf32>
      %14 = vector.broadcast %13 : vector<1x128xf32> to vector<128x128xf32>
      %15 = arith.addf %12, %14 : vector<128x128xf32>
      %16 = arith.truncf %15 : vector<128x128xf32> to vector<128x128xbf16>
      %c0_13 = arith.constant 0 : index
      %c0_14 = arith.constant 0 : index
      %17 = vector.load %arg6[%c0_13, %c0_14] : memref<128x128xbf16, #tpu.memory_space<vmem>>, vector<128x128xbf16>
      tpu.vector_store %arg6[%c0_13, %c0_14], %16 {strides = array<i32>} : memref<128x128xbf16, #tpu.memory_space<vmem>>, vector<128x128xbf16>,
    } else {
    }
    return
  }
  func.func @transform_0(%arg0: i32, %arg1: i32, %arg2: i32) -> (i32, i32) {
    %c0_i32 = arith.constant 0 : i32
    return %arg0, %arg2 : i32, i32
  }
  func.func @transform_1(%arg0: i32, %arg1: i32, %arg2: i32) -> (i32, i32) {
    %c0_i32 = arith.constant 0 : i32
    return %arg2, %arg1 : i32, i32
  }
  func.func @transform_2(%arg0: i32, %arg1: i32, %arg2: i32) -> (i32, i32) {
    %c0_i32 = arith.constant 0 : i32
    %c0_i32_0 = arith.constant 0 : i32
    return %c0_i32, %arg1 : i32, i32
  }
  func.func @transform_3(%arg0: i32, %arg1: i32, %arg2: i32) -> (i32, i32) {
    %c0_i32 = arith.constant 0 : i32
    return %arg0, %arg1 : i32, i32
  }
}

module attributes {stable_mosaic.version = 11 : i64} {
  func.func @_inorm_lrelu_kernel(%arg0: i32, %arg1: i32, %arg2: memref<1x64x128xbf16, #tpu.memory_space<vmem>>, %arg3: memref<1x64x128xbf16, #tpu.memory_space<vmem>>) attributes {dimension_semantics = [#tpu.dimension_semantics<parallel>, #tpu.dimension_semantics<parallel>], iteration_bounds = array<i64: 2, 1>, scalar_prefetch = 0 : i64, scratch_operands = 0 : i64, tpu.core_type = #tpu.core_type<tc>, window_params = [{transform_indices = @transform_0, window_bounds = array<i64: 1, 64, 128>}, {transform_indices = @transform_1, window_bounds = array<i64: 1, 64, 128>}]} {
    %c0 = arith.constant 0 : index
    %c0_0 = arith.constant 0 : index
    %c0_1 = arith.constant 0 : index
    %0 = vector.load %arg2[%c0, %c0_0, %c0_1] : memref<1x64x128xbf16, #tpu.memory_space<vmem>>, vector<1x64x128xbf16>
    %1 = arith.extf %0 : vector<1x64x128xbf16> to vector<1x64x128xf32>
    %cst = arith.constant dense<0.000000e+00> : vector<1x128xf32>
    %2 = vector.multi_reduction <add>, %1, %cst [1] : vector<1x64x128xf32> to vector<1x128xf32>
    %3 = vector.shape_cast %2 : vector<1x128xf32> to vector<1x1x128xf32>
    %cst_2 = arith.constant 6.400000e+01 : f32
    %4 = vector.broadcast %cst_2 : f32 to vector<1x1x128xf32>
    %5 = arith.divf %3, %4 : vector<1x1x128xf32>
    %6 = vector.broadcast %5 : vector<1x1x128xf32> to vector<1x64x128xf32>
    %7 = arith.subf %1, %6 : vector<1x64x128xf32>
    %8 = arith.mulf %7, %7 : vector<1x64x128xf32>
    %cst_3 = arith.constant dense<0.000000e+00> : vector<1x128xf32>
    %9 = vector.multi_reduction <add>, %8, %cst_3 [1] : vector<1x64x128xf32> to vector<1x128xf32>
    %10 = vector.shape_cast %9 : vector<1x128xf32> to vector<1x1x128xf32>
    %cst_4 = arith.constant 6.400000e+01 : f32
    %11 = vector.broadcast %cst_4 : f32 to vector<1x1x128xf32>
    %12 = arith.divf %10, %11 : vector<1x1x128xf32>
    %13 = vector.broadcast %5 : vector<1x1x128xf32> to vector<1x64x128xf32>
    %14 = arith.subf %1, %13 : vector<1x64x128xf32>
    %cst_5 = arith.constant 9.99999974E-6 : f32
    %15 = vector.broadcast %cst_5 : f32 to vector<1x1x128xf32>
    %16 = arith.addf %12, %15 : vector<1x1x128xf32>
    %17 = math.rsqrt %16 : vector<1x1x128xf32>
    %18 = vector.broadcast %17 : vector<1x1x128xf32> to vector<1x64x128xf32>
    %19 = arith.mulf %14, %18 : vector<1x64x128xf32>
    %cst_6 = arith.constant 0.000000e+00 : f32
    %20 = vector.broadcast %cst_6 : f32 to vector<1x64x128xf32>
    %21 = arith.cmpf oge, %19, %20 : vector<1x64x128xf32>
    %cst_7 = arith.constant 2.000000e-01 : f32
    %22 = vector.broadcast %cst_7 : f32 to vector<1x64x128xf32>
    %23 = arith.mulf %22, %19 : vector<1x64x128xf32>
    %24 = arith.select %21, %19, %23 : vector<1x64x128xi1>, vector<1x64x128xf32>
    %25 = arith.truncf %24 : vector<1x64x128xf32> to vector<1x64x128xbf16>
    %c0_8 = arith.constant 0 : index
    %c0_9 = arith.constant 0 : index
    %c0_10 = arith.constant 0 : index
    %26 = vector.load %arg3[%c0_8, %c0_9, %c0_10] : memref<1x64x128xbf16, #tpu.memory_space<vmem>>, vector<1x64x128xbf16>
    tpu.vector_store %arg3[%c0_8, %c0_9, %c0_10], %25 {strides = array<i32>} : memref<1x64x128xbf16, #tpu.memory_space<vmem>>, vector<1x64x128xbf16>,
    return
  }
  func.func @transform_0(%arg0: i32, %arg1: i32) -> (i32, i32, i32) {
    %c0_i32 = arith.constant 0 : i32
    %c0_i32_0 = arith.constant 0 : i32
    return %arg0, %c0_i32, %arg1 : i32, i32, i32
  }
  func.func @transform_1(%arg0: i32, %arg1: i32) -> (i32, i32, i32) {
    %c0_i32 = arith.constant 0 : i32
    %c0_i32_0 = arith.constant 0 : i32
    return %arg0, %c0_i32, %arg1 : i32, i32, i32
  }
}

module attributes {stable_mosaic.version = 11 : i64} {
  func.func @_matmul_bias_kernel(%arg0: i32, %arg1: i32, %arg2: i32, %arg3: memref<32x512xbf16, #tpu.memory_space<vmem>>, %arg4: memref<512x256xbf16, #tpu.memory_space<vmem>>, %arg5: memref<1x256xf32, #tpu.memory_space<vmem>>, %arg6: memref<32x256xbf16, #tpu.memory_space<vmem>>, %arg7: memref<32x256xf32, #tpu.memory_space<vmem>>) attributes {dimension_semantics = [#tpu.dimension_semantics<parallel>, #tpu.dimension_semantics<parallel>, #tpu.dimension_semantics<arbitrary>], iteration_bounds = array<i64: 1, 1, 4>, scalar_prefetch = 0 : i64, scratch_operands = 1 : i64, tpu.core_type = #tpu.core_type<tc>, window_params = [{transform_indices = @transform_0, window_bounds = array<i64: 32, 512>}, {transform_indices = @transform_1, window_bounds = array<i64: 512, 256>}, {transform_indices = @transform_2, window_bounds = array<i64: 1, 256>}, {transform_indices = @transform_3, window_bounds = array<i64: 32, 256>}]} {
    %c0_i32 = arith.constant 0 : i32
    %0 = arith.cmpi eq, %arg2, %c0_i32 : i32
    %1 = arith.extui %0 : i1 to i32
    %c0_i32_0 = arith.constant 0 : i32
    %2 = arith.cmpi ne, %1, %c0_i32_0 : i32
    scf.if %2 {
      %cst_9 = arith.constant 0.000000e+00 : f32
      %12 = vector.broadcast %cst_9 : f32 to vector<32x256xf32>
      %c0_10 = arith.constant 0 : index
      %c0_11 = arith.constant 0 : index
      %13 = vector.load %arg7[%c0_10, %c0_11] : memref<32x256xf32, #tpu.memory_space<vmem>>, vector<32x256xf32>
      tpu.vector_store %arg7[%c0_10, %c0_11], %12 {strides = array<i32>} : memref<32x256xf32, #tpu.memory_space<vmem>>, vector<32x256xf32>,
    } else {
    }
    %c0 = arith.constant 0 : index
    %c0_1 = arith.constant 0 : index
    %3 = vector.load %arg7[%c0, %c0_1] : memref<32x256xf32, #tpu.memory_space<vmem>>, vector<32x256xf32>
    %c0_2 = arith.constant 0 : index
    %c0_3 = arith.constant 0 : index
    %4 = vector.load %arg3[%c0_2, %c0_3] : memref<32x512xbf16, #tpu.memory_space<vmem>>, vector<32x512xbf16>
    %c0_4 = arith.constant 0 : index
    %c0_5 = arith.constant 0 : index
    %5 = vector.load %arg4[%c0_4, %c0_5] : memref<512x256xbf16, #tpu.memory_space<vmem>>, vector<512x256xbf16>
    %cst = arith.constant dense<0.000000e+00> : vector<32x256xf32>
    %6 = tpu.matmul %4, %5, %cst {dimension_numbers = #tpu.dot_dimension_numbers<[1], [0], [0], [1], [0, 0, 1, 1], [], []>} : vector<32x512xbf16>, vector<512x256xbf16>, vector<32x256xf32> -> vector<32x256xf32>
    %7 = arith.addf %3, %6 : vector<32x256xf32>
    %c0_6 = arith.constant 0 : index
    %c0_7 = arith.constant 0 : index
    %8 = vector.load %arg7[%c0_6, %c0_7] : memref<32x256xf32, #tpu.memory_space<vmem>>, vector<32x256xf32>
    tpu.vector_store %arg7[%c0_6, %c0_7], %7 {strides = array<i32>} : memref<32x256xf32, #tpu.memory_space<vmem>>, vector<32x256xf32>,
    %c3_i32 = arith.constant 3 : i32
    %9 = arith.cmpi eq, %arg2, %c3_i32 : i32
    %10 = arith.extui %9 : i1 to i32
    %c0_i32_8 = arith.constant 0 : i32
    %11 = arith.cmpi ne, %10, %c0_i32_8 : i32
    scf.if %11 {
      %c0_9 = arith.constant 0 : index
      %c0_10 = arith.constant 0 : index
      %12 = vector.load %arg7[%c0_9, %c0_10] : memref<32x256xf32, #tpu.memory_space<vmem>>, vector<32x256xf32>
      %c0_11 = arith.constant 0 : index
      %c0_12 = arith.constant 0 : index
      %13 = vector.load %arg5[%c0_11, %c0_12] : memref<1x256xf32, #tpu.memory_space<vmem>>, vector<1x256xf32>
      %14 = vector.broadcast %13 : vector<1x256xf32> to vector<32x256xf32>
      %15 = arith.addf %12, %14 : vector<32x256xf32>
      %16 = arith.truncf %15 : vector<32x256xf32> to vector<32x256xbf16>
      %c0_13 = arith.constant 0 : index
      %c0_14 = arith.constant 0 : index
      %17 = vector.load %arg6[%c0_13, %c0_14] : memref<32x256xbf16, #tpu.memory_space<vmem>>, vector<32x256xbf16>
      tpu.vector_store %arg6[%c0_13, %c0_14], %16 {strides = array<i32>} : memref<32x256xbf16, #tpu.memory_space<vmem>>, vector<32x256xbf16>,
    } else {
    }
    return
  }
  func.func @transform_0(%arg0: i32, %arg1: i32, %arg2: i32) -> (i32, i32) {
    %c0_i32 = arith.constant 0 : i32
    return %arg0, %arg2 : i32, i32
  }
  func.func @transform_1(%arg0: i32, %arg1: i32, %arg2: i32) -> (i32, i32) {
    %c0_i32 = arith.constant 0 : i32
    return %arg2, %arg1 : i32, i32
  }
  func.func @transform_2(%arg0: i32, %arg1: i32, %arg2: i32) -> (i32, i32) {
    %c0_i32 = arith.constant 0 : i32
    %c0_i32_0 = arith.constant 0 : i32
    return %c0_i32, %arg1 : i32, i32
  }
  func.func @transform_3(%arg0: i32, %arg1: i32, %arg2: i32) -> (i32, i32) {
    %c0_i32 = arith.constant 0 : i32
    return %arg0, %arg1 : i32, i32
  }
}

module attributes {stable_mosaic.version = 11 : i64} {
  func.func @_inorm_lrelu_kernel(%arg0: i32, %arg1: i32, %arg2: memref<1x16x256xbf16, #tpu.memory_space<vmem>>, %arg3: memref<1x16x256xbf16, #tpu.memory_space<vmem>>) attributes {dimension_semantics = [#tpu.dimension_semantics<parallel>, #tpu.dimension_semantics<parallel>], iteration_bounds = array<i64: 2, 1>, scalar_prefetch = 0 : i64, scratch_operands = 0 : i64, tpu.core_type = #tpu.core_type<tc>, window_params = [{transform_indices = @transform_0, window_bounds = array<i64: 1, 16, 256>}, {transform_indices = @transform_1, window_bounds = array<i64: 1, 16, 256>}]} {
    %c0 = arith.constant 0 : index
    %c0_0 = arith.constant 0 : index
    %c0_1 = arith.constant 0 : index
    %0 = vector.load %arg2[%c0, %c0_0, %c0_1] : memref<1x16x256xbf16, #tpu.memory_space<vmem>>, vector<1x16x256xbf16>
    %1 = arith.extf %0 : vector<1x16x256xbf16> to vector<1x16x256xf32>
    %cst = arith.constant dense<0.000000e+00> : vector<1x256xf32>
    %2 = vector.multi_reduction <add>, %1, %cst [1] : vector<1x16x256xf32> to vector<1x256xf32>
    %3 = vector.shape_cast %2 : vector<1x256xf32> to vector<1x1x256xf32>
    %cst_2 = arith.constant 1.600000e+01 : f32
    %4 = vector.broadcast %cst_2 : f32 to vector<1x1x256xf32>
    %5 = arith.divf %3, %4 : vector<1x1x256xf32>
    %6 = vector.broadcast %5 : vector<1x1x256xf32> to vector<1x16x256xf32>
    %7 = arith.subf %1, %6 : vector<1x16x256xf32>
    %8 = arith.mulf %7, %7 : vector<1x16x256xf32>
    %cst_3 = arith.constant dense<0.000000e+00> : vector<1x256xf32>
    %9 = vector.multi_reduction <add>, %8, %cst_3 [1] : vector<1x16x256xf32> to vector<1x256xf32>
    %10 = vector.shape_cast %9 : vector<1x256xf32> to vector<1x1x256xf32>
    %cst_4 = arith.constant 1.600000e+01 : f32
    %11 = vector.broadcast %cst_4 : f32 to vector<1x1x256xf32>
    %12 = arith.divf %10, %11 : vector<1x1x256xf32>
    %13 = vector.broadcast %5 : vector<1x1x256xf32> to vector<1x16x256xf32>
    %14 = arith.subf %1, %13 : vector<1x16x256xf32>
    %cst_5 = arith.constant 9.99999974E-6 : f32
    %15 = vector.broadcast %cst_5 : f32 to vector<1x1x256xf32>
    %16 = arith.addf %12, %15 : vector<1x1x256xf32>
    %17 = math.rsqrt %16 : vector<1x1x256xf32>
    %18 = vector.broadcast %17 : vector<1x1x256xf32> to vector<1x16x256xf32>
    %19 = arith.mulf %14, %18 : vector<1x16x256xf32>
    %cst_6 = arith.constant 0.000000e+00 : f32
    %20 = vector.broadcast %cst_6 : f32 to vector<1x16x256xf32>
    %21 = arith.cmpf oge, %19, %20 : vector<1x16x256xf32>
    %cst_7 = arith.constant 2.000000e-01 : f32
    %22 = vector.broadcast %cst_7 : f32 to vector<1x16x256xf32>
    %23 = arith.mulf %22, %19 : vector<1x16x256xf32>
    %24 = arith.select %21, %19, %23 : vector<1x16x256xi1>, vector<1x16x256xf32>
    %25 = arith.truncf %24 : vector<1x16x256xf32> to vector<1x16x256xbf16>
    %c0_8 = arith.constant 0 : index
    %c0_9 = arith.constant 0 : index
    %c0_10 = arith.constant 0 : index
    %26 = vector.load %arg3[%c0_8, %c0_9, %c0_10] : memref<1x16x256xbf16, #tpu.memory_space<vmem>>, vector<1x16x256xbf16>
    tpu.vector_store %arg3[%c0_8, %c0_9, %c0_10], %25 {strides = array<i32>} : memref<1x16x256xbf16, #tpu.memory_space<vmem>>, vector<1x16x256xbf16>,
    return
  }
  func.func @transform_0(%arg0: i32, %arg1: i32) -> (i32, i32, i32) {
    %c0_i32 = arith.constant 0 : i32
    %c0_i32_0 = arith.constant 0 : i32
    return %arg0, %c0_i32, %arg1 : i32, i32, i32
  }
  func.func @transform_1(%arg0: i32, %arg1: i32) -> (i32, i32, i32) {
    %c0_i32 = arith.constant 0 : i32
    %c0_i32_0 = arith.constant 0 : i32
    return %arg0, %c0_i32, %arg1 : i32, i32, i32
  }
}

module attributes {stable_mosaic.version = 11 : i64} {
  func.func @_matmul_bias_kernel(%arg0: i32, %arg1: i32, %arg2: i32, %arg3: memref<8x512xbf16, #tpu.memory_space<vmem>>, %arg4: memref<512x256xbf16, #tpu.memory_space<vmem>>, %arg5: memref<1x256xf32, #tpu.memory_space<vmem>>, %arg6: memref<8x256xbf16, #tpu.memory_space<vmem>>, %arg7: memref<8x256xf32, #tpu.memory_space<vmem>>) attributes {dimension_semantics = [#tpu.dimension_semantics<parallel>, #tpu.dimension_semantics<parallel>, #tpu.dimension_semantics<arbitrary>], iteration_bounds = array<i64: 1, 2, 8>, scalar_prefetch = 0 : i64, scratch_operands = 1 : i64, tpu.core_type = #tpu.core_type<tc>, window_params = [{transform_indices = @transform_0, window_bounds = array<i64: 8, 512>}, {transform_indices = @transform_1, window_bounds = array<i64: 512, 256>}, {transform_indices = @transform_2, window_bounds = array<i64: 1, 256>}, {transform_indices = @transform_3, window_bounds = array<i64: 8, 256>}]} {
    %c0_i32 = arith.constant 0 : i32
    %0 = arith.cmpi eq, %arg2, %c0_i32 : i32
    %1 = arith.extui %0 : i1 to i32
    %c0_i32_0 = arith.constant 0 : i32
    %2 = arith.cmpi ne, %1, %c0_i32_0 : i32
    scf.if %2 {
      %cst_9 = arith.constant 0.000000e+00 : f32
      %12 = vector.broadcast %cst_9 : f32 to vector<8x256xf32>
      %c0_10 = arith.constant 0 : index
      %c0_11 = arith.constant 0 : index
      %13 = vector.load %arg7[%c0_10, %c0_11] : memref<8x256xf32, #tpu.memory_space<vmem>>, vector<8x256xf32>
      tpu.vector_store %arg7[%c0_10, %c0_11], %12 {strides = array<i32>} : memref<8x256xf32, #tpu.memory_space<vmem>>, vector<8x256xf32>,
    } else {
    }
    %c0 = arith.constant 0 : index
    %c0_1 = arith.constant 0 : index
    %3 = vector.load %arg7[%c0, %c0_1] : memref<8x256xf32, #tpu.memory_space<vmem>>, vector<8x256xf32>
    %c0_2 = arith.constant 0 : index
    %c0_3 = arith.constant 0 : index
    %4 = vector.load %arg3[%c0_2, %c0_3] : memref<8x512xbf16, #tpu.memory_space<vmem>>, vector<8x512xbf16>
    %c0_4 = arith.constant 0 : index
    %c0_5 = arith.constant 0 : index
    %5 = vector.load %arg4[%c0_4, %c0_5] : memref<512x256xbf16, #tpu.memory_space<vmem>>, vector<512x256xbf16>
    %cst = arith.constant dense<0.000000e+00> : vector<8x256xf32>
    %6 = tpu.matmul %4, %5, %cst {dimension_numbers = #tpu.dot_dimension_numbers<[1], [0], [0], [1], [0, 0, 1, 1], [], []>} : vector<8x512xbf16>, vector<512x256xbf16>, vector<8x256xf32> -> vector<8x256xf32>
    %7 = arith.addf %3, %6 : vector<8x256xf32>
    %c0_6 = arith.constant 0 : index
    %c0_7 = arith.constant 0 : index
    %8 = vector.load %arg7[%c0_6, %c0_7] : memref<8x256xf32, #tpu.memory_space<vmem>>, vector<8x256xf32>
    tpu.vector_store %arg7[%c0_6, %c0_7], %7 {strides = array<i32>} : memref<8x256xf32, #tpu.memory_space<vmem>>, vector<8x256xf32>,
    %c7_i32 = arith.constant 7 : i32
    %9 = arith.cmpi eq, %arg2, %c7_i32 : i32
    %10 = arith.extui %9 : i1 to i32
    %c0_i32_8 = arith.constant 0 : i32
    %11 = arith.cmpi ne, %10, %c0_i32_8 : i32
    scf.if %11 {
      %c0_9 = arith.constant 0 : index
      %c0_10 = arith.constant 0 : index
      %12 = vector.load %arg7[%c0_9, %c0_10] : memref<8x256xf32, #tpu.memory_space<vmem>>, vector<8x256xf32>
      %c0_11 = arith.constant 0 : index
      %c0_12 = arith.constant 0 : index
      %13 = vector.load %arg5[%c0_11, %c0_12] : memref<1x256xf32, #tpu.memory_space<vmem>>, vector<1x256xf32>
      %14 = vector.broadcast %13 : vector<1x256xf32> to vector<8x256xf32>
      %15 = arith.addf %12, %14 : vector<8x256xf32>
      %16 = arith.truncf %15 : vector<8x256xf32> to vector<8x256xbf16>
      %c0_13 = arith.constant 0 : index
      %c0_14 = arith.constant 0 : index
      %17 = vector.load %arg6[%c0_13, %c0_14] : memref<8x256xbf16, #tpu.memory_space<vmem>>, vector<8x256xbf16>
      tpu.vector_store %arg6[%c0_13, %c0_14], %16 {strides = array<i32>} : memref<8x256xbf16, #tpu.memory_space<vmem>>, vector<8x256xbf16>,
    } else {
    }
    return
  }
  func.func @transform_0(%arg0: i32, %arg1: i32, %arg2: i32) -> (i32, i32) {
    %c0_i32 = arith.constant 0 : i32
    return %arg0, %arg2 : i32, i32
  }
  func.func @transform_1(%arg0: i32, %arg1: i32, %arg2: i32) -> (i32, i32) {
    %c0_i32 = arith.constant 0 : i32
    return %arg2, %arg1 : i32, i32
  }
  func.func @transform_2(%arg0: i32, %arg1: i32, %arg2: i32) -> (i32, i32) {
    %c0_i32 = arith.constant 0 : i32
    %c0_i32_0 = arith.constant 0 : i32
    return %c0_i32, %arg1 : i32, i32
  }
  func.func @transform_3(%arg0: i32, %arg1: i32, %arg2: i32) -> (i32, i32) {
    %c0_i32 = arith.constant 0 : i32
    return %arg0, %arg1 : i32, i32
  }
}

module attributes {stable_mosaic.version = 11 : i64} {
  func.func @_inorm_lrelu_kernel(%arg0: i32, %arg1: i32, %arg2: memref<1x4x256xbf16, #tpu.memory_space<vmem>>, %arg3: memref<1x4x256xbf16, #tpu.memory_space<vmem>>) attributes {dimension_semantics = [#tpu.dimension_semantics<parallel>, #tpu.dimension_semantics<parallel>], iteration_bounds = array<i64: 2, 2>, scalar_prefetch = 0 : i64, scratch_operands = 0 : i64, tpu.core_type = #tpu.core_type<tc>, window_params = [{transform_indices = @transform_0, window_bounds = array<i64: 1, 4, 256>}, {transform_indices = @transform_1, window_bounds = array<i64: 1, 4, 256>}]} {
    %c0 = arith.constant 0 : index
    %c0_0 = arith.constant 0 : index
    %c0_1 = arith.constant 0 : index
    %0 = vector.load %arg2[%c0, %c0_0, %c0_1] : memref<1x4x256xbf16, #tpu.memory_space<vmem>>, vector<1x4x256xbf16>
    %1 = arith.extf %0 : vector<1x4x256xbf16> to vector<1x4x256xf32>
    %cst = arith.constant dense<0.000000e+00> : vector<1x256xf32>
    %2 = vector.multi_reduction <add>, %1, %cst [1] : vector<1x4x256xf32> to vector<1x256xf32>
    %3 = vector.shape_cast %2 : vector<1x256xf32> to vector<1x1x256xf32>
    %cst_2 = arith.constant 4.000000e+00 : f32
    %4 = vector.broadcast %cst_2 : f32 to vector<1x1x256xf32>
    %5 = arith.divf %3, %4 : vector<1x1x256xf32>
    %6 = vector.broadcast %5 : vector<1x1x256xf32> to vector<1x4x256xf32>
    %7 = arith.subf %1, %6 : vector<1x4x256xf32>
    %8 = arith.mulf %7, %7 : vector<1x4x256xf32>
    %cst_3 = arith.constant dense<0.000000e+00> : vector<1x256xf32>
    %9 = vector.multi_reduction <add>, %8, %cst_3 [1] : vector<1x4x256xf32> to vector<1x256xf32>
    %10 = vector.shape_cast %9 : vector<1x256xf32> to vector<1x1x256xf32>
    %cst_4 = arith.constant 4.000000e+00 : f32
    %11 = vector.broadcast %cst_4 : f32 to vector<1x1x256xf32>
    %12 = arith.divf %10, %11 : vector<1x1x256xf32>
    %13 = vector.broadcast %5 : vector<1x1x256xf32> to vector<1x4x256xf32>
    %14 = arith.subf %1, %13 : vector<1x4x256xf32>
    %cst_5 = arith.constant 9.99999974E-6 : f32
    %15 = vector.broadcast %cst_5 : f32 to vector<1x1x256xf32>
    %16 = arith.addf %12, %15 : vector<1x1x256xf32>
    %17 = math.rsqrt %16 : vector<1x1x256xf32>
    %18 = vector.broadcast %17 : vector<1x1x256xf32> to vector<1x4x256xf32>
    %19 = arith.mulf %14, %18 : vector<1x4x256xf32>
    %cst_6 = arith.constant 0.000000e+00 : f32
    %20 = vector.broadcast %cst_6 : f32 to vector<1x4x256xf32>
    %21 = arith.cmpf oge, %19, %20 : vector<1x4x256xf32>
    %cst_7 = arith.constant 2.000000e-01 : f32
    %22 = vector.broadcast %cst_7 : f32 to vector<1x4x256xf32>
    %23 = arith.mulf %22, %19 : vector<1x4x256xf32>
    %24 = arith.select %21, %19, %23 : vector<1x4x256xi1>, vector<1x4x256xf32>
    %25 = arith.truncf %24 : vector<1x4x256xf32> to vector<1x4x256xbf16>
    %c0_8 = arith.constant 0 : index
    %c0_9 = arith.constant 0 : index
    %c0_10 = arith.constant 0 : index
    %26 = vector.load %arg3[%c0_8, %c0_9, %c0_10] : memref<1x4x256xbf16, #tpu.memory_space<vmem>>, vector<1x4x256xbf16>
    tpu.vector_store %arg3[%c0_8, %c0_9, %c0_10], %25 {strides = array<i32>} : memref<1x4x256xbf16, #tpu.memory_space<vmem>>, vector<1x4x256xbf16>,
    return
  }
  func.func @transform_0(%arg0: i32, %arg1: i32) -> (i32, i32, i32) {
    %c0_i32 = arith.constant 0 : i32
    %c0_i32_0 = arith.constant 0 : i32
    return %arg0, %c0_i32, %arg1 : i32, i32, i32
  }
  func.func @transform_1(%arg0: i32, %arg1: i32) -> (i32, i32, i32) {
    %c0_i32 = arith.constant 0 : i32
    %c0_i32_0 = arith.constant 0 : i32
    return %arg0, %c0_i32, %arg1 : i32, i32, i32
  }
}

module attributes {stable_mosaic.version = 11 : i64} {
  func.func @_matmul_bias_kernel(%arg0: i32, %arg1: i32, %arg2: i32, %arg3: memref<8x512xbf16, #tpu.memory_space<vmem>>, %arg4: memref<512x128xbf16, #tpu.memory_space<vmem>>, %arg5: memref<1x128xf32, #tpu.memory_space<vmem>>, %arg6: memref<8x128xf32, #tpu.memory_space<vmem>>, %arg7: memref<8x128xf32, #tpu.memory_space<vmem>>) attributes {dimension_semantics = [#tpu.dimension_semantics<parallel>, #tpu.dimension_semantics<parallel>, #tpu.dimension_semantics<arbitrary>], iteration_bounds = array<i64: 1, 1, 16>, scalar_prefetch = 0 : i64, scratch_operands = 1 : i64, tpu.core_type = #tpu.core_type<tc>, window_params = [{transform_indices = @transform_0, window_bounds = array<i64: 8, 512>}, {transform_indices = @transform_1, window_bounds = array<i64: 512, 128>}, {transform_indices = @transform_2, window_bounds = array<i64: 1, 128>}, {transform_indices = @transform_3, window_bounds = array<i64: 8, 128>}]} {
    %c0_i32 = arith.constant 0 : i32
    %0 = arith.cmpi eq, %arg2, %c0_i32 : i32
    %1 = arith.extui %0 : i1 to i32
    %c0_i32_0 = arith.constant 0 : i32
    %2 = arith.cmpi ne, %1, %c0_i32_0 : i32
    scf.if %2 {
      %cst_9 = arith.constant 0.000000e+00 : f32
      %12 = vector.broadcast %cst_9 : f32 to vector<8x128xf32>
      %c0_10 = arith.constant 0 : index
      %c0_11 = arith.constant 0 : index
      %13 = vector.load %arg7[%c0_10, %c0_11] : memref<8x128xf32, #tpu.memory_space<vmem>>, vector<8x128xf32>
      tpu.vector_store %arg7[%c0_10, %c0_11], %12 {strides = array<i32>} : memref<8x128xf32, #tpu.memory_space<vmem>>, vector<8x128xf32>,
    } else {
    }
    %c0 = arith.constant 0 : index
    %c0_1 = arith.constant 0 : index
    %3 = vector.load %arg7[%c0, %c0_1] : memref<8x128xf32, #tpu.memory_space<vmem>>, vector<8x128xf32>
    %c0_2 = arith.constant 0 : index
    %c0_3 = arith.constant 0 : index
    %4 = vector.load %arg3[%c0_2, %c0_3] : memref<8x512xbf16, #tpu.memory_space<vmem>>, vector<8x512xbf16>
    %c0_4 = arith.constant 0 : index
    %c0_5 = arith.constant 0 : index
    %5 = vector.load %arg4[%c0_4, %c0_5] : memref<512x128xbf16, #tpu.memory_space<vmem>>, vector<512x128xbf16>
    %cst = arith.constant dense<0.000000e+00> : vector<8x128xf32>
    %6 = tpu.matmul %4, %5, %cst {dimension_numbers = #tpu.dot_dimension_numbers<[1], [0], [0], [1], [0, 0, 1, 1], [], []>} : vector<8x512xbf16>, vector<512x128xbf16>, vector<8x128xf32> -> vector<8x128xf32>
    %7 = arith.addf %3, %6 : vector<8x128xf32>
    %c0_6 = arith.constant 0 : index
    %c0_7 = arith.constant 0 : index
    %8 = vector.load %arg7[%c0_6, %c0_7] : memref<8x128xf32, #tpu.memory_space<vmem>>, vector<8x128xf32>
    tpu.vector_store %arg7[%c0_6, %c0_7], %7 {strides = array<i32>} : memref<8x128xf32, #tpu.memory_space<vmem>>, vector<8x128xf32>,
    %c15_i32 = arith.constant 15 : i32
    %9 = arith.cmpi eq, %arg2, %c15_i32 : i32
    %10 = arith.extui %9 : i1 to i32
    %c0_i32_8 = arith.constant 0 : i32
    %11 = arith.cmpi ne, %10, %c0_i32_8 : i32
    scf.if %11 {
      %c0_9 = arith.constant 0 : index
      %c0_10 = arith.constant 0 : index
      %12 = vector.load %arg7[%c0_9, %c0_10] : memref<8x128xf32, #tpu.memory_space<vmem>>, vector<8x128xf32>
      %c0_11 = arith.constant 0 : index
      %c0_12 = arith.constant 0 : index
      %13 = vector.load %arg5[%c0_11, %c0_12] : memref<1x128xf32, #tpu.memory_space<vmem>>, vector<1x128xf32>
      %14 = vector.broadcast %13 : vector<1x128xf32> to vector<8x128xf32>
      %15 = arith.addf %12, %14 : vector<8x128xf32>
      %c0_13 = arith.constant 0 : index
      %c0_14 = arith.constant 0 : index
      %16 = vector.load %arg6[%c0_13, %c0_14] : memref<8x128xf32, #tpu.memory_space<vmem>>, vector<8x128xf32>
      tpu.vector_store %arg6[%c0_13, %c0_14], %15 {strides = array<i32>} : memref<8x128xf32, #tpu.memory_space<vmem>>, vector<8x128xf32>,
    } else {
    }
    return
  }
  func.func @transform_0(%arg0: i32, %arg1: i32, %arg2: i32) -> (i32, i32) {
    %c0_i32 = arith.constant 0 : i32
    return %arg0, %arg2 : i32, i32
  }
  func.func @transform_1(%arg0: i32, %arg1: i32, %arg2: i32) -> (i32, i32) {
    %c0_i32 = arith.constant 0 : i32
    return %arg2, %arg1 : i32, i32
  }
  func.func @transform_2(%arg0: i32, %arg1: i32, %arg2: i32) -> (i32, i32) {
    %c0_i32 = arith.constant 0 : i32
    %c0_i32_0 = arith.constant 0 : i32
    return %c0_i32, %arg1 : i32, i32
  }
  func.func @transform_3(%arg0: i32, %arg1: i32, %arg2: i32) -> (i32, i32) {
    %c0_i32 = arith.constant 0 : i32
    return %arg0, %arg1 : i32, i32
  }
}

</mosaic_0001>

<bundles_post_ra>
// kernel: discriminator_forward.8
= control target key start
LH: loop header
LB: loop body
LE: loop exit
PB: predicated region body
PF: predicated region fallthrough
CT: control target
= control target key end

     0   :  { %s1563_s12 = smov 0   ;;  %s1565_s13 = smov 0   ;;  %s1706_s0 = inlined_call_operand.vmem [shape: bf16[512,128], index: 0, kind: input, shape index: {}]   ;;  %s1707_s1 = inlined_call_operand.vmem [shape: bf16[128,128], index: 1, kind: input, shape index: {}]   ;;  %s1708_s2 = inlined_call_operand.vmem [shape: f32[1,128], index: 2, kind: input, shape index: {}]   ;;  %s1709_s3 = inlined_call_operand.vmem [shape: bf16[512,128], index: 3, kind: output, shape index: {}]  }
   0x1   :  { %s1567_s14 = smov 0  }
   0x2 LB: > { %s32_s15 = sadd.s32 1, %s1537_s13  ;;  %p1192_p0 = scmp.ge.s32.totalorder %s1541_s14, 1  ;;  %s1541_s14 = sphi %s1567_s14, %s13_s14   ;;  %s1537_s13 = sphi %s1565_s13, %s1711_s13   ;;  %s1533_s12 = sphi %s1563_s12, %s1710_s12  }
   0x3   : > { %p34_p1 = scmp.ge.s32.totalorder %s32_s15, 2  ;;  %p188_p2 = scmp.lt.s32.totalorder %s1541_s14, 3 }
   0x5   : > { %s1713_s15 = smov (%p34_p1, %s32_s15), 0  ;;  %p189_p3 = pnand %p1192_p0, %p188_p2 }
   0x6   : > { %v1495_v0 = vld [vmem:[%s1707_s1] sm:$0xff] (!%p189_p3)   ;;  %s1193_s18 = sshll.u32 (!%p189_p3), %s1533_s12, 5  ;;  %v1496_v1 = vld [vmem:[%s1707_s1 + $0x8] sm:$0xff] (!%p189_p3)   ;;  %v1497_v2 = vld [vmem:[%s1707_s1 + $0x10] sm:$0xff] (!%p189_p3)  }
   0x7   : > { %192 = sbr.rel (%p189_p3) target bundleno = 294 (0x126), region = 32  ;;  %p230_p4 = scmp.lt.s32.totalorder (!%p189_p3), %s1193_s18, 63  ;;  %1407 = vmatprep.subr.bf16.mxu0 (!%p189_p3), %v1495_v0  ;;  %1455 = vmatprep.subr.bf16.mxu1 (!%p189_p3), %v1495_v0  ;;  %v1498_v3 = vld [vmem:[%s1707_s1 + $0x18] sm:$0xff] (!%p189_p3)   ;;  %v1499_v6 = vld [vmem:[%s1707_s1 + $0x20] sm:$0xff] (!%p189_p3)   ;;  %v1500_v7 = vld [vmem:[%s1707_s1 + $0x28] sm:$0xff] (!%p189_p3)  }
   0x8   : > { %1408 = vmatpush3.bf16.msra.mxu0 (!%p189_p3), %v1495_v0  ;;  %1463 = vmatpush3.bf16.msra.mxu1 (!%p189_p3), %v1495_v0  ;;  %v1501_v8 = vld [vmem:[%s1707_s1 + $0x30] sm:$0xff] (!%p189_p3)   ;;  %v1502_v9 = vld [vmem:[%s1707_s1 + $0x38] sm:$0xff] (!%p189_p3)   ;;  %v1634_v24 = vld [vmem:[%s1708_s2] ss:$0 sm:$0xff] (!%p189_p3) }
   0x9   : > { %1409 = vmatprep.subr.bf16.mxu0 (!%p189_p3), %v1496_v1  ;;  %1456 = vmatprep.subr.bf16.mxu1 (!%p189_p3), %v1496_v1 }
   0xc   : > { %1410 = vmatpush3.bf16.msra.mxu0 (!%p189_p3), %v1496_v1  ;;  %1464 = vmatpush3.bf16.msra.mxu1 (!%p189_p3), %v1496_v1 }
   0xd   : > { %1411 = vmatprep.subr.bf16.mxu0 (!%p189_p3), %v1497_v2  ;;  %1457 = vmatprep.subr.bf16.mxu1 (!%p189_p3), %v1497_v2 }
   0xe   : > { %s1715_s18 = smov (!%p230_p4, %s1193_s18), 63 }
   0xf   : > { %s1194_s23 = sshll.u32 %s1715_s18, 2 }
  0x10   : > { %s1598_s26 = scalar_lea.vmem %s1706_s0, %s1194_s23  ;;  %1412 = vmatpush3.bf16.msra.mxu0 %v1497_v2  ;;  %1465 = vmatpush3.bf16.msra.mxu1 %v1497_v2  ;;  %s1651_s17 = scalar_lea.vmem %s1709_s3, %s1194_s23 }
  0x11   : > { %v1503_v4 = vld [vmem:[%s1598_s26] sm:$0xff]   ;;  %1413 = vmatprep.subr.bf16.mxu0 %v1498_v3  ;;  %1458 = vmatprep.subr.bf16.mxu1 %v1498_v3  ;;  %v1505_v10 = vld [vmem:[%s1598_s26 + $0x8] sm:$0xff]   ;;  %v1507_v12 = vld [vmem:[%s1598_s26 + $0x10] sm:$0xff]  }
  0x12   : > { %v1504_v5 = vld [vmem:[%s1598_s26 + $0x40] sm:$0xff]   ;;  %1423 = vmatprep.mubr.bf16.mxu0 %v1503_v4  ;;  %v1506_v11 = vld [vmem:[%s1598_s26 + $0x48] sm:$0xff]   ;;  %v1508_v13 = vld [vmem:[%s1598_s26 + $0x50] sm:$0xff]  }
  0x13   : > { %1439 = vmatprep.mubr.bf16.mxu1 %v1504_v5  ;;  %v1509_v14 = vld [vmem:[%s1598_s26 + $0x18] sm:$0xff]   ;;  %v1511_v16 = vld [vmem:[%s1598_s26 + $0x20] sm:$0xff]   ;;  %v1513_v18 = vld [vmem:[%s1598_s26 + $0x28] sm:$0xff]  }
  0x14   : > { %1414 = vmatpush3.bf16.msra.mxu0 %v1498_v3  ;;  %1466 = vmatpush3.bf16.msra.mxu1 %v1498_v3  ;;  %v1510_v15 = vld [vmem:[%s1598_s26 + $0x58] sm:$0xff]   ;;  %v1512_v17 = vld [vmem:[%s1598_s26 + $0x60] sm:$0xff]   ;;  %v1514_v19 = vld [vmem:[%s1598_s26 + $0x68] sm:$0xff]  }
  0x15   : > { %1415 = vmatprep.subr.bf16.mxu0 %v1499_v6  ;;  %1459 = vmatprep.subr.bf16.mxu1 %v1499_v6  ;;  %v1515_v20 = vld [vmem:[%s1598_s26 + $0x30] sm:$0xff]   ;;  %v1517_v22 = vld [vmem:[%s1598_s26 + $0x38] sm:$0xff]  }
  0x16   : > { %v1516_v21 = vld [vmem:[%s1598_s26 + $0x70] sm:$0xff]   ;;  %v1518_v23 = vld [vmem:[%s1598_s26 + $0x78] sm:$0xff]  }
  0x18   : > { %1416 = vmatpush3.bf16.msra.mxu0 %v1499_v6  ;;  %1467 = vmatpush3.bf16.msra.mxu1 %v1499_v6 }
  0x19   : > { %1417 = vmatprep.subr.bf16.mxu0 %v1500_v7  ;;  %1460 = vmatprep.subr.bf16.mxu1 %v1500_v7 }
  0x1c   : > { %1418 = vmatpush3.bf16.msra.mxu0 %v1500_v7  ;;  %1468 = vmatpush3.bf16.msra.mxu1 %v1500_v7 }
  0x1d   : > { %1419 = vmatprep.subr.bf16.mxu0 %v1501_v8  ;;  %1461 = vmatprep.subr.bf16.mxu1 %v1501_v8 }
  0x20   : > { %1420 = vmatpush3.bf16.msra.mxu0 %v1501_v8  ;;  %1469 = vmatpush3.bf16.msra.mxu1 %v1501_v8 }
  0x21   : > { %1421 = vmatprep.subr.bf16.mxu0 %v1502_v9  ;;  %1462 = vmatprep.subr.bf16.mxu1 %v1502_v9 }
  0x24   : > { %1422 = vmatpush3.bf16.msra.mxu0 %v1502_v9  ;;  %1470 = vmatpush3.bf16.msra.mxu1 %v1502_v9 }
  0x27   : > { %1424 = vmatmul.mubr.bf16.vlgmr.msra.gmra.mrb[0].mxu0 %v1505_v10  ;;  %1440 = vmatmul.mubr.bf16.vlgmr.msra.gmra.mrb[0].mxu1 %v1506_v11 }
  0x28   : > { %1427 = vmatprep.mubr.bf16.mxu0 %v1507_v12  ;;  %1443 = vmatprep.mubr.bf16.mxu1 %v1508_v13 }
  0x2f   : > { %1428 = vmatmul.mubr.bf16.gmra.mrb[4].mxu0 %v1509_v14  ;;  %1444 = vmatmul.mubr.bf16.gmra.mrb[4].mxu1 %v1510_v15 }
  0x30   : > { %1431 = vmatprep.mubr.bf16.mxu0 %v1511_v16  ;;  %1447 = vmatprep.mubr.bf16.mxu1 %v1512_v17 }
  0x37   : > { %1432 = vmatmul.mubr.bf16.gmra.mrb[8].mxu0 %v1513_v18  ;;  %1448 = vmatmul.mubr.bf16.gmra.mrb[8].mxu1 %v1514_v19 }
  0x38   : > { %1435 = vmatprep.mubr.bf16.mxu0 %v1515_v20  ;;  %1451 = vmatprep.mubr.bf16.mxu1 %v1516_v21 }
  0x3f   : > { %1436 = vmatmul.mubr.bf16.gmra.mrb[12].mxu0 %v1517_v22  ;;  %1452 = vmatmul.mubr.bf16.gmra.mrb[12].mxu1 %v1518_v23 }
  0xfa   : > { %v1425_v25 = vpop.f32.mrb[0].mxu0  ;;  %v1441_v26 = vpop.f32.mrb[0].mxu1 }
  0xfb   : > { %v789_v27 = vadd.f32 %v1425_v25, %v1634_v24  ;;  %v805_v28 = vadd.f32 %v1441_v26, %v1634_v24  ;;  %v554_v29 = vpop.f32.mrb[1].mxu0  ;;  %v618_v30 = vpop.f32.mrb[1].mxu1 }
  0xfc   : > { %v787_v31 = vadd.f32 %v1634_v24, %v554_v29  ;;  %v803_v32 = vadd.f32 %v1634_v24, %v618_v30  ;;  %v1426_v33 = vpop.f32.mrb[2].mxu0  ;;  %v1442_v34 = vpop.f32.mrb[2].mxu1 }
  0xfd   : > { %vm821_vm0 = vcmp.ge.f32.partialorder %v789_v27, 0.0  ;;  %v853_v35 = vmul.f32 0.2, %v789_v27  ;;  %vm837_vm1 = vcmp.ge.f32.partialorder %v805_v28, 0.0  ;;  %v869_v36 = vmul.f32 0.2, %v805_v28 }
  0xfe   : > { %vm819_vm2 = vcmp.ge.f32.partialorder %v787_v31, 0.0  ;;  %v851_v37 = vmul.f32 0.2, %v787_v31  ;;  %vm835_vm3 = vcmp.ge.f32.partialorder %v803_v32, 0.0  ;;  %v867_v38 = vmul.f32 0.2, %v803_v32 }
  0xff   : > { %v790_v39 = vadd.f32 %v1426_v33, %v1634_v24  ;;  %v806_v40 = vadd.f32 %v1442_v34, %v1634_v24  ;;  %v557_v41 = vpop.f32.mrb[3].mxu0  ;;  %v621_v42 = vpop.f32.mrb[3].mxu1  ;;  %v885_v43 = vsel %vm821_vm0, %v789_v27, %v853_v35  ;;  %v901_v44 = vsel %vm837_vm1, %v805_v28, %v869_v36 }
 0x100   : > { %v788_v45 = vadd.f32 %v1634_v24, %v557_v41  ;;  %v804_v46 = vadd.f32 %v1634_v24, %v621_v42  ;;  %v883_v51 = vsel %vm819_vm2, %v787_v31, %v851_v37  ;;  %v899_v52 = vsel %vm835_vm3, %v803_v32, %v867_v38 }
 0x101   : > { %vm822_vm4 = vcmp.ge.f32.partialorder %v790_v39, 0.0  ;;  %v854_v47 = vmul.f32 0.2, %v790_v39  ;;  %vm838_vm5 = vcmp.ge.f32.partialorder %v806_v40, 0.0  ;;  %v870_v48 = vmul.f32 0.2, %v806_v40 }
 0x102   : > { %vm820_vm6 = vcmp.ge.f32.partialorder %v788_v45, 0.0  ;;  %v852_v49 = vmul.f32 0.2, %v788_v45  ;;  %vm836_vm7 = vcmp.ge.f32.partialorder %v804_v46, 0.0  ;;  %v868_v50 = vmul.f32 0.2, %v804_v46 }
 0x103   : > { %v886_v53 = vsel %vm822_vm4, %v790_v39, %v854_v47  ;;  %v902_v54 = vsel %vm838_vm5, %v806_v40, %v870_v48  ;;  %v1429_v55 = vpop.f32.mrb[4].mxu0  ;;  %v1445_v56 = vpop.f32.mrb[4].mxu1 }
 0x104   : > { %v1296_v57 = vpack.c.bf16 %v886_v53, %v885_v43  ;;  %v1336_v58 = vpack.c.bf16 %v902_v54, %v901_v44  ;;  %v884_v59 = vsel %vm820_vm6, %v788_v45, %v852_v49  ;;  %v900_v60 = vsel %vm836_vm7, %v804_v46, %v868_v50  ;;  %v570_v61 = vpop.f32.mrb[5].mxu0  ;;  %v634_v62 = vpop.f32.mrb[5].mxu1 }
 0x105   : > { %v1291_v63 = vpack.c.bf16 %v884_v59, %v883_v51  ;;  %v1331_v0 = vpack.c.bf16 %v900_v60, %v899_v52  ;;  %v793_v1 = vadd.f32 %v1429_v55, %v1634_v24  ;;  %v809_v2 = vadd.f32 %v1445_v56, %v1634_v24  ;;  %v1430_v3 = vpop.f32.mrb[6].mxu0  ;;  %v1446_v4 = vpop.f32.mrb[6].mxu1 }
 0x106   : > { %1368 = vst [vmem:[%s1651_s17 + $0x8] sm:$0xff] %v1296_v57   ;;  %1376 = vst [vmem:[%s1651_s17 + $0x48] sm:$0xff] %v1336_v58   ;;  %v791_v5 = vadd.f32 %v1634_v24, %v570_v61  ;;  %v807_v6 = vadd.f32 %v1634_v24, %v634_v62  ;;  %v794_v7 = vadd.f32 %v1430_v3, %v1634_v24  ;;  %v573_v9 = vpop.f32.mrb[7].mxu0  ;;  %v637_v10 = vpop.f32.mrb[7].mxu1 }
 0x107   : > { %v810_v8 = vadd.f32 %v1446_v4, %v1634_v24  ;;  %1292 = vst [vmem:[%s1651_s17] sm:$0xff] %v1291_v63   ;;  %1375 = vst [vmem:[%s1651_s17 + $0x40] sm:$0xff] %v1331_v0   ;;  %vm825_vm8 = vcmp.ge.f32.partialorder %v793_v1, 0.0  ;;  %v857_v11 = vmul.f32 0.2, %v793_v1  ;;  %vm841_vm9 = vcmp.ge.f32.partialorder %v809_v2, 0.0 }
 0x108   : > { %v873_v12 = vmul.f32 0.2, %v809_v2  ;;  %vm823_vm10 = vcmp.ge.f32.partialorder %v791_v5, 0.0  ;;  %v855_v13 = vmul.f32 0.2, %v791_v5  ;;  %vm839_vm11 = vcmp.ge.f32.partialorder %v807_v6, 0.0 }
 0x109   : > { %v889_v14 = vsel %vm825_vm8, %v793_v1, %v857_v11  ;;  %v871_v15 = vmul.f32 0.2, %v807_v6  ;;  %vm826_vm12 = vcmp.ge.f32.partialorder %v794_v7, 0.0  ;;  %v858_v16 = vmul.f32 0.2, %v794_v7 }
 0x10a   : > { %v905_v17 = vsel %vm841_vm9, %v809_v2, %v873_v12  ;;  %v887_v18 = vsel %vm823_vm10, %v791_v5, %v855_v13  ;;  %vm842_vm13 = vcmp.ge.f32.partialorder %v810_v8, 0.0  ;;  %v874_v19 = vmul.f32 0.2, %v810_v8  ;;  %v1433_v20 = vpop.f32.mrb[8].mxu0  ;;  %v1449_v21 = vpop.f32.mrb[8].mxu1 }
 0x10b   : > { %v890_v22 = vsel %vm826_vm12, %v794_v7, %v858_v16  ;;  %v792_v23 = vadd.f32 %v1634_v24, %v573_v9  ;;  %v808_v25 = vadd.f32 %v1634_v24, %v637_v10  ;;  %v797_v26 = vadd.f32 %v1433_v20, %v1634_v24  ;;  %v586_v27 = vpop.f32.mrb[9].mxu0  ;;  %v650_v28 = vpop.f32.mrb[9].mxu1 }
 0x10c   : > { %v1306_v29 = vpack.c.bf16 %v890_v22, %v889_v14  ;;  %v906_v30 = vsel %vm842_vm13, %v810_v8, %v874_v19  ;;  %v813_v31 = vadd.f32 %v1449_v21, %v1634_v24  ;;  %v795_v32 = vadd.f32 %v1634_v24, %v586_v27  ;;  %v1434_v33 = vpop.f32.mrb[10].mxu0  ;;  %v1450_v34 = vpop.f32.mrb[10].mxu1 }
 0x10d   : > { %v1346_v35 = vpack.c.bf16 %v906_v30, %v905_v17  ;;  %vm824_vm14 = vcmp.ge.f32.partialorder %v792_v23, 0.0  ;;  %v856_v36 = vmul.f32 0.2, %v792_v23  ;;  %vm840_vm15 = vcmp.ge.f32.partialorder %v808_v25, 0.0  ;;  %v589_v37 = vpop.f32.mrb[11].mxu0  ;;  %v653_v38 = vpop.f32.mrb[11].mxu1 }
 0x10e   : > { %1370 = vst [vmem:[%s1651_s17 + $0x18] sm:$0xff] %v1306_v29   ;;  %v872_v39 = vmul.f32 0.2, %v808_v25  ;;  %vm829_vm0 = vcmp.ge.f32.partialorder %v797_v26, 0.0  ;;  %v861_v40 = vmul.f32 0.2, %v797_v26  ;;  %v903_v41 = vsel %vm839_vm11, %v807_v6, %v871_v15 }
 0x10f   : > { %vm845_vm1 = vcmp.ge.f32.partialorder %v813_v31, 0.0  ;;  %1378 = vst [vmem:[%s1651_s17 + $0x58] sm:$0xff] %v1346_v35   ;;  %v888_v42 = vsel %vm824_vm14, %v792_v23, %v856_v36  ;;  %v877_v43 = vmul.f32 0.2, %v813_v31  ;;  %vm827_vm2 = vcmp.ge.f32.partialorder %v795_v32, 0.0 }
 0x110   : > { %v1301_v44 = vpack.c.bf16 %v888_v42, %v887_v18  ;;  %v904_v45 = vsel %vm840_vm15, %v808_v25, %v872_v39  ;;  %v859_v46 = vmul.f32 0.2, %v795_v32  ;;  %v811_v47 = vadd.f32 %v1634_v24, %v650_v28 }
 0x111   : > { %v1341_v48 = vpack.c.bf16 %v904_v45, %v903_v41  ;;  %v893_v49 = vsel %vm829_vm0, %v797_v26, %v861_v40  ;;  %v909_v50 = vsel %vm845_vm1, %v813_v31, %v877_v43  ;;  %v798_v51 = vadd.f32 %v1434_v33, %v1634_v24 }
 0x112   : > { %1369 = vst [vmem:[%s1651_s17 + $0x10] sm:$0xff] %v1301_v44   ;;  %vm843_vm3 = vcmp.ge.f32.partialorder %v811_v47, 0.0  ;;  %v875_v52 = vmul.f32 0.2, %v811_v47  ;;  %v814_v53 = vadd.f32 %v1450_v34, %v1634_v24  ;;  %v796_v54 = vadd.f32 %v1634_v24, %v589_v37  ;;  %v1437_v55 = vpop.f32.mrb[12].mxu0  ;;  %v1453_v56 = vpop.f32.mrb[12].mxu1 }
 0x113   : > { %1377 = vst [vmem:[%s1651_s17 + $0x50] sm:$0xff] %v1341_v48   ;;  %vm830_vm4 = vcmp.ge.f32.partialorder %v798_v51, 0.0  ;;  %v862_v57 = vmul.f32 0.2, %v798_v51  ;;  %v812_v58 = vadd.f32 %v1634_v24, %v653_v38  ;;  %v801_v59 = vadd.f32 %v1437_v55, %v1634_v24  ;;  %v602_v60 = vpop.f32.mrb[13].mxu0  ;;  %v666_v61 = vpop.f32.mrb[13].mxu1 }
 0x114   : > { %v891_v62 = vsel %vm827_vm2, %v795_v32, %v859_v46  ;;  %vm846_vm5 = vcmp.ge.f32.partialorder %v814_v53, 0.0  ;;  %v878_v63 = vmul.f32 0.2, %v814_v53  ;;  %vm828_vm6 = vcmp.ge.f32.partialorder %v796_v54, 0.0  ;;  %v1438_v0 = vpop.f32.mrb[14].mxu0  ;;  %v1454_v1 = vpop.f32.mrb[14].mxu1 }
 0x115   : > { %v894_v2 = vsel %vm830_vm4, %v798_v51, %v862_v57  ;;  %v860_v3 = vmul.f32 0.2, %v796_v54  ;;  %vm844_vm7 = vcmp.ge.f32.partialorder %v812_v58, 0.0  ;;  %v876_v4 = vmul.f32 0.2, %v812_v58  ;;  %v605_v5 = vpop.f32.mrb[15].mxu0 }
 0x116   : > { %v907_v6 = vsel %vm843_vm3, %v811_v47, %v875_v52  ;;  %v1316_v7 = vpack.c.bf16 %v894_v2, %v893_v49  ;;  %v910_v8 = vsel %vm846_vm5, %v814_v53, %v878_v63  ;;  %v865_v9 = vmul.f32 0.2, %v801_v59  ;;  %v669_v10 = vpop.f32.mrb[15].mxu1 }
 0x117   : > { %v1356_v11 = vpack.c.bf16 %v910_v8, %v909_v50  ;;  %v892_v12 = vsel %vm828_vm6, %v796_v54, %v860_v3  ;;  %v908_v13 = vsel %vm844_vm7, %v812_v58, %v876_v4  ;;  %v817_v14 = vadd.f32 %v1453_v56, %v1634_v24 }
 0x118   : > { %1372 = vst [vmem:[%s1651_s17 + $0x28] sm:$0xff] %v1316_v7   ;;  %v1311_v15 = vpack.c.bf16 %v892_v12, %v891_v62  ;;  %v1351_v16 = vpack.c.bf16 %v908_v13, %v907_v6  ;;  %vm833_vm8 = vcmp.ge.f32.partialorder %v801_v59, 0.0  ;;  %v799_v17 = vadd.f32 %v1634_v24, %v602_v60 }
 0x119   : > { %1380 = vst [vmem:[%s1651_s17 + $0x68] sm:$0xff] %v1356_v11   ;;  %vm849_vm9 = vcmp.ge.f32.partialorder %v817_v14, 0.0  ;;  %v881_v18 = vmul.f32 0.2, %v817_v14  ;;  %v815_v19 = vadd.f32 %v1634_v24, %v666_v61  ;;  %v802_v20 = vadd.f32 %v1438_v0, %v1634_v24 }
 0x11a   : > { %1371 = vst [vmem:[%s1651_s17 + $0x20] sm:$0xff] %v1311_v15   ;;  %1379 = vst [vmem:[%s1651_s17 + $0x60] sm:$0xff] %v1351_v16   ;;  %v863_v21 = vmul.f32 0.2, %v799_v17  ;;  %v818_v22 = vadd.f32 %v1454_v1, %v1634_v24  ;;  %v800_v23 = vadd.f32 %v1634_v24, %v605_v5  ;;  %v897_v25 = vsel %vm833_vm8, %v801_v59, %v865_v9 }
 0x11b   : > { %vm831_vm10 = vcmp.ge.f32.partialorder %v799_v17, 0.0  ;;  %vm834_vm11 = vcmp.ge.f32.partialorder %v802_v20, 0.0  ;;  %v913_v26 = vsel %vm849_vm9, %v817_v14, %v881_v18  ;;  %v866_v27 = vmul.f32 0.2, %v802_v20 }
 0x11c   : > { %vm850_vm12 = vcmp.ge.f32.partialorder %v818_v22, 0.0  ;;  %v882_v28 = vmul.f32 0.2, %v818_v22  ;;  %vm847_vm13 = vcmp.ge.f32.partialorder %v815_v19, 0.0  ;;  %vm832_vm14 = vcmp.ge.f32.partialorder %v800_v23, 0.0 }
 0x11d   : > { %v864_v29 = vmul.f32 0.2, %v800_v23  ;;  %v816_v30 = vadd.f32 %v1634_v24, %v669_v10  ;;  %v895_v31 = vsel %vm831_vm10, %v799_v17, %v863_v21  ;;  %v879_v32 = vmul.f32 0.2, %v815_v19 }
 0x11e   : > { %v898_v33 = vsel %vm834_vm11, %v802_v20, %v866_v27  ;;  %v914_v34 = vsel %vm850_vm12, %v818_v22, %v882_v28 }
 0x11f   : > { %v1326_v35 = vpack.c.bf16 %v898_v33, %v897_v25  ;;  %v1366_v36 = vpack.c.bf16 %v914_v34, %v913_v26  ;;  %v896_v37 = vsel %vm832_vm14, %v800_v23, %v864_v29  ;;  %vm848_vm15 = vcmp.ge.f32.partialorder %v816_v30, 0.0 }
 0x120   : > { %v1321_v38 = vpack.c.bf16 %v896_v37, %v895_v31  ;;  %v880_v39 = vmul.f32 0.2, %v816_v30  ;;  %v911_v40 = vsel %vm847_vm13, %v815_v19, %v879_v32 }
 0x121   : > { %1374 = vst [vmem:[%s1651_s17 + $0x38] sm:$0xff] %v1326_v35   ;;  %1382 = vst [vmem:[%s1651_s17 + $0x78] sm:$0xff] %v1366_v36  }
 0x122   : > { %1373 = vst [vmem:[%s1651_s17 + $0x30] sm:$0xff] %v1321_v38   ;;  %v912_v41 = vsel %vm848_vm15, %v816_v30, %v880_v39 }
 0x123   : > { %v1361_v42 = vpack.c.bf16 %v912_v41, %v911_v40 }
 0x125   : > { %1381 = vst [vmem:[%s1651_s17 + $0x70] sm:$0xff] %v1361_v42  }
 0x126 PF: > { %s13_s14 = sadd.s32 1, %s1541_s14   ;;  %s1710_s12 = smov %s1537_s13 }
 0x127   : > { %p10_p5 = scmp.ge.s32.totalorder %s13_s14, 4   ;;  %s1711_s13 = smov %s1713_s15 }
 0x129   :  { %12 = sbr.rel (!%p10_p5) target bundleno = 2 (0x2), region = 76 }

// kernel: discriminator_forward.9
= control target key start
LH: loop header
LB: loop body
LE: loop exit
PB: predicated region body
PF: predicated region fallthrough
CT: control target
= control target key end

     0   :  { %s1752_s12 = smov 0   ;;  %s1754_s13 = smov 0   ;;  %s1982_s0 = inlined_call_operand.vmem [shape: bf16[128,1024], index: 0, kind: input, shape index: {}]   ;;  %s1983_s1 = inlined_call_operand.vmem [shape: bf16[1024,128], index: 1, kind: input, shape index: {}]   ;;  %s1984_s2 = inlined_call_operand.vmem [shape: f32[1,128], index: 2, kind: input, shape index: {}]   ;;  %s1985_s3 = inlined_call_operand.vmem [shape: bf16[128,128], index: 3, kind: output, shape index: {}]  }
   0x1   :  { %s1756_s14 = smov 0   ;;  %s1758_s15 = smov 0  }
   0x2   :  { %s1760_s16 = smov 0  }
   0x3 LB: > { %s25_s17 = sadd.s32 1, %s1725_s15  ;;  %p48_p1 = scmp.ne.s32.totalorder %s1717_s13, %s1713_s12  ;;  %s1729_s16 = sphi %s1760_s16, %s13_s16   ;;  %s1725_s15 = sphi %s1758_s15, %s1989_s15   ;;  %s1721_s14 = sphi %s1756_s14, %s1988_s14   ;;  %s1717_s13 = sphi %s1754_s13, %s1987_s13   ;;  %s1713_s12 = sphi %s1752_s12, %s1986_s12  }
   0x4   : > { %p26_p0 = scmp.ge.s32.totalorder %s25_s17, 2  ;;  %p49_p2 = scmp.eq.s32.totalorder %s1729_s16, 0 }
   0x5   : > { %s41_s19 = sadd.s32 1, %s1717_s13  ;;  %p1283_p5 = scmp.ge.s32.totalorder %s1729_s16, 2 }
   0x6   : > { %s1991_s17 = smov (%p26_p0, %s25_s17), 0  ;;  %p50_p3 = por %p49_p2, %p48_p1 }
   0x7   : > { %s37_s18 = ssub.s32 %s1725_s15, %s1991_s17  ;;  %162 = sbr.rel (%p1283_p5) target bundleno = 34 (0x22), region = 20 }
   0x8   : > { %p39_p4 = scmp.eq.s32.totalorder %s37_s18, 0 }
   0xa   : > { %s1787_s20 = scalar_select %p39_p4, %s1717_s13, %s41_s19  }
   0xe   : > { %165 = sbr.rel (!%p50_p3) target bundleno = 34 (0x22), region = 24  ;;  %s167_s21 = sand.u32 (%p50_p3), 1, %s1717_s13  }
   0xf   : > { %s1378_s22 = sshll.u32 (%p50_p3), %s1725_s15, 4  ;;  %s1284_s23 = sshll.u32 (%p50_p3), %s167_s21, 8 }
  0x10   : > { %s1795_s26 = scalar_lea.vmem (%p50_p3), %s1982_s0, %s1378_s22  ;;  %s1800_s27 = scalar_lea.vmem (%p50_p3), [#allocation3], %s1284_s23 }
  0x11   : > { %v188_v0 = vld [vmem:[%s1795_s26] sm:$0xff] (%p50_p3)  ;;  %v190_v1 = vld [vmem:[%s1795_s26 + $0x8] sm:$0xff] (%p50_p3) }
  0x12   : > { %v192_v2 = vld [vmem:[%s1795_s26 + $0x20] sm:$0xff] (%p50_p3)  ;;  %189 = vst [vmem:[%s1800_s27] sm:$0xff] (%p50_p3), %v188_v0  ;;  %191 = vst [vmem:[%s1800_s27 + $0x8] sm:$0xff] (%p50_p3), %v190_v1  ;;  %v194_v3 = vld [vmem:[%s1795_s26 + $0x28] sm:$0xff] (%p50_p3) }
  0x13   : > { %193 = vst [vmem:[%s1800_s27 + $0x10] sm:$0xff] (%p50_p3), %v192_v2  ;;  %v196_v4 = vld [vmem:[%s1795_s26 + $0x40] sm:$0xff] (%p50_p3)  ;;  %v198_v5 = vld [vmem:[%s1795_s26 + $0x48] sm:$0xff] (%p50_p3)  ;;  %195 = vst [vmem:[%s1800_s27 + $0x18] sm:$0xff] (%p50_p3), %v194_v3 }
  0x14   : > { %197 = vst [vmem:[%s1800_s27 + $0x20] sm:$0xff] (%p50_p3), %v196_v4  ;;  %199 = vst [vmem:[%s1800_s27 + $0x28] sm:$0xff] (%p50_p3), %v198_v5  ;;  %v200_v6 = vld [vmem:[%s1795_s26 + $0x60] sm:$0xff] (%p50_p3)  ;;  %v202_v7 = vld [vmem:[%s1795_s26 + $0x68] sm:$0xff] (%p50_p3) }
  0x15   : > { %v204_v8 = vld [vmem:[%s1795_s26 + $0x80] sm:$0xff]  ;;  %201 = vst [vmem:[%s1800_s27 + $0x30] sm:$0xff] %v200_v6  ;;  %203 = vst [vmem:[%s1800_s27 + $0x38] sm:$0xff] %v202_v7  ;;  %v206_v9 = vld [vmem:[%s1795_s26 + $0x88] sm:$0xff] }
  0x16   : > { %205 = vst [vmem:[%s1800_s27 + $0x40] sm:$0xff] %v204_v8  ;;  %v208_v10 = vld [vmem:[%s1795_s26 + $0xa0] sm:$0xff]  ;;  %v210_v11 = vld [vmem:[%s1795_s26 + $0xa8] sm:$0xff]  ;;  %207 = vst [vmem:[%s1800_s27 + $0x48] sm:$0xff] %v206_v9 }
  0x17   : > { %209 = vst [vmem:[%s1800_s27 + $0x50] sm:$0xff] %v208_v10  ;;  %211 = vst [vmem:[%s1800_s27 + $0x58] sm:$0xff] %v210_v11  ;;  %v212_v12 = vld [vmem:[%s1795_s26 + $0xc0] sm:$0xff]  ;;  %v214_v13 = vld [vmem:[%s1795_s26 + $0xc8] sm:$0xff] }
  0x18   : > { %v216_v14 = vld [vmem:[%s1795_s26 + $0xe0] sm:$0xff]  ;;  %213 = vst [vmem:[%s1800_s27 + $0x60] sm:$0xff] %v212_v12  ;;  %215 = vst [vmem:[%s1800_s27 + $0x68] sm:$0xff] %v214_v13  ;;  %v218_v15 = vld [vmem:[%s1795_s26 + $0xe8] sm:$0xff] }
  0x19   : > { %217 = vst [vmem:[%s1800_s27 + $0x70] sm:$0xff] %v216_v14  ;;  %v220_v16 = vld [vmem:[%s1795_s26 + $0x100] sm:$0xff]  ;;  %v222_v17 = vld [vmem:[%s1795_s26 + $0x108] sm:$0xff]  ;;  %219 = vst [vmem:[%s1800_s27 + $0x78] sm:$0xff] %v218_v15 }
  0x1a   : > { %221 = vst [vmem:[%s1800_s27 + $0x80] sm:$0xff] %v220_v16  ;;  %223 = vst [vmem:[%s1800_s27 + $0x88] sm:$0xff] %v222_v17  ;;  %v224_v18 = vld [vmem:[%s1795_s26 + $0x120] sm:$0xff]  ;;  %v226_v19 = vld [vmem:[%s1795_s26 + $0x128] sm:$0xff] }
  0x1b   : > { %v228_v20 = vld [vmem:[%s1795_s26 + $0x140] sm:$0xff]  ;;  %225 = vst [vmem:[%s1800_s27 + $0x90] sm:$0xff] %v224_v18  ;;  %227 = vst [vmem:[%s1800_s27 + $0x98] sm:$0xff] %v226_v19  ;;  %v230_v21 = vld [vmem:[%s1795_s26 + $0x148] sm:$0xff] }
  0x1c   : > { %229 = vst [vmem:[%s1800_s27 + $0xa0] sm:$0xff] %v228_v20  ;;  %v232_v22 = vld [vmem:[%s1795_s26 + $0x160] sm:$0xff]  ;;  %v234_v23 = vld [vmem:[%s1795_s26 + $0x168] sm:$0xff]  ;;  %231 = vst [vmem:[%s1800_s27 + $0xa8] sm:$0xff] %v230_v21 }
  0x1d   : > { %233 = vst [vmem:[%s1800_s27 + $0xb0] sm:$0xff] %v232_v22  ;;  %235 = vst [vmem:[%s1800_s27 + $0xb8] sm:$0xff] %v234_v23  ;;  %v236_v24 = vld [vmem:[%s1795_s26 + $0x180] sm:$0xff]  ;;  %v238_v25 = vld [vmem:[%s1795_s26 + $0x188] sm:$0xff] }
  0x1e   : > { %v240_v26 = vld [vmem:[%s1795_s26 + $0x1a0] sm:$0xff]  ;;  %237 = vst [vmem:[%s1800_s27 + $0xc0] sm:$0xff] %v236_v24  ;;  %239 = vst [vmem:[%s1800_s27 + $0xc8] sm:$0xff] %v238_v25  ;;  %v242_v27 = vld [vmem:[%s1795_s26 + $0x1a8] sm:$0xff] }
  0x1f   : > { %241 = vst [vmem:[%s1800_s27 + $0xd0] sm:$0xff] %v240_v26  ;;  %v244_v28 = vld [vmem:[%s1795_s26 + $0x1c0] sm:$0xff]  ;;  %v246_v29 = vld [vmem:[%s1795_s26 + $0x1c8] sm:$0xff]  ;;  %243 = vst [vmem:[%s1800_s27 + $0xd8] sm:$0xff] %v242_v27 }
  0x20   : > { %245 = vst [vmem:[%s1800_s27 + $0xe0] sm:$0xff] %v244_v28  ;;  %247 = vst [vmem:[%s1800_s27 + $0xe8] sm:$0xff] %v246_v29  ;;  %v248_v30 = vld [vmem:[%s1795_s26 + $0x1e0] sm:$0xff]  ;;  %v250_v31 = vld [vmem:[%s1795_s26 + $0x1e8] sm:$0xff] }
  0x21   : > { %249 = vst [vmem:[%s1800_s27 + $0xf0] sm:$0xff] %v248_v30  ;;  %251 = vst [vmem:[%s1800_s27 + $0xf8] sm:$0xff] %v250_v31 }
  0x22 PF: > { %p1287_p6 = scmp.ge.s32.totalorder %s1729_s16, 1  ;;  %p268_p7 = scmp.lt.s32.totalorder %s1729_s16, 3 }
  0x24   : > { %p269_p8 = pnand %p1287_p6, %p268_p7 }
  0x25   : > { %s275_s28 = sand.u32 (!%p269_p8), 1, %s1713_s12   ;;  %s1289_s29 = sshll.u32 (!%p269_p8), %s1721_s14, 6 }
  0x26   : > { %272 = sbr.rel (%p269_p8) target bundleno = 380 (0x17c), region = 51  ;;  %s1288_s30 = sshll.u32 (!%p269_p8), %s275_s28, 8 }
  0x27   : > { %p315_p9 = scmp.lt.s32.totalorder (!%p269_p8), %s1289_s29, 127  ;;  %s1872_s8 = scalar_lea.vmem (!%p269_p8), [#allocation3], %s1288_s30 }
  0x28   : > { %p1291_p10 = scmp.ne.s32.totalorder (!%p269_p8), %s1721_s14, 0 }
  0x2d   : > { %s1993_s29 = smov (!%p315_p9, %s1289_s29), 127  ;;  %339 = sbr.rel (%p1291_p10) target bundleno = 55 (0x37), region = 59 }
  0x2e   : > { %s1290_s4 = sshll.u32 %s1993_s29, 2  ;;  %v1731_v32 = vmov (!%p1291_p10), 0.0  }
  0x2f   : > { %s1870_s7 = scalar_lea.vmem %s1983_s1, %s1290_s4  ;;  %340 = vst [vmem:[#allocation2] sm:$0xff] (!%p1291_p10), %v1731_v32  ;;  %341 = vst [vmem:[#allocation2 + $0x8] sm:$0xff] (!%p1291_p10), %v1731_v32 }
  0x30   : > { %342 = vst [vmem:[#allocation2 + $0x10] sm:$0xff] (!%p1291_p10), %v1731_v32  ;;  %343 = vst [vmem:[#allocation2 + $0x18] sm:$0xff] (!%p1291_p10), %v1731_v32 }
  0x31   : > { %344 = vst [vmem:[#allocation2 + $0x20] sm:$0xff] (!%p1291_p10), %v1731_v32  ;;  %345 = vst [vmem:[#allocation2 + $0x28] sm:$0xff] (!%p1291_p10), %v1731_v32 }
  0x32   : > { %346 = vst [vmem:[#allocation2 + $0x30] sm:$0xff] (!%p1291_p10), %v1731_v32  ;;  %347 = vst [vmem:[#allocation2 + $0x38] sm:$0xff] (!%p1291_p10), %v1731_v32 }
  0x33   : > { %348 = vst [vmem:[#allocation2 + $0x40] sm:$0xff] (!%p1291_p10), %v1731_v32  ;;  %349 = vst [vmem:[#allocation2 + $0x48] sm:$0xff] (!%p1291_p10), %v1731_v32 }
  0x34   : > { %350 = vst [vmem:[#allocation2 + $0x50] sm:$0xff] %v1731_v32  ;;  %351 = vst [vmem:[#allocation2 + $0x58] sm:$0xff] %v1731_v32 }
  0x35   : > { %352 = vst [vmem:[#allocation2 + $0x60] sm:$0xff] %v1731_v32  ;;  %353 = vst [vmem:[#allocation2 + $0x68] sm:$0xff] %v1731_v32 }
  0x36   : > { %354 = vst [vmem:[#allocation2 + $0x70] sm:$0xff] %v1731_v32  ;;  %355 = vst [vmem:[#allocation2 + $0x78] sm:$0xff] %v1731_v32 }
  0x37 PF: > { %v1611_v33 = vld [vmem:[%s1870_s7 + $0x40] sm:$0xff]   ;;  %v1615_v37 = vld [vmem:[%s1870_s7 + $0x48] sm:$0xff]   ;;  %v1619_v41 = vld [vmem:[%s1870_s7 + $0x50] sm:$0xff]   ;;  %p1356_p11 = scmp.ne.s32.totalorder %s1721_s14, 1 }
  0x38   : > { %v1612_v34 = vld [vmem:[%s1870_s7 + $0xc0] sm:$0xff]   ;;  %1442 = vmatprep.subr.bf16.mxu0 %v1611_v33  ;;  %v1616_v38 = vld [vmem:[%s1870_s7 + $0xc8] sm:$0xff]   ;;  %v1620_v42 = vld [vmem:[%s1870_s7 + $0xd0] sm:$0xff]  }
  0x39   : > { %v1613_v35 = vld [vmem:[%s1870_s7] sm:$0xff]   ;;  %1506 = vmatprep.subr.bf16.mxu1 %v1612_v34  ;;  %v1617_v39 = vld [vmem:[%s1870_s7 + $0x8] sm:$0xff]   ;;  %v1621_v43 = vld [vmem:[%s1870_s7 + $0x10] sm:$0xff]  }
  0x3a   : > { %v1614_v36 = vld [vmem:[%s1870_s7 + $0x80] sm:$0xff]   ;;  %1443 = vmatpush3.bf16.msra.mxu0 %v1613_v35  ;;  %v1618_v40 = vld [vmem:[%s1870_s7 + $0x88] sm:$0xff]   ;;  %v1622_v44 = vld [vmem:[%s1870_s7 + $0x90] sm:$0xff]  }
  0x3b   : > { %1507 = vmatpush3.bf16.msra.mxu1 %v1614_v36  ;;  %1444 = vmatprep.subr.bf16.mxu0 %v1615_v37  ;;  %v1623_v45 = vld [vmem:[%s1870_s7 + $0x58] sm:$0xff]   ;;  %v1627_v49 = vld [vmem:[%s1870_s7 + $0x60] sm:$0xff]   ;;  %v1631_v53 = vld [vmem:[%s1870_s7 + $0x68] sm:$0xff]  }
  0x3c   : > { %1508 = vmatprep.subr.bf16.mxu1 %v1616_v38  ;;  %v1624_v46 = vld [vmem:[%s1870_s7 + $0xd8] sm:$0xff]   ;;  %v1628_v50 = vld [vmem:[%s1870_s7 + $0xe0] sm:$0xff]   ;;  %v1632_v54 = vld [vmem:[%s1870_s7 + $0xe8] sm:$0xff]  }
  0x3d   : > { %v1625_v47 = vld [vmem:[%s1870_s7 + $0x18] sm:$0xff]   ;;  %v1629_v51 = vld [vmem:[%s1870_s7 + $0x20] sm:$0xff]   ;;  %v1633_v55 = vld [vmem:[%s1870_s7 + $0x28] sm:$0xff]  }
  0x3e   : > { %1445 = vmatpush3.bf16.msra.mxu0 %v1617_v39  ;;  %v1626_v48 = vld [vmem:[%s1870_s7 + $0x98] sm:$0xff]   ;;  %v1630_v52 = vld [vmem:[%s1870_s7 + $0xa0] sm:$0xff]   ;;  %v1634_v56 = vld [vmem:[%s1870_s7 + $0xa8] sm:$0xff]  }
  0x3f   : > { %1509 = vmatpush3.bf16.msra.mxu1 %v1618_v40  ;;  %1446 = vmatprep.subr.bf16.mxu0 %v1619_v41  ;;  %v1635_v57 = vld [vmem:[%s1870_s7 + $0x70] sm:$0xff]   ;;  %v1639_v61 = vld [vmem:[%s1870_s7 + $0x78] sm:$0xff]  }
  0x40   : > { %1510 = vmatprep.subr.bf16.mxu1 %v1620_v42  ;;  %v1636_v58 = vld [vmem:[%s1870_s7 + $0xf0] sm:$0xff]   ;;  %v1640_v62 = vld [vmem:[%s1870_s7 + $0xf8] sm:$0xff]   ;;  %v356_v42 = vld [vmem:[#allocation2] sm:$0xff] }
  0x41   : > { %v1637_v59 = vld [vmem:[%s1870_s7 + $0x30] sm:$0xff]   ;;  %v1641_v63 = vld [vmem:[%s1870_s7 + $0x38] sm:$0xff]  }
  0x42   : > { %1447 = vmatpush3.bf16.msra.mxu0 %v1621_v43  ;;  %v1638_v60 = vld [vmem:[%s1870_s7 + $0xb0] sm:$0xff]   ;;  %v1642_v0 = vld [vmem:[%s1870_s7 + $0xb8] sm:$0xff]  }
  0x43   : > { %1511 = vmatpush3.bf16.msra.mxu1 %v1622_v44  ;;  %1448 = vmatprep.subr.bf16.mxu0 %v1623_v45  ;;  %v1643_v1 = vld [vmem:[%s1872_s8] ss:$16 sps:$4 sm:$0xff]   ;;  %v1645_v2 = vld [vmem:[%s1872_s8 + $0x4] ss:$16 sps:$4 sm:$0xff]   ;;  %v1646_v3 = vld [vmem:[%s1872_s8 + $0x8] ss:$16 sps:$4 sm:$0xff]  }
  0x44   : > { %1512 = vmatprep.subr.bf16.mxu1 %v1624_v46  ;;  %v1648_v4 = vld [vmem:[%s1872_s8 + $0xc] ss:$16 sps:$4 sm:$0xff]   ;;  %852 = vmatprep.mubr.bf16.mxu0 %v1645_v2  ;;  %v1649_v5 = vld [vmem:[%s1872_s8 + $0x24] ss:$16 sps:$4 sm:$0xff]   ;;  %v1653_v7 = vld [vmem:[%s1872_s8 + $0x20] ss:$16 sps:$4 sm:$0xff]  }
  0x45   : > { %949 = vmatprep.mubr.bf16.mxu1 %v1648_v4  ;;  %v1651_v6 = vld [vmem:[%s1872_s8 + $0x2c] ss:$16 sps:$4 sm:$0xff]   ;;  %v1654_v8 = vld [vmem:[%s1872_s8 + $0x28] ss:$16 sps:$4 sm:$0xff]   ;;  %v1655_v9 = vld [vmem:[%s1872_s8 + $0x44] ss:$16 sps:$4 sm:$0xff]  }
  0x46   : > { %1449 = vmatpush3.bf16.msra.mxu0 %v1625_v47  ;;  %v1657_v10 = vld [vmem:[%s1872_s8 + $0x4c] ss:$16 sps:$4 sm:$0xff]   ;;  %v1659_v11 = vld [vmem:[%s1872_s8 + $0x40] ss:$16 sps:$4 sm:$0xff]   ;;  %v1660_v12 = vld [vmem:[%s1872_s8 + $0x48] ss:$16 sps:$4 sm:$0xff]  }
  0x47   : > { %1513 = vmatpush3.bf16.msra.mxu1 %v1626_v48  ;;  %1450 = vmatprep.subr.bf16.mxu0 %v1627_v49  ;;  %v1661_v13 = vld [vmem:[%s1872_s8 + $0x64] ss:$16 sps:$4 sm:$0xff]   ;;  %v1663_v14 = vld [vmem:[%s1872_s8 + $0x6c] ss:$16 sps:$4 sm:$0xff]   ;;  %v1665_v15 = vld [vmem:[%s1872_s8 + $0x60] ss:$16 sps:$4 sm:$0xff]  }
  0x48   : > { %1514 = vmatprep.subr.bf16.mxu1 %v1628_v50  ;;  %v1666_v16 = vld [vmem:[%s1872_s8 + $0x68] ss:$16 sps:$4 sm:$0xff]   ;;  %v1667_v17 = vld [vmem:[%s1872_s8 + $0x84] ss:$16 sps:$4 sm:$0xff]   ;;  %v1669_v18 = vld [vmem:[%s1872_s8 + $0x8c] ss:$16 sps:$4 sm:$0xff]  }
  0x49   : > { %v1671_v19 = vld [vmem:[%s1872_s8 + $0x80] ss:$16 sps:$4 sm:$0xff]   ;;  %v1672_v20 = vld [vmem:[%s1872_s8 + $0x88] ss:$16 sps:$4 sm:$0xff]   ;;  %v1673_v21 = vld [vmem:[%s1872_s8 + $0xa4] ss:$16 sps:$4 sm:$0xff]  }
  0x4a   : > { %1451 = vmatpush3.bf16.msra.mxu0 %v1629_v51  ;;  %v1675_v22 = vld [vmem:[%s1872_s8 + $0xac] ss:$16 sps:$4 sm:$0xff]   ;;  %v1677_v23 = vld [vmem:[%s1872_s8 + $0xa0] ss:$16 sps:$4 sm:$0xff]   ;;  %v1678_v24 = vld [vmem:[%s1872_s8 + $0xa8] ss:$16 sps:$4 sm:$0xff]  }
  0x4b   : > { %1515 = vmatpush3.bf16.msra.mxu1 %v1630_v52  ;;  %1452 = vmatprep.subr.bf16.mxu0 %v1631_v53  ;;  %v1679_v25 = vld [vmem:[%s1872_s8 + $0xc4] ss:$16 sps:$4 sm:$0xff]   ;;  %v1681_v26 = vld [vmem:[%s1872_s8 + $0xcc] ss:$16 sps:$4 sm:$0xff]   ;;  %v1683_v27 = vld [vmem:[%s1872_s8 + $0xc0] ss:$16 sps:$4 sm:$0xff]  }
  0x4c   : > { %1516 = vmatprep.subr.bf16.mxu1 %v1632_v54  ;;  %v1684_v28 = vld [vmem:[%s1872_s8 + $0xc8] ss:$16 sps:$4 sm:$0xff]   ;;  %v1685_v29 = vld [vmem:[%s1872_s8 + $0xe4] ss:$16 sps:$4 sm:$0xff]   ;;  %v1687_v30 = vld [vmem:[%s1872_s8 + $0xec] ss:$16 sps:$4 sm:$0xff]  }
  0x4d   : > { %v1689_v31 = vld [vmem:[%s1872_s8 + $0xe0] ss:$16 sps:$4 sm:$0xff]   ;;  %v1690_v32 = vld [vmem:[%s1872_s8 + $0xe8] ss:$16 sps:$4 sm:$0xff]  }
  0x4e   : > { %1453 = vmatpush3.bf16.msra.mxu0 %v1633_v55  ;;  %v357_v47 = vld [vmem:[#allocation2 + $0x8] sm:$0xff] }
  0x4f   : > { %1517 = vmatpush3.bf16.msra.mxu1 %v1634_v56  ;;  %1454 = vmatprep.subr.bf16.mxu0 %v1635_v57 }
  0x50   : > { %1518 = vmatprep.subr.bf16.mxu1 %v1636_v58 }
  0x52   : > { %1455 = vmatpush3.bf16.msra.mxu0 %v1637_v59 }
  0x53   : > { %1519 = vmatpush3.bf16.msra.mxu1 %v1638_v60  ;;  %1456 = vmatprep.subr.bf16.mxu0 %v1639_v61  ;;  %v358_v60 = vld [vmem:[#allocation2 + $0x10] sm:$0xff] }
  0x54   : > { %1520 = vmatprep.subr.bf16.mxu1 %v1640_v62 }
  0x56   : > { %1457 = vmatpush3.bf16.msra.mxu0 %v1641_v63 }
  0x57   : > { %1521 = vmatpush3.bf16.msra.mxu1 %v1642_v0 }
  0x59   : > { %853 = vmatmul.mubr.bf16.vlgmr.msra.gmra.mrb[0].mxu0 %v1643_v1  ;;  %v359_v1 = vld [vmem:[#allocation2 + $0x18] sm:$0xff] }
  0x5a   : > { %950 = vmatmul.mubr.bf16.vlgmr.msra.gmra.mrb[0].mxu1 %v1646_v3  ;;  %860 = vmatprep.mubr.bf16.mxu0 %v1649_v5 }
  0x5b   : > { %957 = vmatprep.mubr.bf16.mxu1 %v1651_v6 }
  0x61   : > { %861 = vmatmul.mubr.bf16.gmra.mrb[4].mxu0 %v1653_v7 }
  0x62   : > { %958 = vmatmul.mubr.bf16.gmra.mrb[4].mxu1 %v1654_v8  ;;  %868 = vmatprep.mubr.bf16.mxu0 %v1655_v9 }
  0x63   : > { %965 = vmatprep.mubr.bf16.mxu1 %v1657_v10 }
  0x69   : > { %869 = vmatmul.mubr.bf16.gmra.mrb[8].mxu0 %v1659_v11 }
  0x6a   : > { %966 = vmatmul.mubr.bf16.gmra.mrb[8].mxu1 %v1660_v12  ;;  %876 = vmatprep.mubr.bf16.mxu0 %v1661_v13 }
  0x6b   : > { %973 = vmatprep.mubr.bf16.mxu1 %v1663_v14  ;;  %v360_v14 = vld [vmem:[#allocation2 + $0x20] sm:$0xff] }
  0x71   : > { %877 = vmatmul.mubr.bf16.gmra.mrb[12].mxu0 %v1665_v15 }
  0x72   : > { %974 = vmatmul.mubr.bf16.gmra.mrb[12].mxu1 %v1666_v16  ;;  %884 = vmatprep.mubr.bf16.mxu0 %v1667_v17 }
  0x73   : > { %981 = vmatprep.mubr.bf16.mxu1 %v1669_v18 }
  0x79   : > { %885 = vmatmul.mubr.bf16.gmra.mrb[16].mxu0 %v1671_v19  ;;  %v361_v19 = vld [vmem:[#allocation2 + $0x28] sm:$0xff] }
  0x7a   : > { %982 = vmatmul.mubr.bf16.gmra.mrb[16].mxu1 %v1672_v20  ;;  %892 = vmatprep.mubr.bf16.mxu0 %v1673_v21 }
  0x7b   : > { %989 = vmatprep.mubr.bf16.mxu1 %v1675_v22 }
  0x81   : > { %893 = vmatmul.mubr.bf16.gmra.mrb[20].mxu0 %v1677_v23 }
  0x82   : > { %990 = vmatmul.mubr.bf16.gmra.mrb[20].mxu1 %v1678_v24  ;;  %900 = vmatprep.mubr.bf16.mxu0 %v1679_v25 }
  0x83   : > { %997 = vmatprep.mubr.bf16.mxu1 %v1681_v26 }
  0x89   : > { %901 = vmatmul.mubr.bf16.gmra.mrb[24].mxu0 %v1683_v27 }
  0x8a   : > { %998 = vmatmul.mubr.bf16.gmra.mrb[24].mxu1 %v1684_v28  ;;  %908 = vmatprep.mubr.bf16.mxu0 %v1685_v29 }
  0x8b   : > { %1005 = vmatprep.mubr.bf16.mxu1 %v1687_v30 }
  0x91   : > { %909 = vmatmul.mubr.bf16.gmra.mrb[28].mxu0 %v1689_v31 }
  0x92   : > { %1006 = vmatmul.mubr.bf16.gmra.mrb[28].mxu1 %v1690_v32  ;;  %v362_v32 = vld [vmem:[#allocation2 + $0x30] sm:$0xff] }
 0x12c   : > { %v1458_v33 = vpop.f32.mrb[0].mxu0 }
 0x12d   : > { %v1522_v34 = vpop.f32.mrb[0].mxu1  ;;  %v1459_v35 = vpop.f32.mrb[1].mxu0 }
 0x12e   : > { %v1460_v36 = vadd.f32 %v1459_v35, %v1458_v33  ;;  %v1523_v37 = vpop.f32.mrb[1].mxu1  ;;  %v1461_v38 = vpop.f32.mrb[2].mxu0 }
 0x12f   : > { %v1524_v39 = vadd.f32 %v1523_v37, %v1522_v34  ;;  %v1525_v40 = vpop.f32.mrb[2].mxu1  ;;  %v1462_v41 = vpop.f32.mrb[3].mxu0  ;;  %v363_v37 = vld [vmem:[#allocation2 + $0x38] sm:$0xff] }
 0x130   : > { %v1463_v43 = vadd.f32 %v1462_v41, %v1461_v38  ;;  %v1526_v44 = vpop.f32.mrb[3].mxu1 }
 0x131   : > { %v952_v45 = vadd.f32 %v1524_v39, %v1460_v36  ;;  %v1527_v46 = vadd.f32 %v1526_v44, %v1525_v40 }
 0x133   : > { %v1014_v48 = vadd.f32 %v952_v45, %v356_v42  ;;  %v955_v49 = vadd.f32 %v1527_v46, %v1463_v43 }
 0x134   : > { %v1464_v50 = vpop.f32.mrb[4].mxu0 }
 0x135   : > { %1030 = vst [vmem:[#allocation2] sm:$0xff] %v1014_v48  ;;  %v1015_v51 = vadd.f32 %v955_v49, %v357_v47  ;;  %v1528_v52 = vpop.f32.mrb[4].mxu1  ;;  %v1465_v53 = vpop.f32.mrb[5].mxu0 }
 0x136   : > { %v1466_v54 = vadd.f32 %v1465_v53, %v1464_v50  ;;  %v1529_v55 = vpop.f32.mrb[5].mxu1  ;;  %v1467_v56 = vpop.f32.mrb[6].mxu0  ;;  %v364_v50 = vld [vmem:[#allocation2 + $0x40] sm:$0xff] }
 0x137   : > { %1031 = vst [vmem:[#allocation2 + $0x8] sm:$0xff] %v1015_v51  ;;  %v1530_v57 = vadd.f32 %v1529_v55, %v1528_v52  ;;  %v1531_v58 = vpop.f32.mrb[6].mxu1  ;;  %v1468_v59 = vpop.f32.mrb[7].mxu0  ;;  %v365_v55 = vld [vmem:[#allocation2 + $0x48] sm:$0xff] }
 0x138   : > { %v1469_v61 = vadd.f32 %v1468_v59, %v1467_v56  ;;  %v1532_v62 = vpop.f32.mrb[7].mxu1 }
 0x139   : > { %v960_v63 = vadd.f32 %v1530_v57, %v1466_v54  ;;  %v1533_v0 = vadd.f32 %v1532_v62, %v1531_v58 }
 0x13b   : > { %v1016_v2 = vadd.f32 %v960_v63, %v358_v60  ;;  %v963_v3 = vadd.f32 %v1533_v0, %v1469_v61 }
 0x13c   : > { %v1470_v4 = vpop.f32.mrb[8].mxu0 }
 0x13d   : > { %1032 = vst [vmem:[#allocation2 + $0x10] sm:$0xff] %v1016_v2  ;;  %v1017_v5 = vadd.f32 %v963_v3, %v359_v1  ;;  %v1534_v6 = vpop.f32.mrb[8].mxu1  ;;  %v1471_v7 = vpop.f32.mrb[9].mxu0 }
 0x13e   : > { %v1472_v8 = vadd.f32 %v1471_v7, %v1470_v4  ;;  %v1535_v9 = vpop.f32.mrb[9].mxu1  ;;  %v1473_v10 = vpop.f32.mrb[10].mxu0  ;;  %v366_v4 = vld [vmem:[#allocation2 + $0x50] sm:$0xff] }
 0x13f   : > { %1033 = vst [vmem:[#allocation2 + $0x18] sm:$0xff] %v1017_v5  ;;  %v1536_v11 = vadd.f32 %v1535_v9, %v1534_v6  ;;  %v1537_v12 = vpop.f32.mrb[10].mxu1  ;;  %v1474_v13 = vpop.f32.mrb[11].mxu0  ;;  %v367_v9 = vld [vmem:[#allocation2 + $0x58] sm:$0xff] }
 0x140   : > { %v1475_v15 = vadd.f32 %v1474_v13, %v1473_v10  ;;  %v1538_v16 = vpop.f32.mrb[11].mxu1 }
 0x141   : > { %v968_v17 = vadd.f32 %v1536_v11, %v1472_v8  ;;  %v1539_v18 = vadd.f32 %v1538_v16, %v1537_v12 }
 0x143   : > { %v1018_v20 = vadd.f32 %v968_v17, %v360_v14  ;;  %v971_v21 = vadd.f32 %v1539_v18, %v1475_v15 }
 0x144   : > { %v1476_v22 = vpop.f32.mrb[12].mxu0 }
 0x145   : > { %1034 = vst [vmem:[#allocation2 + $0x20] sm:$0xff] %v1018_v20  ;;  %v1019_v23 = vadd.f32 %v971_v21, %v361_v19  ;;  %v1540_v24 = vpop.f32.mrb[12].mxu1  ;;  %v1477_v25 = vpop.f32.mrb[13].mxu0 }
 0x146   : > { %v1478_v26 = vadd.f32 %v1477_v25, %v1476_v22  ;;  %v1541_v27 = vpop.f32.mrb[13].mxu1  ;;  %v1479_v28 = vpop.f32.mrb[14].mxu0  ;;  %v368_v22 = vld [vmem:[#allocation2 + $0x60] sm:$0xff] }
 0x147   : > { %1035 = vst [vmem:[#allocation2 + $0x28] sm:$0xff] %v1019_v23  ;;  %v1542_v29 = vadd.f32 %v1541_v27, %v1540_v24  ;;  %v1543_v30 = vpop.f32.mrb[14].mxu1  ;;  %v1480_v31 = vpop.f32.mrb[15].mxu0  ;;  %v369_v27 = vld [vmem:[#allocation2 + $0x68] sm:$0xff] }
 0x148   : > { %v1481_v33 = vadd.f32 %v1480_v31, %v1479_v28  ;;  %v1544_v34 = vpop.f32.mrb[15].mxu1 }
 0x149   : > { %v976_v35 = vadd.f32 %v1542_v29, %v1478_v26  ;;  %v1545_v36 = vadd.f32 %v1544_v34, %v1543_v30 }
 0x14b   : > { %v1020_v38 = vadd.f32 %v976_v35, %v362_v32  ;;  %v979_v39 = vadd.f32 %v1545_v36, %v1481_v33 }
 0x14c   : > { %v1482_v40 = vpop.f32.mrb[16].mxu0 }
 0x14d   : > { %1036 = vst [vmem:[#allocation2 + $0x30] sm:$0xff] %v1020_v38  ;;  %v1021_v41 = vadd.f32 %v979_v39, %v363_v37  ;;  %v1546_v42 = vpop.f32.mrb[16].mxu1  ;;  %v1483_v43 = vpop.f32.mrb[17].mxu0 }
 0x14e   : > { %v1484_v44 = vadd.f32 %v1483_v43, %v1482_v40  ;;  %v1547_v45 = vpop.f32.mrb[17].mxu1  ;;  %v1485_v46 = vpop.f32.mrb[18].mxu0  ;;  %v370_v40 = vld [vmem:[#allocation2 + $0x70] sm:$0xff] }
 0x14f   : > { %1037 = vst [vmem:[#allocation2 + $0x38] sm:$0xff] %v1021_v41  ;;  %v1548_v47 = vadd.f32 %v1547_v45, %v1546_v42  ;;  %v1549_v48 = vpop.f32.mrb[18].mxu1  ;;  %v1486_v49 = vpop.f32.mrb[19].mxu0  ;;  %v371_v45 = vld [vmem:[#allocation2 + $0x78] sm:$0xff] }
 0x150   : > { %v1487_v51 = vadd.f32 %v1486_v49, %v1485_v46  ;;  %v1550_v52 = vpop.f32.mrb[19].mxu1  ;;  %v1050_v49 = vld [vmem:[#allocation2] sm:$0xff] (!%p1356_p11) }
 0x151   : > { %v984_v53 = vadd.f32 %v1548_v47, %v1484_v44  ;;  %v1551_v54 = vadd.f32 %v1550_v52, %v1549_v48 }
 0x153   : > { %v1022_v56 = vadd.f32 %v984_v53, %v364_v50  ;;  %v987_v57 = vadd.f32 %v1551_v54, %v1487_v51  ;;  %v1051_v50 = vld [vmem:[#allocation2 + $0x8] sm:$0xff] (!%p1356_p11)  ;;  %v1357_v51 = vld [vmem:[%s1984_s2] ss:$0 sm:$0xff] (!%p1356_p11)  ;;  %v1052_v54 = vld [vmem:[#allocation2 + $0x10] sm:$0xff] (!%p1356_p11) }
 0x154   : > { %v1488_v58 = vpop.f32.mrb[20].mxu0  ;;  %v1073_v52 = vadd.f32 (!%p1356_p11), %v1357_v51, %v1050_v49  ;;  %v1074_v53 = vadd.f32 (!%p1356_p11), %v1357_v51, %v1051_v50 }
 0x155   : > { %1038 = vst [vmem:[#allocation2 + $0x40] sm:$0xff] %v1022_v56  ;;  %v1023_v59 = vadd.f32 %v987_v57, %v365_v55  ;;  %v1552_v60 = vpop.f32.mrb[20].mxu1  ;;  %v1489_v61 = vpop.f32.mrb[21].mxu0  ;;  %v1053_v55 = vld [vmem:[#allocation2 + $0x18] sm:$0xff] (!%p1356_p11)  ;;  %v1054_v56 = vld [vmem:[#allocation2 + $0x20] sm:$0xff] (!%p1356_p11)  ;;  %v1075_v57 = vadd.f32 (!%p1356_p11), %v1357_v51, %v1052_v54 }
 0x156   : > { %v1490_v62 = vadd.f32 %v1489_v61, %v1488_v58  ;;  %v1553_v63 = vpop.f32.mrb[21].mxu1  ;;  %v1491_v0 = vpop.f32.mrb[22].mxu0  ;;  %v1076_v58 = vadd.f32 (!%p1356_p11), %v1357_v51, %v1053_v55  ;;  %v1056_v61 = vld [vmem:[#allocation2 + $0x30] sm:$0xff] (!%p1356_p11) }
 0x157   : > { %1039 = vst [vmem:[#allocation2 + $0x48] sm:$0xff] %v1023_v59  ;;  %v1554_v1 = vadd.f32 %v1553_v63, %v1552_v60  ;;  %v1555_v2 = vpop.f32.mrb[22].mxu1  ;;  %v1492_v3 = vpop.f32.mrb[23].mxu0  ;;  %v1055_v59 = vld [vmem:[#allocation2 + $0x28] sm:$0xff] (!%p1356_p11)  ;;  %v1077_v60 = vadd.f32 (!%p1356_p11), %v1357_v51, %v1054_v56  ;;  %v1398_v63 = vpack.c.bf16 (!%p1356_p11), %v1074_v53, %v1073_v52 }
 0x158   : > { %v1493_v5 = vadd.f32 %v1492_v3, %v1491_v0  ;;  %v1556_v6 = vpop.f32.mrb[23].mxu1  ;;  %v1078_v0 = vadd.f32 (!%p1356_p11), %v1357_v51, %v1055_v59 }
 0x159   : > { %v992_v7 = vadd.f32 %v1554_v1, %v1490_v62  ;;  %v1557_v8 = vadd.f32 %v1556_v6, %v1555_v2  ;;  %v1057_v62 = vld [vmem:[#allocation2 + $0x38] sm:$0xff] (!%p1356_p11)  ;;  %v1079_v1 = vadd.f32 (!%p1356_p11), %v1357_v51, %v1056_v61  ;;  %v1403_v6 = vpack.c.bf16 (!%p1356_p11), %v1076_v58, %v1075_v57  ;;  %1399 = vst [vmem:[%s1985_s3] sm:$0xff] (!%p1356_p11), %v1398_v63  }
 0x15a   : > { %v1080_v2 = vadd.f32 (!%p1356_p11), %v1357_v51, %v1057_v62 }
 0x15b   : > { %v1024_v10 = vadd.f32 %v992_v7, %v366_v4  ;;  %v995_v11 = vadd.f32 %v1557_v8, %v1493_v5  ;;  %1435 = vst [vmem:[%s1985_s3 + $0x8] sm:$0xff] (!%p1356_p11), %v1403_v6  }
 0x15c   : > { %v1494_v12 = vpop.f32.mrb[24].mxu0  ;;  %v1058_v3 = vld [vmem:[#allocation2 + $0x40] sm:$0xff] (!%p1356_p11) }
 0x15d   : > { %1040 = vst [vmem:[#allocation2 + $0x50] sm:$0xff] %v1024_v10  ;;  %v1025_v13 = vadd.f32 %v995_v11, %v367_v9  ;;  %v1558_v14 = vpop.f32.mrb[24].mxu1  ;;  %v1495_v15 = vpop.f32.mrb[25].mxu0  ;;  %v1081_v7 = vadd.f32 (!%p1356_p11), %v1357_v51, %v1058_v3 }
 0x15e   : > { %v1496_v16 = vadd.f32 %v1495_v15, %v1494_v12  ;;  %v1559_v17 = vpop.f32.mrb[25].mxu1  ;;  %v1497_v18 = vpop.f32.mrb[26].mxu0  ;;  %v1059_v4 = vld [vmem:[#allocation2 + $0x48] sm:$0xff] (!%p1356_p11) }
 0x15f   : > { %1041 = vst [vmem:[#allocation2 + $0x58] sm:$0xff] %v1025_v13  ;;  %v1560_v19 = vadd.f32 %v1559_v17, %v1558_v14  ;;  %v1561_v20 = vpop.f32.mrb[26].mxu1  ;;  %v1498_v21 = vpop.f32.mrb[27].mxu0  ;;  %v1082_v8 = vadd.f32 (!%p1356_p11), %v1357_v51, %v1059_v4  ;;  %v1408_v13 = vpack.c.bf16 (!%p1356_p11), %v1078_v0, %v1077_v60  ;;  %v1413_v14 = vpack.c.bf16 (!%p1356_p11), %v1080_v2, %v1079_v1 }
 0x160   : > { %v1499_v23 = vadd.f32 %v1498_v21, %v1497_v18  ;;  %v1562_v24 = vpop.f32.mrb[27].mxu1 }
 0x161   : > { %v1000_v25 = vadd.f32 %v1560_v19, %v1496_v16  ;;  %v1563_v26 = vadd.f32 %v1562_v24, %v1561_v20  ;;  %v1418_v19 = vpack.c.bf16 (!%p1356_p11), %v1082_v8, %v1081_v7  ;;  %1436 = vst [vmem:[%s1985_s3 + $0x10] sm:$0xff] (!%p1356_p11), %v1408_v13   ;;  %1437 = vst [vmem:[%s1985_s3 + $0x18] sm:$0xff] (!%p1356_p11), %v1413_v14  }
 0x163   : > { %v1026_v28 = vadd.f32 %v1000_v25, %v368_v22  ;;  %v1003_v29 = vadd.f32 %v1563_v26, %v1499_v23  ;;  %1438 = vst [vmem:[%s1985_s3 + $0x20] sm:$0xff] (!%p1356_p11), %v1418_v19  }
 0x164   : > { %v1500_v30 = vpop.f32.mrb[28].mxu0  ;;  %v1060_v5 = vld [vmem:[#allocation2 + $0x50] sm:$0xff] (!%p1356_p11) }
 0x165   : > { %1042 = vst [vmem:[#allocation2 + $0x60] sm:$0xff] %v1026_v28  ;;  %v1027_v31 = vadd.f32 %v1003_v29, %v369_v27  ;;  %v1564_v32 = vpop.f32.mrb[28].mxu1  ;;  %v1501_v33 = vpop.f32.mrb[29].mxu0  ;;  %v1083_v10 = vadd.f32 (!%p1356_p11), %v1357_v51, %v1060_v5 }
 0x166   : > { %v1502_v34 = vadd.f32 %v1501_v33, %v1500_v30  ;;  %v1565_v35 = vpop.f32.mrb[29].mxu1  ;;  %v1503_v36 = vpop.f32.mrb[30].mxu0  ;;  %v1061_v9 = vld [vmem:[#allocation2 + $0x58] sm:$0xff] (!%p1356_p11) }
 0x167   : > { %1043 = vst [vmem:[#allocation2 + $0x68] sm:$0xff] %v1027_v31  ;;  %v1566_v37 = vadd.f32 %v1565_v35, %v1564_v32  ;;  %v1567_v38 = vpop.f32.mrb[30].mxu1  ;;  %v1504_v39 = vpop.f32.mrb[31].mxu0  ;;  %v1084_v15 = vadd.f32 (!%p1356_p11), %v1357_v51, %v1061_v9 }
 0x168   : > { %v1505_v41 = vadd.f32 %v1504_v39, %v1503_v36  ;;  %v1568_v42 = vpop.f32.mrb[31].mxu1 }
 0x169   : > { %v1008_v43 = vadd.f32 %v1566_v37, %v1502_v34  ;;  %v1569_v44 = vadd.f32 %v1568_v42, %v1567_v38  ;;  %1049 = sbr.rel (%p1356_p11) target bundleno = 380 (0x17c), region = 63  ;;  %v1423_v23 = vpack.c.bf16 (!%p1356_p11), %v1084_v15, %v1083_v10 }
 0x16b   : > { %v1028_v46 = vadd.f32 %v1008_v43, %v370_v40  ;;  %v1011_v47 = vadd.f32 %v1569_v44, %v1505_v41  ;;  %1439 = vst [vmem:[%s1985_s3 + $0x28] sm:$0xff] (!%p1356_p11), %v1423_v23  }
 0x16c   : > { %v1062_v11 = vld [vmem:[#allocation2 + $0x60] sm:$0xff] (!%p1356_p11) }
 0x16d   : > { %1044 = vst [vmem:[#allocation2 + $0x70] sm:$0xff] %v1028_v46  ;;  %v1029_v48 = vadd.f32 %v1011_v47, %v371_v45  ;;  %v1085_v16 = vadd.f32 (!%p1356_p11), %v1357_v51, %v1062_v11 }
 0x16e   : > { %v1063_v12 = vld [vmem:[#allocation2 + $0x68] sm:$0xff] (!%p1356_p11) }
 0x16f   : > { %1045 = vst [vmem:[#allocation2 + $0x78] sm:$0xff] %v1029_v48  ;;  %v1086_v20 = vadd.f32 (!%p1356_p11), %v1357_v51, %v1063_v12 }
 0x171   : > { %v1428_v24 = vpack.c.bf16 %v1086_v20, %v1085_v16 }
 0x173   : > { %1440 = vst [vmem:[%s1985_s3 + $0x30] sm:$0xff] %v1428_v24  }
 0x174   : > { %v1064_v17 = vld [vmem:[#allocation2 + $0x70] sm:$0xff] }
 0x175   : > { %v1087_v21 = vadd.f32 %v1357_v51, %v1064_v17 }
 0x176   : > { %v1065_v18 = vld [vmem:[#allocation2 + $0x78] sm:$0xff] }
 0x177   : > { %v1088_v22 = vadd.f32 %v1357_v51, %v1065_v18 }
 0x179   : > { %v1433_v25 = vpack.c.bf16 %v1088_v22, %v1087_v21 }
 0x17b   : > { %1441 = vst [vmem:[%s1985_s3 + $0x38] sm:$0xff] %v1433_v25  }
 0x17c PF: > { %s13_s16 = sadd.s32 1, %s1729_s16   ;;  %s1986_s12 = smov %s1717_s13 }
 0x17d   : > { %p10_p12 = scmp.ge.s32.totalorder %s13_s16, 4   ;;  %s1987_s13 = smov %s1787_s20 }
 0x17e   : > { %s1988_s14 = smov %s1725_s15  ;;  %s1989_s15 = smov %s1991_s17 }
 0x17f   :  { %12 = sbr.rel (!%p10_p12) target bundleno = 3 (0x3), region = 104 }

// kernel: discriminator_forward.10
= control target key start
LH: loop header
LB: loop body
LE: loop exit
PB: predicated region body
PF: predicated region fallthrough
CT: control target
= control target key end

     0   :  { %s497_s6 = smov 0   ;;  %s499_s7 = smov 0   ;;  %s537_s0 = inlined_call_operand.vmem [shape: bf16[2,64,128], index: 0, kind: input, shape index: {}]   ;;  %s538_s1 = inlined_call_operand.vmem [shape: bf16[2,64,128], index: 1, kind: output, shape index: {}]  }
   0x1   :  { %s501_s8 = smov 0  }
   0x2 LB: > { %s23_s9 = sadd.s32 1, %s481_s7  ;;  %p370_p0 = scmp.ge.s32.totalorder %s485_s8, 1  ;;  %s485_s8 = sphi %s501_s8, %s11_s8   ;;  %s481_s7 = sphi %s499_s7, %s540_s7   ;;  %s477_s6 = sphi %s497_s6, %s539_s6  }
   0x3   : > { %p25_p1 = scmp.ge.s32.totalorder %s23_s9, 2  ;;  %p106_p2 = scmp.lt.s32.totalorder %s485_s8, 3 }
   0x5   : > { %s542_s9 = smov (%p25_p1, %s23_s9), 0  ;;  %p107_p3 = pnand %p370_p0, %p106_p2 }
   0x6   : > { %p132_p4 = scmp.lt.s32.totalorder (!%p107_p3), %s477_s6, 1 }
   0x7   : > { %110 = sbr.rel (%p107_p3) target bundleno = 106 (0x6a), region = 24 }
   0xe   : > { %s544_s6 = smov (!%p132_p4, %s477_s6), 1 }
   0xf   : > { %s385_s10 = sshll.u32 %s544_s6, 5 }
  0x10   : > { %s139_s13 = scalar_lea.vmem %s537_s0, %s385_s10  ;;  %s147_s16 = scalar_lea.vmem %s538_s1, %s385_s10 }
  0x11   : > { %v396_v0 = vld [vmem:[%s139_s13] sm:$0xff]   ;;  %v431_v1 = vld [vmem:[%s139_s13 + $0x8] sm:$0xff]   ;;  %v432_v5 = vld [vmem:[%s139_s13 + $0x10] sm:$0xff]  }
  0x12   : > { %v397_v2 = vunpack.c.l.bf16 %v396_v0  ;;  %v398_v3 = vunpack.c.h.bf16 %v396_v0  ;;  %v401_v4 = vunpack.c.l.bf16 %v431_v1  ;;  %v402_v6 = vunpack.c.h.bf16 %v431_v1  ;;  %v433_v10 = vld [vmem:[%s139_s13 + $0x18] sm:$0xff]  }
  0x13   : > { %v405_v8 = vunpack.c.l.bf16 %v432_v5  ;;  %v406_v11 = vunpack.c.h.bf16 %v432_v5  ;;  %v409_v13 = vunpack.c.l.bf16 %v433_v10  ;;  %v410_v15 = vunpack.c.h.bf16 %v433_v10 }
  0x14   : > { %v164_v7 = vadd.f32 %v398_v3, %v397_v2 }
  0x16   : > { %v165_v9 = vadd.f32 %v401_v4, %v164_v7 }
  0x18   : > { %v166_v12 = vadd.f32 %v402_v6, %v165_v9 }
  0x1a   : > { %v167_v14 = vadd.f32 %v405_v8, %v166_v12 }
  0x1c   : > { %v168_v16 = vadd.f32 %v406_v11, %v167_v14 }
  0x1e   : > { %v169_v17 = vadd.f32 %v409_v13, %v168_v16 }
  0x20   : > { %v170_v18 = vadd.f32 %v410_v15, %v169_v17 }
  0x22   : > { %v171_v19 = vrot.slane %v170_v18, 4 }
  0x24   : > { %v172_v20 = vadd.f32 %v171_v19, %v170_v18 }
  0x26   : > { %v173_v21 = vrot.slane %v172_v20, 2 }
  0x28   : > { %v174_v22 = vadd.f32 %v173_v21, %v172_v20 }
  0x2a   : > { %v175_v23 = vrot.slane %v174_v22, 1 }
  0x2c   : > { %v176_v24 = vadd.f32 %v175_v23, %v174_v22 }
  0x2e   : > { %v178_v25 = vmul.f32 0.015625, %v176_v24 }
  0x30   : > { %v179_v26 = vsub.f32 %v397_v2, %v178_v25  ;;  %v180_v27 = vsub.f32 %v398_v3, %v178_v25  ;;  %v181_v28 = vsub.f32 %v401_v4, %v178_v25  ;;  %v182_v29 = vsub.f32 %v402_v6, %v178_v25 }
  0x31   : > { %v183_v30 = vsub.f32 %v405_v8, %v178_v25  ;;  %v184_v34 = vsub.f32 %v406_v11, %v178_v25  ;;  %v185_v37 = vsub.f32 %v409_v13, %v178_v25  ;;  %v186_v40 = vsub.f32 %v410_v15, %v178_v25 }
  0x32   : > { %v187_v31 = vmul.f32 %v179_v26, %v179_v26  ;;  %v188_v32 = vmul.f32 %v180_v27, %v180_v27  ;;  %v189_v33 = vmul.f32 %v181_v28, %v181_v28  ;;  %v190_v35 = vmul.f32 %v182_v29, %v182_v29 }
  0x33   : > { %v191_v38 = vmul.f32 %v183_v30, %v183_v30  ;;  %v192_v41 = vmul.f32 %v184_v34, %v184_v34  ;;  %v193_v43 = vmul.f32 %v185_v37, %v185_v37  ;;  %v194_v45 = vmul.f32 %v186_v40, %v186_v40 }
  0x34   : > { %v195_v36 = vadd.f32 %v188_v32, %v187_v31 }
  0x36   : > { %v196_v39 = vadd.f32 %v195_v36, %v189_v33 }
  0x38   : > { %v197_v42 = vadd.f32 %v196_v39, %v190_v35 }
  0x3a   : > { %v198_v44 = vadd.f32 %v197_v42, %v191_v38 }
  0x3c   : > { %v199_v46 = vadd.f32 %v198_v44, %v192_v41 }
  0x3e   : > { %v200_v47 = vadd.f32 %v199_v46, %v193_v43 }
  0x40   : > { %v201_v48 = vadd.f32 %v200_v47, %v194_v45 }
  0x42   : > { %v202_v49 = vrot.slane %v201_v48, 4 }
  0x44   : > { %v203_v50 = vadd.f32 %v202_v49, %v201_v48 }
  0x46   : > { %v204_v51 = vrot.slane %v203_v50, 2 }
  0x48   : > { %v205_v52 = vadd.f32 %v204_v51, %v203_v50 }
  0x4a   : > { %v206_v53 = vrot.slane %v205_v52, 1 }
  0x4c   : > { %v207_v54 = vadd.f32 %v206_v53, %v205_v52 }
  0x4e   : > { %v208_v55 = vmul.f32 0.015625, %v207_v54 }
  0x50   : > { %v209_v56 = vadd.f32 1e-05, %v208_v55 }
  0x52   : > { %461 = vrsqrt.f32 %v209_v56 }
  0x5c   : > { %v462_v57 = vpop.eup %461 }
  0x5d   : > { %v211_v58 = vmul.f32 %v462_v57, %v179_v26  ;;  %v212_v59 = vmul.f32 %v462_v57, %v180_v27  ;;  %v213_v60 = vmul.f32 %v462_v57, %v181_v28  ;;  %v214_v61 = vmul.f32 %v462_v57, %v182_v29 }
  0x5e   : > { %v215_v62 = vmul.f32 %v462_v57, %v183_v30  ;;  %v216_v63 = vmul.f32 %v462_v57, %v184_v34  ;;  %v217_v0 = vmul.f32 %v462_v57, %v185_v37  ;;  %v218_v1 = vmul.f32 %v462_v57, %v186_v40 }
  0x5f   : > { %vm219_vm0 = vcmp.ge.f32.partialorder %v211_v58, 0.0  ;;  %vm220_vm1 = vcmp.ge.f32.partialorder %v212_v59, 0.0  ;;  %v227_v2 = vmul.f32 0.2, %v211_v58  ;;  %v228_v3 = vmul.f32 0.2, %v212_v59 }
  0x60   : > { %vm221_vm2 = vcmp.ge.f32.partialorder %v213_v60, 0.0  ;;  %vm222_vm3 = vcmp.ge.f32.partialorder %v214_v61, 0.0  ;;  %v229_v4 = vmul.f32 0.2, %v213_v60  ;;  %v230_v5 = vmul.f32 0.2, %v214_v61 }
  0x61   : > { %v235_v6 = vsel %vm219_vm0, %v211_v58, %v227_v2  ;;  %v236_v7 = vsel %vm220_vm1, %v212_v59, %v228_v3  ;;  %vm223_vm4 = vcmp.ge.f32.partialorder %v215_v62, 0.0  ;;  %vm224_vm5 = vcmp.ge.f32.partialorder %v216_v63, 0.0 }
  0x62   : > { %v414_v8 = vpack.c.bf16 %v236_v7, %v235_v6  ;;  %v237_v9 = vsel %vm221_vm2, %v213_v60, %v229_v4  ;;  %v238_v10 = vsel %vm222_vm3, %v214_v61, %v230_v5  ;;  %v231_v11 = vmul.f32 0.2, %v215_v62 }
  0x63   : > { %v419_v12 = vpack.c.bf16 %v238_v10, %v237_v9  ;;  %v232_v13 = vmul.f32 0.2, %v216_v63  ;;  %vm225_vm6 = vcmp.ge.f32.partialorder %v217_v0, 0.0  ;;  %vm226_vm7 = vcmp.ge.f32.partialorder %v218_v1, 0.0 }
  0x64   : > { %415 = vst [vmem:[%s147_s16] sm:$0xff] %v414_v8   ;;  %v239_v14 = vsel %vm223_vm4, %v215_v62, %v231_v11  ;;  %v233_v15 = vmul.f32 0.2, %v217_v0  ;;  %v234_v16 = vmul.f32 0.2, %v218_v1 }
  0x65   : > { %434 = vst [vmem:[%s147_s16 + $0x8] sm:$0xff] %v419_v12   ;;  %v240_v17 = vsel %vm224_vm5, %v216_v63, %v232_v13 }
  0x66   : > { %v424_v18 = vpack.c.bf16 %v240_v17, %v239_v14  ;;  %v241_v19 = vsel %vm225_vm6, %v217_v0, %v233_v15  ;;  %v242_v20 = vsel %vm226_vm7, %v218_v1, %v234_v16 }
  0x67   : > { %v429_v21 = vpack.c.bf16 %v242_v20, %v241_v19 }
  0x68   : > { %435 = vst [vmem:[%s147_s16 + $0x10] sm:$0xff] %v424_v18  }
  0x69   : > { %436 = vst [vmem:[%s147_s16 + $0x18] sm:$0xff] %v429_v21  }
  0x6a PF: > { %s11_s8 = sadd.s32 1, %s485_s8   ;;  %s539_s6 = smov %s481_s7 }
  0x6b   : > { %p8_p5 = scmp.ge.s32.totalorder %s11_s8, 4   ;;  %s540_s7 = smov %s542_s9 }
  0x6d   :  { %10 = sbr.rel (!%p8_p5) target bundleno = 2 (0x2), region = 54 }

// kernel: discriminator_forward.11
= control target key start
LH: loop header
LB: loop body
LE: loop exit
PB: predicated region body
PF: predicated region fallthrough
CT: control target
= control target key end

     0   :  { %s1380_s12 = smov 0   ;;  %s1382_s13 = smov 0   ;;  %s1538_s0 = inlined_call_operand.vmem [shape: bf16[32,2048], index: 0, kind: input, shape index: {}]   ;;  %s1539_s1 = inlined_call_operand.vmem [shape: bf16[2048,256], index: 1, kind: input, shape index: {}]   ;;  %s1540_s2 = inlined_call_operand.vmem [shape: f32[1,256], index: 2, kind: input, shape index: {}]   ;;  %s1541_s3 = inlined_call_operand.vmem [shape: bf16[32,256], index: 3, kind: output, shape index: {}]  }
   0x1   :  { %s1384_s14 = smov 0   ;;  %s1386_s15 = smov 0  }
   0x2   :  { %s1388_s16 = smov 0  }
   0x3 LB: > { %s25_s17 = sadd.s32 1, %s1353_s15  ;;  %p48_p1 = scmp.ne.s32.totalorder %s1345_s13, %s1341_s12  ;;  %s1357_s16 = sphi %s1388_s16, %s13_s16   ;;  %s1353_s15 = sphi %s1386_s15, %s1545_s15   ;;  %s1349_s14 = sphi %s1384_s14, %s1544_s14   ;;  %s1345_s13 = sphi %s1382_s13, %s1543_s13   ;;  %s1341_s12 = sphi %s1380_s12, %s1542_s12  }
   0x4   : > { %p26_p0 = scmp.ge.s32.totalorder %s25_s17, 4  ;;  %p49_p2 = scmp.eq.s32.totalorder %s1357_s16, 0 }
   0x5   : > { %s41_s19 = sadd.s32 1, %s1345_s13  ;;  %p1065_p5 = scmp.ge.s32.totalorder %s1357_s16, 4 }
   0x6   : > { %s1547_s17 = smov (%p26_p0, %s25_s17), 0  ;;  %p50_p3 = por %p49_p2, %p48_p1 }
   0x7   : > { %s37_s18 = ssub.s32 %s1353_s15, %s1547_s17  ;;  %164 = sbr.rel (%p1065_p5) target bundleno = 22 (0x16), region = 20 }
   0x8   : > { %p39_p4 = scmp.eq.s32.totalorder %s37_s18, 0 }
   0xa   : > { %s1415_s20 = scalar_select %p39_p4, %s1345_s13, %s41_s19  }
   0xe   : > { %167 = sbr.rel (!%p50_p3) target bundleno = 22 (0x16), region = 24  ;;  %s169_s21 = sand.u32 (%p50_p3), 1, %s1345_s13  }
   0xf   : > { %s1156_s22 = sshll.u32 (%p50_p3), %s1353_s15, 4  ;;  %s1066_s23 = sshll.u32 (%p50_p3), %s169_s21, 6 }
  0x10   : > { %s177_s26 = scalar_lea.vmem (%p50_p3), %s1538_s0, %s1156_s22  ;;  %s171_s27 = scalar_lea.vmem (%p50_p3), [#allocation3], %s1066_s23 }
  0x11   : > { %v190_v0 = vld [vmem:[%s177_s26] sm:$0xff] (%p50_p3)  ;;  %v192_v1 = vld [vmem:[%s177_s26 + $0x8] sm:$0xff] (%p50_p3) }
  0x12   : > { %v194_v2 = vld [vmem:[%s177_s26 + $0x40] sm:$0xff] (%p50_p3)  ;;  %191 = vst [vmem:[%s171_s27] sm:$0xff] (%p50_p3), %v190_v0  ;;  %193 = vst [vmem:[%s171_s27 + $0x8] sm:$0xff] (%p50_p3), %v192_v1  ;;  %v196_v3 = vld [vmem:[%s177_s26 + $0x48] sm:$0xff] (%p50_p3) }
  0x13   : > { %195 = vst [vmem:[%s171_s27 + $0x10] sm:$0xff] (%p50_p3), %v194_v2  ;;  %v198_v4 = vld [vmem:[%s177_s26 + $0x80] sm:$0xff] (%p50_p3)  ;;  %v200_v5 = vld [vmem:[%s177_s26 + $0x88] sm:$0xff] (%p50_p3)  ;;  %197 = vst [vmem:[%s171_s27 + $0x18] sm:$0xff] (%p50_p3), %v196_v3 }
  0x14   : > { %199 = vst [vmem:[%s171_s27 + $0x20] sm:$0xff] (%p50_p3), %v198_v4  ;;  %201 = vst [vmem:[%s171_s27 + $0x28] sm:$0xff] (%p50_p3), %v200_v5  ;;  %v202_v6 = vld [vmem:[%s177_s26 + $0xc0] sm:$0xff] (%p50_p3)  ;;  %v204_v7 = vld [vmem:[%s177_s26 + $0xc8] sm:$0xff] (%p50_p3) }
  0x15   : > { %203 = vst [vmem:[%s171_s27 + $0x30] sm:$0xff] %v202_v6  ;;  %205 = vst [vmem:[%s171_s27 + $0x38] sm:$0xff] %v204_v7 }
  0x16 PF: > { %p1069_p6 = scmp.ge.s32.totalorder %s1357_s16, 1  ;;  %p225_p7 = scmp.lt.s32.totalorder %s1357_s16, 5 }
  0x18   : > { %p226_p8 = pnand %p1069_p6, %p225_p7 }
  0x19   : > { %s232_s28 = sand.u32 (!%p226_p8), 1, %s1341_s12   ;;  %s1071_s29 = sshll.u32 (!%p226_p8), %s1349_s14, 6 }
  0x1a   : > { %229 = sbr.rel (%p226_p8) target bundleno = 346 (0x15a), region = 51  ;;  %s1070_s30 = sshll.u32 (!%p226_p8), %s232_s28, 6 }
  0x1b   : > { %p278_p9 = scmp.lt.s32.totalorder (!%p226_p8), %s1071_s29, 255  ;;  %s1432_s8 = scalar_lea.vmem (!%p226_p8), [#allocation3], %s1070_s30 }
  0x1c   : > { %p1074_p10 = scmp.ne.s32.totalorder (!%p226_p8), %s1349_s14, 0 }
  0x21   : > { %s1549_s29 = smov (!%p278_p9, %s1071_s29), 255  ;;  %308 = sbr.rel (%p1074_p10) target bundleno = 40 (0x28), region = 59 }
  0x22   : > { %s1157_s4 = sshll.u32 %s1549_s29, 3  ;;  %v1359_v8 = vmov (!%p1074_p10), 0.0  }
  0x23   : > { %s1430_s7 = scalar_lea.vmem %s1539_s1, %s1157_s4  ;;  %309 = vst [vmem:[#allocation2] sm:$0xff] (!%p1074_p10), %v1359_v8  ;;  %310 = vst [vmem:[#allocation2 + $0x8] sm:$0xff] (!%p1074_p10), %v1359_v8 }
  0x24   : > { %311 = vst [vmem:[#allocation2 + $0x10] sm:$0xff] (!%p1074_p10), %v1359_v8  ;;  %312 = vst [vmem:[#allocation2 + $0x18] sm:$0xff] (!%p1074_p10), %v1359_v8 }
  0x25   : > { %313 = vst [vmem:[#allocation2 + $0x20] sm:$0xff] (!%p1074_p10), %v1359_v8  ;;  %314 = vst [vmem:[#allocation2 + $0x28] sm:$0xff] (!%p1074_p10), %v1359_v8 }
  0x26   : > { %315 = vst [vmem:[#allocation2 + $0x30] sm:$0xff] (!%p1074_p10), %v1359_v8  ;;  %316 = vst [vmem:[#allocation2 + $0x38] sm:$0xff] (!%p1074_p10), %v1359_v8 }
  0x28 PF: > { %v1211_v9 = vld [vmem:[%s1430_s7 + $0x4] ss:$8 sps:$4 sm:$0xff]   ;;  %v1215_v11 = vld [vmem:[%s1430_s7] ss:$8 sps:$4 sm:$0xff]   ;;  %v1217_v13 = vld [vmem:[%s1430_s7 + $0x14] ss:$8 sps:$4 sm:$0xff]  }
  0x29   : > { %v1213_v10 = vld [vmem:[%s1430_s7 + $0x104] ss:$8 sps:$4 sm:$0xff]   ;;  %757 = vmatprep.subr.bf16.mxu1 %v1211_v9  ;;  %v1216_v12 = vld [vmem:[%s1430_s7 + $0x100] ss:$8 sps:$4 sm:$0xff]   ;;  %v1219_v14 = vld [vmem:[%s1430_s7 + $0x114] ss:$8 sps:$4 sm:$0xff]  }
  0x2a   : > { %810 = vmatprep.subr.bf16.mxu0 %v1213_v10  ;;  %758 = vmatpush1.bf16.msra.mxu1 %v1215_v11  ;;  %v1221_v15 = vld [vmem:[%s1430_s7 + $0x10] ss:$8 sps:$4 sm:$0xff]   ;;  %v1223_v17 = vld [vmem:[%s1430_s7 + $0x24] ss:$8 sps:$4 sm:$0xff]   ;;  %v1227_v19 = vld [vmem:[%s1430_s7 + $0x20] ss:$8 sps:$4 sm:$0xff]  }
  0x2b   : > { %811 = vmatpush1.bf16.msra.mxu0 %v1216_v12  ;;  %759 = vmatprep.subr.bf16.mxu1 %v1217_v13  ;;  %v1222_v16 = vld [vmem:[%s1430_s7 + $0x110] ss:$8 sps:$4 sm:$0xff]   ;;  %v1225_v18 = vld [vmem:[%s1430_s7 + $0x124] ss:$8 sps:$4 sm:$0xff]   ;;  %v1228_v20 = vld [vmem:[%s1430_s7 + $0x120] ss:$8 sps:$4 sm:$0xff]  }
  0x2c   : > { %812 = vmatprep.subr.bf16.mxu0 %v1219_v14  ;;  %v1229_v21 = vld [vmem:[%s1430_s7 + $0x34] ss:$8 sps:$4 sm:$0xff]   ;;  %v1233_v23 = vld [vmem:[%s1430_s7 + $0x30] ss:$8 sps:$4 sm:$0xff]   ;;  %v1235_v25 = vld [vmem:[%s1430_s7 + $0x44] ss:$8 sps:$4 sm:$0xff]  }
  0x2d   : > { %v1231_v22 = vld [vmem:[%s1430_s7 + $0x134] ss:$8 sps:$4 sm:$0xff]   ;;  %v1234_v24 = vld [vmem:[%s1430_s7 + $0x130] ss:$8 sps:$4 sm:$0xff]   ;;  %v1237_v26 = vld [vmem:[%s1430_s7 + $0x144] ss:$8 sps:$4 sm:$0xff]  }
  0x2e   : > { %760 = vmatpush1.bf16.msra.mxu1 %v1221_v15  ;;  %v1239_v27 = vld [vmem:[%s1430_s7 + $0x40] ss:$8 sps:$4 sm:$0xff]   ;;  %v1241_v29 = vld [vmem:[%s1430_s7 + $0x54] ss:$8 sps:$4 sm:$0xff]   ;;  %v1245_v31 = vld [vmem:[%s1430_s7 + $0x50] ss:$8 sps:$4 sm:$0xff]  }
  0x2f   : > { %813 = vmatpush1.bf16.msra.mxu0 %v1222_v16  ;;  %761 = vmatprep.subr.bf16.mxu1 %v1223_v17  ;;  %v1240_v28 = vld [vmem:[%s1430_s7 + $0x140] ss:$8 sps:$4 sm:$0xff]   ;;  %v1243_v30 = vld [vmem:[%s1430_s7 + $0x154] ss:$8 sps:$4 sm:$0xff]   ;;  %v1246_v32 = vld [vmem:[%s1430_s7 + $0x150] ss:$8 sps:$4 sm:$0xff]  }
  0x30   : > { %814 = vmatprep.subr.bf16.mxu0 %v1225_v18  ;;  %v1247_v33 = vld [vmem:[%s1430_s7 + $0x64] ss:$8 sps:$4 sm:$0xff]   ;;  %v1251_v35 = vld [vmem:[%s1430_s7 + $0x60] ss:$8 sps:$4 sm:$0xff]   ;;  %v1253_v37 = vld [vmem:[%s1430_s7 + $0x74] ss:$8 sps:$4 sm:$0xff]  }
  0x31   : > { %v1249_v34 = vld [vmem:[%s1430_s7 + $0x164] ss:$8 sps:$4 sm:$0xff]   ;;  %v1252_v36 = vld [vmem:[%s1430_s7 + $0x160] ss:$8 sps:$4 sm:$0xff]   ;;  %v1255_v38 = vld [vmem:[%s1430_s7 + $0x174] ss:$8 sps:$4 sm:$0xff]  }
  0x32   : > { %762 = vmatpush1.bf16.msra.mxu1 %v1227_v19  ;;  %v1257_v39 = vld [vmem:[%s1430_s7 + $0x70] ss:$8 sps:$4 sm:$0xff]   ;;  %v1259_v41 = vld [vmem:[%s1430_s7 + $0x84] ss:$8 sps:$4 sm:$0xff]   ;;  %v1263_v43 = vld [vmem:[%s1430_s7 + $0x80] ss:$8 sps:$4 sm:$0xff]  }
  0x33   : > { %815 = vmatpush1.bf16.msra.mxu0 %v1228_v20  ;;  %763 = vmatprep.subr.bf16.mxu1 %v1229_v21  ;;  %v1258_v40 = vld [vmem:[%s1430_s7 + $0x170] ss:$8 sps:$4 sm:$0xff]   ;;  %v1261_v42 = vld [vmem:[%s1430_s7 + $0x184] ss:$8 sps:$4 sm:$0xff]   ;;  %v1264_v44 = vld [vmem:[%s1430_s7 + $0x180] ss:$8 sps:$4 sm:$0xff]  }
  0x34   : > { %816 = vmatprep.subr.bf16.mxu0 %v1231_v22  ;;  %v1265_v45 = vld [vmem:[%s1430_s7 + $0x94] ss:$8 sps:$4 sm:$0xff]   ;;  %v1269_v47 = vld [vmem:[%s1430_s7 + $0x90] ss:$8 sps:$4 sm:$0xff]   ;;  %v1271_v49 = vld [vmem:[%s1430_s7 + $0xa4] ss:$8 sps:$4 sm:$0xff]  }
  0x35   : > { %v1267_v46 = vld [vmem:[%s1430_s7 + $0x194] ss:$8 sps:$4 sm:$0xff]   ;;  %v1270_v48 = vld [vmem:[%s1430_s7 + $0x190] ss:$8 sps:$4 sm:$0xff]   ;;  %v1273_v50 = vld [vmem:[%s1430_s7 + $0x1a4] ss:$8 sps:$4 sm:$0xff]  }
  0x36   : > { %764 = vmatpush1.bf16.msra.mxu1 %v1233_v23  ;;  %v1275_v51 = vld [vmem:[%s1430_s7 + $0xa0] ss:$8 sps:$4 sm:$0xff]   ;;  %v1277_v53 = vld [vmem:[%s1430_s7 + $0xb4] ss:$8 sps:$4 sm:$0xff]   ;;  %v1281_v55 = vld [vmem:[%s1430_s7 + $0xb0] ss:$8 sps:$4 sm:$0xff]  }
  0x37   : > { %817 = vmatpush1.bf16.msra.mxu0 %v1234_v24  ;;  %765 = vmatprep.subr.bf16.mxu1 %v1235_v25  ;;  %v1276_v52 = vld [vmem:[%s1430_s7 + $0x1a0] ss:$8 sps:$4 sm:$0xff]   ;;  %v1279_v54 = vld [vmem:[%s1430_s7 + $0x1b4] ss:$8 sps:$4 sm:$0xff]   ;;  %v1282_v56 = vld [vmem:[%s1430_s7 + $0x1b0] ss:$8 sps:$4 sm:$0xff]  }
  0x38   : > { %818 = vmatprep.subr.bf16.mxu0 %v1237_v26  ;;  %v1283_v57 = vld [vmem:[%s1430_s7 + $0xc4] ss:$8 sps:$4 sm:$0xff]   ;;  %v1287_v61 = vld [vmem:[%s1430_s7 + $0xc0] ss:$8 sps:$4 sm:$0xff]   ;;  %v1289_v63 = vld [vmem:[%s1430_s7 + $0xd4] ss:$8 sps:$4 sm:$0xff]  }
  0x39   : > { %v1309_v58 = vld [vmem:[%s1432_s8 + $0x4] ss:$16 sps:$4 sm:$0xff]   ;;  %v1312_v60 = vld [vmem:[%s1432_s8 + $0xc] ss:$16 sps:$4 sm:$0xff]   ;;  %v1288_v62 = vld [vmem:[%s1430_s7 + $0x1c0] ss:$8 sps:$4 sm:$0xff]  }
  0x3a   : > { %766 = vmatpush1.bf16.msra.mxu1 %v1239_v27  ;;  %v1285_v59 = vld [vmem:[%s1430_s7 + $0x1c4] ss:$8 sps:$4 sm:$0xff]   ;;  %789 = vmatprep.mubr.bf16.mxu1 %v1309_v58  ;;  %v1291_v0 = vld [vmem:[%s1430_s7 + $0x1d4] ss:$8 sps:$4 sm:$0xff]   ;;  %v1293_v1 = vld [vmem:[%s1430_s7 + $0xd0] ss:$8 sps:$4 sm:$0xff]  }
  0x3b   : > { %819 = vmatpush1.bf16.msra.mxu0 %v1240_v28  ;;  %767 = vmatprep.subr.bf16.mxu1 %v1241_v29  ;;  %v1294_v2 = vld [vmem:[%s1430_s7 + $0x1d0] ss:$8 sps:$4 sm:$0xff]   ;;  %v1295_v3 = vld [vmem:[%s1430_s7 + $0xe4] ss:$8 sps:$4 sm:$0xff]   ;;  %v1299_v5 = vld [vmem:[%s1430_s7 + $0xe0] ss:$8 sps:$4 sm:$0xff]  }
  0x3c   : > { %820 = vmatprep.subr.bf16.mxu0 %v1243_v30  ;;  %842 = vmatprep.mubr.bf16.mxu0 %v1312_v60  ;;  %v1297_v4 = vld [vmem:[%s1430_s7 + $0x1e4] ss:$8 sps:$4 sm:$0xff]   ;;  %v1300_v6 = vld [vmem:[%s1430_s7 + $0x1e0] ss:$8 sps:$4 sm:$0xff]   ;;  %v1301_v7 = vld [vmem:[%s1430_s7 + $0xf4] ss:$8 sps:$4 sm:$0xff]  }
  0x3d   : > { %v1303_v8 = vld [vmem:[%s1430_s7 + $0x1f4] ss:$8 sps:$4 sm:$0xff]   ;;  %v1305_v9 = vld [vmem:[%s1430_s7 + $0xf0] ss:$8 sps:$4 sm:$0xff]   ;;  %v317_v18 = vld [vmem:[#allocation2] sm:$0xff]  ;;  %p1147_p11 = scmp.ne.s32.totalorder %s1349_s14, 3 }
  0x3e   : > { %768 = vmatpush1.bf16.msra.mxu1 %v1245_v31  ;;  %v1306_v10 = vld [vmem:[%s1430_s7 + $0x1f0] ss:$8 sps:$4 sm:$0xff]   ;;  %v1313_v13 = vld [vmem:[%s1432_s8 + $0x24] ss:$16 sps:$4 sm:$0xff]   ;;  %v1315_v14 = vld [vmem:[%s1432_s8 + $0x2c] ss:$16 sps:$4 sm:$0xff]  }
  0x3f   : > { %821 = vmatpush1.bf16.msra.mxu0 %v1246_v32  ;;  %769 = vmatprep.subr.bf16.mxu1 %v1247_v33  ;;  %v1307_v11 = vld [vmem:[%s1432_s8] ss:$16 sps:$4 sm:$0xff]   ;;  %v1310_v12 = vld [vmem:[%s1432_s8 + $0x8] ss:$16 sps:$4 sm:$0xff]  }
  0x40   : > { %822 = vmatprep.subr.bf16.mxu0 %v1249_v34  ;;  %v1317_v15 = vld [vmem:[%s1432_s8 + $0x20] ss:$16 sps:$4 sm:$0xff]   ;;  %v1318_v16 = vld [vmem:[%s1432_s8 + $0x28] ss:$16 sps:$4 sm:$0xff]  }
  0x41   : > { %v318_v22 = vld [vmem:[#allocation2 + $0x8] sm:$0xff]  ;;  %v319_v26 = vld [vmem:[#allocation2 + $0x10] sm:$0xff]  ;;  %v320_v31 = vld [vmem:[#allocation2 + $0x18] sm:$0xff] }
  0x42   : > { %770 = vmatpush1.bf16.msra.mxu1 %v1251_v35 }
  0x43   : > { %823 = vmatpush1.bf16.msra.mxu0 %v1252_v36  ;;  %771 = vmatprep.subr.bf16.mxu1 %v1253_v37 }
  0x44   : > { %824 = vmatprep.subr.bf16.mxu0 %v1255_v38  ;;  %v321_v38 = vld [vmem:[#allocation2 + $0x20] sm:$0xff] }
  0x46   : > { %772 = vmatpush1.bf16.msra.mxu1 %v1257_v39 }
  0x47   : > { %825 = vmatpush1.bf16.msra.mxu0 %v1258_v40  ;;  %773 = vmatprep.subr.bf16.mxu1 %v1259_v41 }
  0x48   : > { %826 = vmatprep.subr.bf16.mxu0 %v1261_v42  ;;  %v322_v42 = vld [vmem:[#allocation2 + $0x28] sm:$0xff] }
  0x4a   : > { %774 = vmatpush1.bf16.msra.mxu1 %v1263_v43 }
  0x4b   : > { %827 = vmatpush1.bf16.msra.mxu0 %v1264_v44  ;;  %775 = vmatprep.subr.bf16.mxu1 %v1265_v45 }
  0x4c   : > { %828 = vmatprep.subr.bf16.mxu0 %v1267_v46  ;;  %v323_v46 = vld [vmem:[#allocation2 + $0x30] sm:$0xff] }
  0x4e   : > { %776 = vmatpush1.bf16.msra.mxu1 %v1269_v47 }
  0x4f   : > { %829 = vmatpush1.bf16.msra.mxu0 %v1270_v48  ;;  %777 = vmatprep.subr.bf16.mxu1 %v1271_v49 }
  0x50   : > { %830 = vmatprep.subr.bf16.mxu0 %v1273_v50 }
  0x52   : > { %778 = vmatpush1.bf16.msra.mxu1 %v1275_v51  ;;  %v324_v51 = vld [vmem:[#allocation2 + $0x38] sm:$0xff] }
  0x53   : > { %831 = vmatpush1.bf16.msra.mxu0 %v1276_v52  ;;  %779 = vmatprep.subr.bf16.mxu1 %v1277_v53 }
  0x54   : > { %832 = vmatprep.subr.bf16.mxu0 %v1279_v54 }
  0x56   : > { %780 = vmatpush1.bf16.msra.mxu1 %v1281_v55 }
  0x57   : > { %833 = vmatpush1.bf16.msra.mxu0 %v1282_v56  ;;  %781 = vmatprep.subr.bf16.mxu1 %v1283_v57  ;;  %v893_v57 = vlaneseq (!%p1147_p11) }
  0x58   : > { %834 = vmatprep.subr.bf16.mxu0 %v1285_v59  ;;  %v891_v59 = vld [vmem:[%s1540_s2] sm:$0x3] (!%p1147_p11) }
  0x59   : > { %v894_v58 = vshrl.u32 (!%p1147_p11), %v893_v57, 7 }
  0x5a   : > { %782 = vmatpush1.bf16.msra.mxu1 %v1287_v61 }
  0x5b   : > { %835 = vmatpush1.bf16.msra.mxu0 %v1288_v62  ;;  %783 = vmatprep.subr.bf16.mxu1 %v1289_v63  ;;  %v895_v62 = vsub.s32 (!%p1147_p11), 0, %v894_v58  ;;  %v899_v63 = vsub.s32 (!%p1147_p11), 1, %v894_v58 }
  0x5c   : > { %836 = vmatprep.subr.bf16.mxu0 %v1291_v0 }
  0x5e   : > { %784 = vmatpush1.bf16.msra.mxu1 %v1293_v1 }
  0x5f   : > { %837 = vmatpush1.bf16.msra.mxu0 %v1294_v2  ;;  %785 = vmatprep.subr.bf16.mxu1 %v1295_v3  ;;  %v896_v3 = vrot.slane (!%p1147_p11), %v891_v59, %v895_v62 }
  0x60   : > { %838 = vmatprep.subr.bf16.mxu0 %v1297_v4  ;;  %v900_v4 = vrot.slane (!%p1147_p11), %v891_v59, %v899_v63 }
  0x62   : > { %786 = vmatpush1.bf16.msra.mxu1 %v1299_v5 }
  0x63   : > { %839 = vmatpush1.bf16.msra.mxu0 %v1300_v6  ;;  %787 = vmatprep.subr.bf16.mxu1 %v1301_v7 }
  0x64   : > { %840 = vmatprep.subr.bf16.mxu0 %v1303_v8 }
  0x66   : > { %788 = vmatpush1.bf16.msra.mxu1 %v1305_v9 }
  0x67   : > { %841 = vmatpush1.bf16.msra.mxu0 %v1306_v10 }
  0x69   : > { %790 = vmatmul.mubr.bf16.vlgmr.msra.gmra.mrb[0].mxu1 %v1307_v11 }
  0x6a   : > { %843 = vmatmul.mubr.bf16.vlgmr.msra.gmra.mrb[0].mxu0 %v1310_v12  ;;  %799 = vmatprep.mubr.bf16.mxu1 %v1313_v13 }
  0x6b   : > { %852 = vmatprep.mubr.bf16.mxu0 %v1315_v14 }
  0x71   : > { %800 = vmatmul.mubr.bf16.gmra.mrb[4].mxu1 %v1317_v15 }
  0x72   : > { %853 = vmatmul.mubr.bf16.gmra.mrb[4].mxu0 %v1318_v16 }
 0x13c   : > { %v791_v17 = vpop.f32.mrb[0].mxu1 }
 0x13d   : > { %v844_v19 = vpop.f32.mrb[0].mxu0  ;;  %v793_v21 = vpop.f32.mrb[1].mxu1 }
 0x13e   : > { %v845_v20 = vadd.f32 %v844_v19, %v791_v17  ;;  %v846_v23 = vpop.f32.mrb[1].mxu0  ;;  %v795_v25 = vpop.f32.mrb[2].mxu1 }
 0x13f   : > { %v847_v24 = vadd.f32 %v846_v23, %v793_v21  ;;  %v848_v27 = vpop.f32.mrb[2].mxu0  ;;  %v797_v30 = vpop.f32.mrb[3].mxu1 }
 0x140   : > { %v863_v28 = vadd.f32 %v845_v20, %v317_v18  ;;  %v849_v29 = vadd.f32 %v848_v27, %v795_v25  ;;  %v850_v32 = vpop.f32.mrb[3].mxu0 }
 0x141   : > { %v864_v33 = vadd.f32 %v847_v24, %v318_v22  ;;  %v851_v34 = vadd.f32 %v850_v32, %v797_v30 }
 0x142   : > { %871 = vst [vmem:[#allocation2] sm:$0xff] %v863_v28  ;;  %v865_v35 = vadd.f32 %v849_v29, %v319_v26 }
 0x143   : > { %872 = vst [vmem:[#allocation2 + $0x8] sm:$0xff] %v864_v33  ;;  %v866_v36 = vadd.f32 %v851_v34, %v320_v31 }
 0x144   : > { %873 = vst [vmem:[#allocation2 + $0x10] sm:$0xff] %v865_v35  ;;  %v801_v37 = vpop.f32.mrb[4].mxu1 }
 0x145   : > { %874 = vst [vmem:[#allocation2 + $0x18] sm:$0xff] %v866_v36  ;;  %v854_v39 = vpop.f32.mrb[4].mxu0  ;;  %v803_v41 = vpop.f32.mrb[5].mxu1 }
 0x146   : > { %v855_v40 = vadd.f32 %v854_v39, %v801_v37  ;;  %v856_v43 = vpop.f32.mrb[5].mxu0  ;;  %v805_v45 = vpop.f32.mrb[6].mxu1 }
 0x147   : > { %v857_v44 = vadd.f32 %v856_v43, %v803_v41  ;;  %v858_v47 = vpop.f32.mrb[6].mxu0  ;;  %v807_v50 = vpop.f32.mrb[7].mxu1  ;;  %882 = sbr.rel (%p1147_p11) target bundleno = 346 (0x15a), region = 63 }
 0x148   : > { %v867_v48 = vadd.f32 %v855_v40, %v321_v38  ;;  %v859_v49 = vadd.f32 %v858_v47, %v805_v45  ;;  %v860_v52 = vpop.f32.mrb[7].mxu0 }
 0x149   : > { %v868_v53 = vadd.f32 %v857_v44, %v322_v42  ;;  %v861_v54 = vadd.f32 %v860_v52, %v807_v50  ;;  %v883_v60 = vld [vmem:[#allocation2] sm:$0xff] (!%p1147_p11) }
 0x14a   : > { %875 = vst [vmem:[#allocation2 + $0x20] sm:$0xff] %v867_v48  ;;  %v869_v55 = vadd.f32 %v859_v49, %v323_v46  ;;  %v884_v61 = vld [vmem:[#allocation2 + $0x8] sm:$0xff] (!%p1147_p11)  ;;  %v903_v8 = vadd.f32 (!%p1147_p11), %v896_v3, %v883_v60 }
 0x14b   : > { %876 = vst [vmem:[#allocation2 + $0x28] sm:$0xff] %v868_v53  ;;  %v870_v56 = vadd.f32 %v861_v54, %v324_v51  ;;  %v885_v0 = vld [vmem:[#allocation2 + $0x10] sm:$0xff] (!%p1147_p11)  ;;  %v904_v9 = vadd.f32 (!%p1147_p11), %v900_v4, %v884_v61 }
 0x14c   : > { %877 = vst [vmem:[#allocation2 + $0x30] sm:$0xff] %v869_v55  ;;  %v886_v1 = vld [vmem:[#allocation2 + $0x18] sm:$0xff] (!%p1147_p11)  ;;  %v905_v10 = vadd.f32 (!%p1147_p11), %v896_v3, %v885_v0 }
 0x14d   : > { %878 = vst [vmem:[#allocation2 + $0x38] sm:$0xff] %v870_v56  ;;  %v906_v11 = vadd.f32 (!%p1147_p11), %v900_v4, %v886_v1  ;;  %v1158_v16 = vpack.c.bf16 (!%p1147_p11), %v904_v9, %v903_v8 }
 0x14f   : > { %v1159_v17 = vpack.c.bf16 %v906_v11, %v905_v10  ;;  %935 = vst [vmem:[%s1541_s3] sm:$0xff] %v1158_v16 }
 0x151   : > { %v887_v2 = vld [vmem:[#allocation2 + $0x20] sm:$0xff]  ;;  %936 = vst [vmem:[%s1541_s3 + $0x8] sm:$0xff] %v1159_v17 }
 0x152   : > { %v888_v5 = vld [vmem:[#allocation2 + $0x28] sm:$0xff]  ;;  %v907_v12 = vadd.f32 %v896_v3, %v887_v2 }
 0x153   : > { %v889_v6 = vld [vmem:[#allocation2 + $0x30] sm:$0xff]  ;;  %v908_v13 = vadd.f32 %v900_v4, %v888_v5 }
 0x154   : > { %v890_v7 = vld [vmem:[#allocation2 + $0x38] sm:$0xff]  ;;  %v909_v14 = vadd.f32 %v896_v3, %v889_v6 }
 0x155   : > { %v910_v15 = vadd.f32 %v900_v4, %v890_v7  ;;  %v1160_v18 = vpack.c.bf16 %v908_v13, %v907_v12 }
 0x157   : > { %v1161_v19 = vpack.c.bf16 %v910_v15, %v909_v14  ;;  %937 = vst [vmem:[%s1541_s3 + $0x10] sm:$0xff] %v1160_v18 }
 0x159   : > { %938 = vst [vmem:[%s1541_s3 + $0x18] sm:$0xff] %v1161_v19 }
 0x15a PF: > { %s13_s16 = sadd.s32 1, %s1357_s16   ;;  %s1542_s12 = smov %s1345_s13 }
 0x15b   : > { %p10_p12 = scmp.ge.s32.totalorder %s13_s16, 6   ;;  %s1543_s13 = smov %s1415_s20 }
 0x15c   : > { %s1544_s14 = smov %s1353_s15  ;;  %s1545_s15 = smov %s1547_s17 }
 0x15d   :  { %12 = sbr.rel (!%p10_p12) target bundleno = 3 (0x3), region = 104 }

// kernel: discriminator_forward.12
= control target key start
LH: loop header
LB: loop body
LE: loop exit
PB: predicated region body
PF: predicated region fallthrough
CT: control target
= control target key end

     0   :  { %s403_s6 = smov 0   ;;  %s405_s7 = smov 0   ;;  %s443_s0 = inlined_call_operand.vmem [shape: bf16[2,16,256], index: 0, kind: input, shape index: {}]   ;;  %s444_s1 = inlined_call_operand.vmem [shape: bf16[2,16,256], index: 1, kind: output, shape index: {}]  }
   0x1   :  { %s407_s8 = smov 0  }
   0x2 LB: > { %s23_s9 = sadd.s32 1, %s387_s7  ;;  %p328_p0 = scmp.ge.s32.totalorder %s391_s8, 1  ;;  %s391_s8 = sphi %s407_s8, %s11_s8   ;;  %s387_s7 = sphi %s405_s7, %s446_s7   ;;  %s383_s6 = sphi %s403_s6, %s445_s6  }
   0x3   : > { %p25_p1 = scmp.ge.s32.totalorder %s23_s9, 2  ;;  %p108_p2 = scmp.lt.s32.totalorder %s391_s8, 3 }
   0x5   : > { %s448_s9 = smov (%p25_p1, %s23_s9), 0  ;;  %p109_p3 = pnand %p328_p0, %p108_p2 }
   0x6   : > { %p137_p4 = scmp.lt.s32.totalorder (!%p109_p3), %s383_s6, 1 }
   0x7   : > { %112 = sbr.rel (%p109_p3) target bundleno = 78 (0x4e), region = 24 }
   0xe   : > { %s450_s6 = smov (!%p137_p4, %s383_s6), 1 }
   0xf   : > { %s337_s10 = sshll.u32 %s450_s6, 4 }
  0x10   : > { %s144_s13 = scalar_lea.vmem %s443_s0, %s337_s10  ;;  %s154_s16 = scalar_lea.vmem %s444_s1, %s337_s10 }
  0x11   : > { %v156_v0 = vld [vmem:[%s144_s13] sm:$0xff]  ;;  %v157_v1 = vld [vmem:[%s144_s13 + $0x8] sm:$0xff] }
  0x12   : > { %v158_v2 = vunpack.c.l.bf16 %v156_v0  ;;  %v159_v3 = vunpack.c.h.bf16 %v156_v0  ;;  %v160_v4 = vunpack.c.l.bf16 %v157_v1  ;;  %v161_v5 = vunpack.c.h.bf16 %v157_v1 }
  0x14   : > { %v162_v6 = vadd.f32 %v160_v4, %v158_v2  ;;  %v169_v7 = vadd.f32 %v161_v5, %v159_v3 }
  0x16   : > { %v163_v8 = vrot.slane %v162_v6, 4  ;;  %v170_v9 = vrot.slane %v169_v7, 4 }
  0x18   : > { %v164_v10 = vadd.f32 %v163_v8, %v162_v6  ;;  %v171_v11 = vadd.f32 %v170_v9, %v169_v7 }
  0x1a   : > { %v165_v12 = vrot.slane %v164_v10, 2  ;;  %v172_v13 = vrot.slane %v171_v11, 2 }
  0x1c   : > { %v166_v14 = vadd.f32 %v165_v12, %v164_v10  ;;  %v173_v15 = vadd.f32 %v172_v13, %v171_v11 }
  0x1e   : > { %v167_v16 = vrot.slane %v166_v14, 1  ;;  %v174_v17 = vrot.slane %v173_v15, 1 }
  0x20   : > { %v168_v18 = vadd.f32 %v167_v16, %v166_v14  ;;  %v175_v19 = vadd.f32 %v174_v17, %v173_v15 }
  0x22   : > { %v177_v20 = vmul.f32 0.0625, %v168_v18  ;;  %v178_v21 = vmul.f32 0.0625, %v175_v19 }
  0x24   : > { %v179_v22 = vsub.f32 %v158_v2, %v177_v20  ;;  %v180_v23 = vsub.f32 %v159_v3, %v178_v21  ;;  %v181_v24 = vsub.f32 %v160_v4, %v177_v20  ;;  %v182_v25 = vsub.f32 %v161_v5, %v178_v21 }
  0x26   : > { %v183_v26 = vmul.f32 %v179_v22, %v179_v22  ;;  %v184_v27 = vmul.f32 %v180_v23, %v180_v23  ;;  %v185_v28 = vmul.f32 %v181_v24, %v181_v24  ;;  %v186_v29 = vmul.f32 %v182_v25, %v182_v25 }
  0x28   : > { %v187_v30 = vadd.f32 %v185_v28, %v183_v26  ;;  %v194_v31 = vadd.f32 %v186_v29, %v184_v27 }
  0x2a   : > { %v188_v32 = vrot.slane %v187_v30, 4  ;;  %v195_v33 = vrot.slane %v194_v31, 4 }
  0x2c   : > { %v189_v34 = vadd.f32 %v188_v32, %v187_v30  ;;  %v196_v35 = vadd.f32 %v195_v33, %v194_v31 }
  0x2e   : > { %v190_v36 = vrot.slane %v189_v34, 2  ;;  %v197_v37 = vrot.slane %v196_v35, 2 }
  0x30   : > { %v191_v38 = vadd.f32 %v190_v36, %v189_v34  ;;  %v198_v39 = vadd.f32 %v197_v37, %v196_v35 }
  0x32   : > { %v192_v40 = vrot.slane %v191_v38, 1  ;;  %v199_v41 = vrot.slane %v198_v39, 1 }
  0x34   : > { %v193_v42 = vadd.f32 %v192_v40, %v191_v38  ;;  %v200_v43 = vadd.f32 %v199_v41, %v198_v39 }
  0x36   : > { %v201_v44 = vmul.f32 0.0625, %v193_v42  ;;  %v202_v45 = vmul.f32 0.0625, %v200_v43 }
  0x38   : > { %v203_v46 = vadd.f32 1e-05, %v201_v44  ;;  %v204_v47 = vadd.f32 1e-05, %v202_v45 }
  0x3a   : > { %365 = vrsqrt.f32 %v203_v46 }
  0x3b   : > { %367 = vrsqrt.f32 %v204_v47 }
  0x44   : > { %v366_v48 = vpop.eup %365 }
  0x45   : > { %v368_v49 = vpop.eup %367  ;;  %v207_v50 = vmul.f32 %v366_v48, %v179_v22  ;;  %v209_v51 = vmul.f32 %v366_v48, %v181_v24 }
  0x46   : > { %v208_v52 = vmul.f32 %v368_v49, %v180_v23  ;;  %v210_v53 = vmul.f32 %v368_v49, %v182_v25 }
  0x47   : > { %vm211_vm0 = vcmp.ge.f32.partialorder %v207_v50, 0.0  ;;  %v215_v54 = vmul.f32 0.2, %v207_v50  ;;  %vm213_vm1 = vcmp.ge.f32.partialorder %v209_v51, 0.0  ;;  %v217_v55 = vmul.f32 0.2, %v209_v51 }
  0x48   : > { %vm212_vm2 = vcmp.ge.f32.partialorder %v208_v52, 0.0  ;;  %v216_v56 = vmul.f32 0.2, %v208_v52  ;;  %vm214_vm3 = vcmp.ge.f32.partialorder %v210_v53, 0.0  ;;  %v218_v57 = vmul.f32 0.2, %v210_v53 }
  0x49   : > { %v219_v58 = vsel %vm211_vm0, %v207_v50, %v215_v54  ;;  %v221_v59 = vsel %vm213_vm1, %v209_v51, %v217_v55 }
  0x4a   : > { %v220_v60 = vsel %vm212_vm2, %v208_v52, %v216_v56  ;;  %v222_v61 = vsel %vm214_vm3, %v210_v53, %v218_v57 }
  0x4b   : > { %v339_v62 = vpack.c.bf16 %v220_v60, %v219_v58  ;;  %v340_v63 = vpack.c.bf16 %v222_v61, %v221_v59 }
  0x4d   : > { %235 = vst [vmem:[%s154_s16] sm:$0xff] %v339_v62  ;;  %236 = vst [vmem:[%s154_s16 + $0x8] sm:$0xff] %v340_v63 }
  0x4e PF: > { %s11_s8 = sadd.s32 1, %s391_s8   ;;  %s445_s6 = smov %s387_s7 }
  0x4f   : > { %p8_p5 = scmp.ge.s32.totalorder %s11_s8, 4   ;;  %s446_s7 = smov %s448_s9 }
  0x51   :  { %10 = sbr.rel (!%p8_p5) target bundleno = 2 (0x2), region = 54 }

// kernel: discriminator_forward.14
= control target key start
LH: loop header
LB: loop body
LE: loop exit
PB: predicated region body
PF: predicated region fallthrough
CT: control target
= control target key end

     0   :  { %s432_s6 = smov 0   ;;  %s434_s7 = smov 0   ;;  %s494_s0 = inlined_call_operand.vmem [shape: bf16[2,4,512], index: 0, kind: input, shape index: {}]   ;;  %s495_s1 = inlined_call_operand.vmem [shape: bf16[2,4,512], index: 1, kind: output, shape index: {}]  }
   0x1   :  { %s436_s8 = smov 0   ;;  %s438_s9 = smov 0  }
   0x2   :  { %s440_s10 = smov 0  }
   0x3 LB: > { %s20_s11 = sadd.s32 1, %s412_s8  ;;  %s23_s12 = sadd.s32 1, %s416_s9  ;;  %s420_s10 = sphi %s440_s10, %s11_s10   ;;  %s416_s9 = sphi %s438_s9, %s499_s9   ;;  %s412_s8 = sphi %s436_s8, %s498_s8   ;;  %s408_s7 = sphi %s434_s7, %s497_s7   ;;  %s404_s6 = sphi %s432_s6, %s496_s6  }
   0x4   : > { %p21_p0 = scmp.ge.s32.totalorder %s20_s11, 2  ;;  %p327_p1 = scmp.ge.s32.totalorder %s420_s10, 1 }
   0x5   : > { %p108_p2 = scmp.lt.s32.totalorder %s420_s10, 5 }
   0x6   : > { %s501_s11 = smov (%p21_p0, %s20_s11), 0  ;;  %s503_s12 = smov (!%p21_p0, %s23_s12), %s416_s9 }
   0x7   : > { %p109_p3 = pnand %p327_p1, %p108_p2  ;;  %p25_p4 = scmp.ge.s32.totalorder %s503_s12, 2 }
   0x8   : > { %s328_s13 = sshll.u32 (!%p109_p3), %s404_s6, 1  ;;  %p137_p5 = scmp.lt.s32.totalorder (!%p109_p3), %s408_s7, 1  ;;  %vm161_vm0 = vcmask (!%p109_p3), 1043456  }
   0x9   : > { %s505_s12 = smov (%p25_p4, %s503_s12), 0  ;;  %112 = sbr.rel (%p109_p3) target bundleno = 89 (0x59), region = 24 }
   0xa   : > { %p139_p6 = scmp.lt.s32.totalorder (!%p109_p3), %s328_s13, 3 }
  0x10   : > { %s507_s7 = smov (!%p137_p5, %s408_s7), 1  ;;  %s509_s13 = smov (!%p139_p6, %s328_s13), 3 }
  0x11   : > { %s329_s14 = sshll.u32 %s507_s7, 2 }
  0x12   : > { %s462_s15 = sadd.s32 %s329_s14, %s509_s13 }
  0x13   : > { %s330_s16 = sshll.u32 %s462_s15, 1 }
  0x14   : > { %s144_s19 = scalar_lea.vmem %s494_s0, %s330_s16  ;;  %s154_s22 = scalar_lea.vmem %s495_s1, %s330_s16 }
  0x15   : > { %v156_v0 = vld [vmem:[%s144_s19] sm:$0xf] }
  0x16   : > { %v157_v1 = vunpack.c.l.bf16 %v156_v0 }
  0x18   : > { %v159_v2 = vcombine.high %v157_v1, %v157_v1  ;;  %v162_v3 = vsel %vm161_vm0, %v157_v1, 0.0 }
  0x19   : > { %v163_v4 = vrot.slane %v162_v3, 4 }
  0x1a   : > { %v169_v5 = vsel %vm161_vm0, %v159_v2, 0.0 }
  0x1b   : > { %v164_v6 = vadd.f32 %v163_v4, %v162_v3  ;;  %v170_v7 = vrot.slane %v169_v5, 4 }
  0x1d   : > { %v165_v8 = vrot.slane %v164_v6, 2  ;;  %v171_v9 = vadd.f32 %v170_v7, %v169_v5 }
  0x1f   : > { %v166_v10 = vadd.f32 %v165_v8, %v164_v6  ;;  %v172_v11 = vrot.slane %v171_v9, 2 }
  0x21   : > { %v167_v12 = vrot.slane %v166_v10, 1  ;;  %v173_v13 = vadd.f32 %v172_v11, %v171_v9 }
  0x23   : > { %v168_v14 = vadd.f32 %v167_v12, %v166_v10  ;;  %v174_v15 = vrot.slane %v173_v13, 1 }
  0x25   : > { %v175_v16 = vadd.f32 %v174_v15, %v173_v13  ;;  %v177_v17 = vmul.f32 0.25, %v168_v14 }
  0x27   : > { %v178_v18 = vmul.f32 0.25, %v175_v16 }
  0x29   : > { %v181_v19 = vcombine.low %v177_v17, %v178_v18 }
  0x2b   : > { %v183_v20 = vsub.f32 %v157_v1, %v181_v19 }
  0x2d   : > { %v184_v21 = vmul.f32 %v183_v20, %v183_v20 }
  0x2f   : > { %v186_v22 = vcombine.high %v184_v21, %v184_v21  ;;  %v188_v23 = vsel %vm161_vm0, %v184_v21, 0.0 }
  0x30   : > { %v189_v24 = vrot.slane %v188_v23, 4 }
  0x31   : > { %v195_v25 = vsel %vm161_vm0, %v186_v22, 0.0 }
  0x32   : > { %v190_v26 = vadd.f32 %v189_v24, %v188_v23  ;;  %v196_v27 = vrot.slane %v195_v25, 4 }
  0x34   : > { %v191_v28 = vrot.slane %v190_v26, 2  ;;  %v197_v29 = vadd.f32 %v196_v27, %v195_v25 }
  0x36   : > { %v192_v30 = vadd.f32 %v191_v28, %v190_v26  ;;  %v198_v31 = vrot.slane %v197_v29, 2 }
  0x38   : > { %v193_v32 = vrot.slane %v192_v30, 1  ;;  %v199_v33 = vadd.f32 %v198_v31, %v197_v29 }
  0x3a   : > { %v194_v34 = vadd.f32 %v193_v32, %v192_v30  ;;  %v200_v35 = vrot.slane %v199_v33, 1 }
  0x3c   : > { %v201_v36 = vadd.f32 %v200_v35, %v199_v33  ;;  %v202_v37 = vmul.f32 0.25, %v194_v34 }
  0x3e   : > { %v203_v38 = vmul.f32 0.25, %v201_v36  ;;  %v204_v39 = vadd.f32 1e-05, %v202_v37 }
  0x40   : > { %v205_v40 = vadd.f32 1e-05, %v203_v38  ;;  %378 = vrsqrt.f32 %v204_v39 }
  0x42   : > { %380 = vrsqrt.f32 %v205_v40 }
  0x4a   : > { %v379_v41 = vpop.eup %378 }
  0x4c   : > { %v381_v42 = vpop.eup %380 }
  0x4d   : > { %v210_v43 = vcombine.low %v379_v41, %v381_v42 }
  0x4f   : > { %v212_v44 = vmul.f32 %v210_v43, %v183_v20 }
  0x51   : > { %vm213_vm1 = vcmp.ge.f32.partialorder %v212_v44, 0.0  ;;  %v214_v45 = vmul.f32 0.2, %v212_v44 }
  0x53   : > { %v215_v46 = vsel %vm213_vm1, %v212_v44, %v214_v45 }
  0x54   : > { %v217_v47 = vcombine.high %v215_v46, %v215_v46 }
  0x56   : > { %v334_v48 = vpack.c.bf16 %v217_v47, %v215_v46 }
  0x58   : > { %335 = vst.sshfl [vmem:[%s154_s22] sm:$0x33 pattern:$0x76325410] %v334_v48 }
  0x59 PF: > { %s11_s10 = sadd.s32 1, %s420_s10   ;;  %s496_s6 = smov %s412_s8 }
  0x5a   : > { %p8_p7 = scmp.ge.s32.totalorder %s11_s10, 6   ;;  %s497_s7 = smov %s416_s9 }
  0x5b   : > { %s498_s8 = smov %s501_s11  ;;  %s499_s9 = smov %s505_s12 }
  0x5c   :  { %10 = sbr.rel (!%p8_p7) target bundleno = 3 (0x3), region = 54 }

// kernel: discriminator_forward.13
= control target key start
LH: loop header
LB: loop body
LE: loop exit
PB: predicated region body
PF: predicated region fallthrough
CT: control target
= control target key end

     0   :  { %s1521_s12 = smov 0   ;;  %s1523_s13 = smov 0   ;;  %s1832_s0 = inlined_call_operand.vmem [shape: bf16[8,4096], index: 0, kind: input, shape index: {}]   ;;  %s1833_s1 = inlined_call_operand.vmem [shape: bf16[4096,512], index: 1, kind: input, shape index: {}]   ;;  %s1834_s2 = inlined_call_operand.vmem [shape: f32[1,512], index: 2, kind: input, shape index: {}]   ;;  %s1835_s3 = inlined_call_operand.vmem [shape: bf16[8,512], index: 3, kind: output, shape index: {}]  }
   0x1   :  { %s1525_s14 = smov 0   ;;  %s1527_s15 = smov 0  }
   0x2   :  { %s1529_s16 = smov 0   ;;  %s1531_s17 = smov 0  }
   0x3   :  { %s1533_s18 = smov 0  }
   0x4 LB: > { %s25_s19 = sadd.s32 1, %s1490_s16  ;;  %s28_s20 = sadd.s32 1, %s1494_s17  ;;  %s1498_s18 = sphi %s1533_s18, %s13_s18   ;;  %s1494_s17 = sphi %s1531_s17, %s1841_s17   ;;  %s1490_s16 = sphi %s1529_s16, %s1840_s16   ;;  %s1486_s15 = sphi %s1527_s15, %s1839_s15   ;;  %s1482_s14 = sphi %s1525_s14, %s1838_s14   ;;  %s1478_s13 = sphi %s1523_s13, %s1837_s13   ;;  %s1474_s12 = sphi %s1521_s12, %s1836_s12  }
   0x5   : > { %p26_p0 = scmp.ge.s32.totalorder %s25_s19, 8  ;;  %p76_p1 = scmp.ne.s32.totalorder %s1478_s13, %s1474_s12 }
   0x6   : > { %p77_p2 = scmp.eq.s32.totalorder %s1498_s18, 0  ;;  %s69_s24 = sadd.s32 1, %s1478_s13 }
   0x7   : > { %s1843_s19 = smov (%p26_p0, %s25_s19), 0  ;;  %s1845_s20 = smov (!%p26_p0, %s28_s20), %s1494_s17 }
   0x8   : > { %p78_p3 = por %p77_p2, %p76_p1  ;;  %p30_p4 = scmp.ge.s32.totalorder %s1845_s20, 2 }
   0x9   : > { %s64_s21 = ssub.s32 %s1490_s16, %s1843_s19  ;;  %p1199_p6 = scmp.ge.s32.totalorder %s1498_s18, 16 }
   0xa   : > { %s1847_s20 = smov (%p30_p4, %s1845_s20), 0 }
   0xb   : > { %s65_s22 = ssub.s32 %s1494_s17, %s1847_s20  ;;  %156 = sbr.rel (%p1199_p6) target bundleno = 57 (0x39), region = 16 }
   0xc   : > { %s66_s23 = sor.u32 %s65_s22, %s64_s21 }
   0xd   : > { %p67_p5 = scmp.eq.s32.totalorder %s66_s23, 0 }
   0xf   : > { %s1572_s25 = scalar_select %p67_p5, %s1478_s13, %s69_s24  }
  0x12   : > { %172 = sbr.rel (!%p78_p3) target bundleno = 57 (0x39), region = 24  ;;  %s174_s26 = sand.u32 (%p78_p3), 1, %s1478_s13  }
  0x13   : > { %s1202_s27 = sshll.u32 (%p78_p3), %s1494_s17, 1  ;;  %s1200_s28 = sshll.u32 (%p78_p3), %s174_s26, 9 }
  0x14   : > { %s1285_s29 = sshll.u32 (%p78_p3), %s1490_s16, 8  ;;  %s1586_s8 = scalar_lea.vmem (%p78_p3), [#allocation3], %s1200_s28 }
  0x15   : > { %s180_s30 = sadd.s32 (%p78_p3), %s1285_s29, %s1202_s27 }
  0x16   : > { %s1204_s4 = sshll.u32 (%p78_p3), %s180_s30, 2 }
  0x17   : > { %s1581_s7 = scalar_lea.vmem (%p78_p3), %s1833_s1, %s1204_s4 }
  0x18   : > { %v336_v0 = vld [vmem:[%s1581_s7] sm:$0xff] (%p78_p3)  ;;  %v338_v1 = vld [vmem:[%s1581_s7 + $0x10] sm:$0xff] (%p78_p3) }
  0x19   : > { %v340_v2 = vld [vmem:[%s1581_s7 + $0x20] sm:$0xff]  ;;  %337 = vst [vmem:[%s1586_s8] sm:$0xff] %v336_v0  ;;  %339 = vst [vmem:[%s1586_s8 + $0x8] sm:$0xff] %v338_v1  ;;  %v342_v3 = vld [vmem:[%s1581_s7 + $0x30] sm:$0xff] }
  0x1a   : > { %341 = vst [vmem:[%s1586_s8 + $0x10] sm:$0xff] %v340_v2  ;;  %v344_v4 = vld [vmem:[%s1581_s7 + $0x40] sm:$0xff]  ;;  %v346_v5 = vld [vmem:[%s1581_s7 + $0x50] sm:$0xff]  ;;  %343 = vst [vmem:[%s1586_s8 + $0x18] sm:$0xff] %v342_v3 }
  0x1b   : > { %345 = vst [vmem:[%s1586_s8 + $0x20] sm:$0xff] %v344_v4  ;;  %347 = vst [vmem:[%s1586_s8 + $0x28] sm:$0xff] %v346_v5  ;;  %v348_v6 = vld [vmem:[%s1581_s7 + $0x60] sm:$0xff]  ;;  %v350_v7 = vld [vmem:[%s1581_s7 + $0x70] sm:$0xff] }
  0x1c   : > { %v352_v8 = vld [vmem:[%s1581_s7 + $0x80] sm:$0xff]  ;;  %349 = vst [vmem:[%s1586_s8 + $0x30] sm:$0xff] %v348_v6  ;;  %351 = vst [vmem:[%s1586_s8 + $0x38] sm:$0xff] %v350_v7  ;;  %v354_v9 = vld [vmem:[%s1581_s7 + $0x90] sm:$0xff] }
  0x1d   : > { %353 = vst [vmem:[%s1586_s8 + $0x40] sm:$0xff] %v352_v8  ;;  %v356_v10 = vld [vmem:[%s1581_s7 + $0xa0] sm:$0xff]  ;;  %v358_v11 = vld [vmem:[%s1581_s7 + $0xb0] sm:$0xff]  ;;  %355 = vst [vmem:[%s1586_s8 + $0x48] sm:$0xff] %v354_v9 }
  0x1e   : > { %357 = vst [vmem:[%s1586_s8 + $0x50] sm:$0xff] %v356_v10  ;;  %359 = vst [vmem:[%s1586_s8 + $0x58] sm:$0xff] %v358_v11  ;;  %v360_v12 = vld [vmem:[%s1581_s7 + $0xc0] sm:$0xff]  ;;  %v362_v13 = vld [vmem:[%s1581_s7 + $0xd0] sm:$0xff] }
  0x1f   : > { %v364_v14 = vld [vmem:[%s1581_s7 + $0xe0] sm:$0xff]  ;;  %361 = vst [vmem:[%s1586_s8 + $0x60] sm:$0xff] %v360_v12  ;;  %363 = vst [vmem:[%s1586_s8 + $0x68] sm:$0xff] %v362_v13  ;;  %v366_v15 = vld [vmem:[%s1581_s7 + $0xf0] sm:$0xff] }
  0x20   : > { %365 = vst [vmem:[%s1586_s8 + $0x70] sm:$0xff] %v364_v14  ;;  %v368_v16 = vld [vmem:[%s1581_s7 + $0x100] sm:$0xff]  ;;  %v370_v17 = vld [vmem:[%s1581_s7 + $0x110] sm:$0xff]  ;;  %367 = vst [vmem:[%s1586_s8 + $0x78] sm:$0xff] %v366_v15 }
  0x21   : > { %369 = vst [vmem:[%s1586_s8 + $0x80] sm:$0xff] %v368_v16  ;;  %371 = vst [vmem:[%s1586_s8 + $0x88] sm:$0xff] %v370_v17  ;;  %v372_v18 = vld [vmem:[%s1581_s7 + $0x120] sm:$0xff]  ;;  %v374_v19 = vld [vmem:[%s1581_s7 + $0x130] sm:$0xff] }
  0x22   : > { %v376_v20 = vld [vmem:[%s1581_s7 + $0x140] sm:$0xff]  ;;  %373 = vst [vmem:[%s1586_s8 + $0x90] sm:$0xff] %v372_v18  ;;  %375 = vst [vmem:[%s1586_s8 + $0x98] sm:$0xff] %v374_v19  ;;  %v378_v21 = vld [vmem:[%s1581_s7 + $0x150] sm:$0xff] }
  0x23   : > { %377 = vst [vmem:[%s1586_s8 + $0xa0] sm:$0xff] %v376_v20  ;;  %v380_v22 = vld [vmem:[%s1581_s7 + $0x160] sm:$0xff]  ;;  %v382_v23 = vld [vmem:[%s1581_s7 + $0x170] sm:$0xff]  ;;  %379 = vst [vmem:[%s1586_s8 + $0xa8] sm:$0xff] %v378_v21 }
  0x24   : > { %381 = vst [vmem:[%s1586_s8 + $0xb0] sm:$0xff] %v380_v22  ;;  %383 = vst [vmem:[%s1586_s8 + $0xb8] sm:$0xff] %v382_v23  ;;  %v384_v24 = vld [vmem:[%s1581_s7 + $0x180] sm:$0xff]  ;;  %v386_v25 = vld [vmem:[%s1581_s7 + $0x190] sm:$0xff] }
  0x25   : > { %v388_v26 = vld [vmem:[%s1581_s7 + $0x1a0] sm:$0xff]  ;;  %385 = vst [vmem:[%s1586_s8 + $0xc0] sm:$0xff] %v384_v24  ;;  %387 = vst [vmem:[%s1586_s8 + $0xc8] sm:$0xff] %v386_v25  ;;  %v390_v27 = vld [vmem:[%s1581_s7 + $0x1b0] sm:$0xff] }
  0x26   : > { %389 = vst [vmem:[%s1586_s8 + $0xd0] sm:$0xff] %v388_v26  ;;  %v392_v28 = vld [vmem:[%s1581_s7 + $0x1c0] sm:$0xff]  ;;  %v394_v29 = vld [vmem:[%s1581_s7 + $0x1d0] sm:$0xff]  ;;  %391 = vst [vmem:[%s1586_s8 + $0xd8] sm:$0xff] %v390_v27 }
  0x27   : > { %393 = vst [vmem:[%s1586_s8 + $0xe0] sm:$0xff] %v392_v28  ;;  %395 = vst [vmem:[%s1586_s8 + $0xe8] sm:$0xff] %v394_v29  ;;  %v396_v30 = vld [vmem:[%s1581_s7 + $0x1e0] sm:$0xff]  ;;  %v398_v31 = vld [vmem:[%s1581_s7 + $0x1f0] sm:$0xff] }
  0x28   : > { %v400_v32 = vld [vmem:[%s1581_s7 + $0x200] sm:$0xff]  ;;  %397 = vst [vmem:[%s1586_s8 + $0xf0] sm:$0xff] %v396_v30  ;;  %399 = vst [vmem:[%s1586_s8 + $0xf8] sm:$0xff] %v398_v31  ;;  %v402_v33 = vld [vmem:[%s1581_s7 + $0x210] sm:$0xff] }
  0x29   : > { %401 = vst [vmem:[%s1586_s8 + $0x100] sm:$0xff] %v400_v32  ;;  %v404_v34 = vld [vmem:[%s1581_s7 + $0x220] sm:$0xff]  ;;  %v406_v35 = vld [vmem:[%s1581_s7 + $0x230] sm:$0xff]  ;;  %403 = vst [vmem:[%s1586_s8 + $0x108] sm:$0xff] %v402_v33 }
  0x2a   : > { %405 = vst [vmem:[%s1586_s8 + $0x110] sm:$0xff] %v404_v34  ;;  %407 = vst [vmem:[%s1586_s8 + $0x118] sm:$0xff] %v406_v35  ;;  %v408_v36 = vld [vmem:[%s1581_s7 + $0x240] sm:$0xff]  ;;  %v410_v37 = vld [vmem:[%s1581_s7 + $0x250] sm:$0xff] }
  0x2b   : > { %v412_v38 = vld [vmem:[%s1581_s7 + $0x260] sm:$0xff]  ;;  %409 = vst [vmem:[%s1586_s8 + $0x120] sm:$0xff] %v408_v36  ;;  %411 = vst [vmem:[%s1586_s8 + $0x128] sm:$0xff] %v410_v37  ;;  %v414_v39 = vld [vmem:[%s1581_s7 + $0x270] sm:$0xff] }
  0x2c   : > { %413 = vst [vmem:[%s1586_s8 + $0x130] sm:$0xff] %v412_v38  ;;  %v416_v40 = vld [vmem:[%s1581_s7 + $0x280] sm:$0xff]  ;;  %v418_v41 = vld [vmem:[%s1581_s7 + $0x290] sm:$0xff]  ;;  %415 = vst [vmem:[%s1586_s8 + $0x138] sm:$0xff] %v414_v39 }
  0x2d   : > { %417 = vst [vmem:[%s1586_s8 + $0x140] sm:$0xff] %v416_v40  ;;  %419 = vst [vmem:[%s1586_s8 + $0x148] sm:$0xff] %v418_v41  ;;  %v420_v42 = vld [vmem:[%s1581_s7 + $0x2a0] sm:$0xff]  ;;  %v422_v43 = vld [vmem:[%s1581_s7 + $0x2b0] sm:$0xff] }
  0x2e   : > { %v424_v44 = vld [vmem:[%s1581_s7 + $0x2c0] sm:$0xff]  ;;  %421 = vst [vmem:[%s1586_s8 + $0x150] sm:$0xff] %v420_v42  ;;  %423 = vst [vmem:[%s1586_s8 + $0x158] sm:$0xff] %v422_v43  ;;  %v426_v45 = vld [vmem:[%s1581_s7 + $0x2d0] sm:$0xff] }
  0x2f   : > { %425 = vst [vmem:[%s1586_s8 + $0x160] sm:$0xff] %v424_v44  ;;  %v428_v46 = vld [vmem:[%s1581_s7 + $0x2e0] sm:$0xff]  ;;  %v430_v47 = vld [vmem:[%s1581_s7 + $0x2f0] sm:$0xff]  ;;  %427 = vst [vmem:[%s1586_s8 + $0x168] sm:$0xff] %v426_v45 }
  0x30   : > { %429 = vst [vmem:[%s1586_s8 + $0x170] sm:$0xff] %v428_v46  ;;  %431 = vst [vmem:[%s1586_s8 + $0x178] sm:$0xff] %v430_v47  ;;  %v432_v48 = vld [vmem:[%s1581_s7 + $0x300] sm:$0xff]  ;;  %v434_v49 = vld [vmem:[%s1581_s7 + $0x310] sm:$0xff] }
  0x31   : > { %v436_v50 = vld [vmem:[%s1581_s7 + $0x320] sm:$0xff]  ;;  %433 = vst [vmem:[%s1586_s8 + $0x180] sm:$0xff] %v432_v48  ;;  %435 = vst [vmem:[%s1586_s8 + $0x188] sm:$0xff] %v434_v49  ;;  %v438_v51 = vld [vmem:[%s1581_s7 + $0x330] sm:$0xff] }
  0x32   : > { %437 = vst [vmem:[%s1586_s8 + $0x190] sm:$0xff] %v436_v50  ;;  %v440_v52 = vld [vmem:[%s1581_s7 + $0x340] sm:$0xff]  ;;  %v442_v53 = vld [vmem:[%s1581_s7 + $0x350] sm:$0xff]  ;;  %439 = vst [vmem:[%s1586_s8 + $0x198] sm:$0xff] %v438_v51 }
  0x33   : > { %441 = vst [vmem:[%s1586_s8 + $0x1a0] sm:$0xff] %v440_v52  ;;  %443 = vst [vmem:[%s1586_s8 + $0x1a8] sm:$0xff] %v442_v53  ;;  %v444_v54 = vld [vmem:[%s1581_s7 + $0x360] sm:$0xff]  ;;  %v446_v55 = vld [vmem:[%s1581_s7 + $0x370] sm:$0xff] }
  0x34   : > { %v448_v56 = vld [vmem:[%s1581_s7 + $0x380] sm:$0xff]  ;;  %445 = vst [vmem:[%s1586_s8 + $0x1b0] sm:$0xff] %v444_v54  ;;  %447 = vst [vmem:[%s1586_s8 + $0x1b8] sm:$0xff] %v446_v55  ;;  %v450_v57 = vld [vmem:[%s1581_s7 + $0x390] sm:$0xff] }
  0x35   : > { %449 = vst [vmem:[%s1586_s8 + $0x1c0] sm:$0xff] %v448_v56  ;;  %v452_v58 = vld [vmem:[%s1581_s7 + $0x3a0] sm:$0xff]  ;;  %v454_v59 = vld [vmem:[%s1581_s7 + $0x3b0] sm:$0xff]  ;;  %451 = vst [vmem:[%s1586_s8 + $0x1c8] sm:$0xff] %v450_v57 }
  0x36   : > { %453 = vst [vmem:[%s1586_s8 + $0x1d0] sm:$0xff] %v452_v58  ;;  %455 = vst [vmem:[%s1586_s8 + $0x1d8] sm:$0xff] %v454_v59  ;;  %v456_v60 = vld [vmem:[%s1581_s7 + $0x3c0] sm:$0xff]  ;;  %v458_v61 = vld [vmem:[%s1581_s7 + $0x3d0] sm:$0xff] }
  0x37   : > { %v460_v62 = vld [vmem:[%s1581_s7 + $0x3e0] sm:$0xff]  ;;  %457 = vst [vmem:[%s1586_s8 + $0x1e0] sm:$0xff] %v456_v60  ;;  %459 = vst [vmem:[%s1586_s8 + $0x1e8] sm:$0xff] %v458_v61  ;;  %v462_v63 = vld [vmem:[%s1581_s7 + $0x3f0] sm:$0xff] }
  0x38   : > { %461 = vst [vmem:[%s1586_s8 + $0x1f0] sm:$0xff] %v460_v62  ;;  %463 = vst [vmem:[%s1586_s8 + $0x1f8] sm:$0xff] %v462_v63 }
  0x39 PF: > { %p1205_p7 = scmp.ge.s32.totalorder %s1498_s18, 1  ;;  %p476_p8 = scmp.lt.s32.totalorder %s1498_s18, 17 }
  0x3b   : > { %p477_p9 = pnand %p1205_p7, %p476_p8 }
  0x3c   : > { %s483_s9 = sand.u32 (!%p477_p9), 1, %s1474_s12   ;;  %s1207_s10 = sshll.u32 (!%p477_p9), %s1482_s14, 2 }
  0x3d   : > { %480 = sbr.rel (%p477_p9) target bundleno = 374 (0x176), region = 66  ;;  %s1206_s11 = sshll.u32 (!%p477_p9), %s483_s9, 9 }
  0x3e   : > { %p526_p10 = scmp.lt.s32.totalorder (!%p477_p9), %s1207_s10, 31  ;;  %s1209_s21 = sshll.u32 (!%p477_p9), %s1486_s15, 1 }
  0x3f   : > { %p536_p11 = scmp.lt.s32.totalorder (!%p477_p9), %s1209_s21, 3  ;;  %s1735_s5 = scalar_lea.vmem (!%p477_p9), [#allocation3], %s1206_s11 }
  0x40   : > { %p1212_p12 = scmp.ne.s32.totalorder (!%p477_p9), %s1482_s14, 0 }
  0x44   : > { %s1849_s10 = smov (!%p526_p10, %s1207_s10), 31  ;;  %s1851_s21 = smov (!%p536_p11, %s1209_s21), 3 }
  0x45   : > { %s1208_s22 = sshll.u32 %s1849_s10, 2  ;;  %s538_s12 = scalar_lea.vmem %s1834_s2, %s1851_s21  ;;  %v1500_v0 = vmov (!%p1212_p12), 0.0  }
  0x46   : > { %s1721_s26 = scalar_lea.vmem %s1832_s0, %s1208_s22  ;;  %s1211_s29 = sshll.u32 %s1851_s21, 2  ;;  %554 = vst [vmem:[#allocation2] sm:$0xff] (!%p1212_p12), %v1500_v0  ;;  %555 = vst [vmem:[#allocation2 + $0x8] sm:$0xff] (!%p1212_p12), %v1500_v0 }
  0x47   : > { %s1733_s15 = scalar_lea.vmem %s1835_s3, %s1211_s29  ;;  %553 = sbr.rel (%p1212_p12) target bundleno = 78 (0x4e), region = 74 }
  0x4e PF: > { %v1344_v1 = vld [vmem:[%s1735_s5 + $0x4] ss:$8 sps:$4 sm:$0xff]   ;;  %v1348_v3 = vld [vmem:[%s1735_s5] ss:$8 sps:$4 sm:$0xff]   ;;  %v1350_v5 = vld [vmem:[%s1735_s5 + $0x14] ss:$8 sps:$4 sm:$0xff]  }
  0x4f   : > { %v1346_v2 = vld [vmem:[%s1735_s5 + $0x104] ss:$8 sps:$4 sm:$0xff]   ;;  %958 = vmatprep.subr.bf16.mxu0 %v1344_v1  ;;  %v1349_v4 = vld [vmem:[%s1735_s5 + $0x100] ss:$8 sps:$4 sm:$0xff]   ;;  %v1352_v6 = vld [vmem:[%s1735_s5 + $0x114] ss:$8 sps:$4 sm:$0xff]  }
  0x50   : > { %999 = vmatprep.subr.bf16.mxu1 %v1346_v2  ;;  %959 = vmatpush1.bf16.msra.mxu0 %v1348_v3  ;;  %v1354_v7 = vld [vmem:[%s1735_s5 + $0x10] ss:$8 sps:$4 sm:$0xff]   ;;  %v1356_v9 = vld [vmem:[%s1735_s5 + $0x24] ss:$8 sps:$4 sm:$0xff]   ;;  %v1360_v11 = vld [vmem:[%s1735_s5 + $0x20] ss:$8 sps:$4 sm:$0xff]  }
  0x51   : > { %1000 = vmatpush1.bf16.msra.mxu1 %v1349_v4  ;;  %960 = vmatprep.subr.bf16.mxu0 %v1350_v5  ;;  %v1355_v8 = vld [vmem:[%s1735_s5 + $0x110] ss:$8 sps:$4 sm:$0xff]   ;;  %v1358_v10 = vld [vmem:[%s1735_s5 + $0x124] ss:$8 sps:$4 sm:$0xff]   ;;  %v1361_v12 = vld [vmem:[%s1735_s5 + $0x120] ss:$8 sps:$4 sm:$0xff]  }
  0x52   : > { %1001 = vmatprep.subr.bf16.mxu1 %v1352_v6  ;;  %v1362_v13 = vld [vmem:[%s1735_s5 + $0x34] ss:$8 sps:$4 sm:$0xff]   ;;  %v1366_v15 = vld [vmem:[%s1735_s5 + $0x30] ss:$8 sps:$4 sm:$0xff]   ;;  %v1368_v17 = vld [vmem:[%s1735_s5 + $0x44] ss:$8 sps:$4 sm:$0xff]  }
  0x53   : > { %v1364_v14 = vld [vmem:[%s1735_s5 + $0x134] ss:$8 sps:$4 sm:$0xff]   ;;  %v1367_v16 = vld [vmem:[%s1735_s5 + $0x130] ss:$8 sps:$4 sm:$0xff]   ;;  %v1370_v18 = vld [vmem:[%s1735_s5 + $0x144] ss:$8 sps:$4 sm:$0xff]  }
  0x54   : > { %961 = vmatpush1.bf16.msra.mxu0 %v1354_v7  ;;  %v1372_v19 = vld [vmem:[%s1735_s5 + $0x40] ss:$8 sps:$4 sm:$0xff]   ;;  %v1374_v21 = vld [vmem:[%s1735_s5 + $0x54] ss:$8 sps:$4 sm:$0xff]   ;;  %v1378_v23 = vld [vmem:[%s1735_s5 + $0x50] ss:$8 sps:$4 sm:$0xff]  }
  0x55   : > { %1002 = vmatpush1.bf16.msra.mxu1 %v1355_v8  ;;  %962 = vmatprep.subr.bf16.mxu0 %v1356_v9  ;;  %v1373_v20 = vld [vmem:[%s1735_s5 + $0x140] ss:$8 sps:$4 sm:$0xff]   ;;  %v1376_v22 = vld [vmem:[%s1735_s5 + $0x154] ss:$8 sps:$4 sm:$0xff]   ;;  %v1379_v24 = vld [vmem:[%s1735_s5 + $0x150] ss:$8 sps:$4 sm:$0xff]  }
  0x56   : > { %1003 = vmatprep.subr.bf16.mxu1 %v1358_v10  ;;  %v1380_v25 = vld [vmem:[%s1735_s5 + $0x64] ss:$8 sps:$4 sm:$0xff]   ;;  %v1384_v27 = vld [vmem:[%s1735_s5 + $0x60] ss:$8 sps:$4 sm:$0xff]   ;;  %v1386_v29 = vld [vmem:[%s1735_s5 + $0x74] ss:$8 sps:$4 sm:$0xff]  }
  0x57   : > { %v1382_v26 = vld [vmem:[%s1735_s5 + $0x164] ss:$8 sps:$4 sm:$0xff]   ;;  %v1385_v28 = vld [vmem:[%s1735_s5 + $0x160] ss:$8 sps:$4 sm:$0xff]   ;;  %v1388_v30 = vld [vmem:[%s1735_s5 + $0x174] ss:$8 sps:$4 sm:$0xff]  }
  0x58   : > { %963 = vmatpush1.bf16.msra.mxu0 %v1360_v11  ;;  %v1390_v31 = vld [vmem:[%s1735_s5 + $0x70] ss:$8 sps:$4 sm:$0xff]   ;;  %v1392_v33 = vld [vmem:[%s1735_s5 + $0x84] ss:$8 sps:$4 sm:$0xff]   ;;  %v1396_v35 = vld [vmem:[%s1735_s5 + $0x80] ss:$8 sps:$4 sm:$0xff]  }
  0x59   : > { %1004 = vmatpush1.bf16.msra.mxu1 %v1361_v12  ;;  %964 = vmatprep.subr.bf16.mxu0 %v1362_v13  ;;  %v1391_v32 = vld [vmem:[%s1735_s5 + $0x170] ss:$8 sps:$4 sm:$0xff]   ;;  %v1394_v34 = vld [vmem:[%s1735_s5 + $0x184] ss:$8 sps:$4 sm:$0xff]   ;;  %v1397_v36 = vld [vmem:[%s1735_s5 + $0x180] ss:$8 sps:$4 sm:$0xff]  }
  0x5a   : > { %1005 = vmatprep.subr.bf16.mxu1 %v1364_v14  ;;  %v1398_v37 = vld [vmem:[%s1735_s5 + $0x94] ss:$8 sps:$4 sm:$0xff]   ;;  %v1402_v39 = vld [vmem:[%s1735_s5 + $0x90] ss:$8 sps:$4 sm:$0xff]   ;;  %v1404_v41 = vld [vmem:[%s1735_s5 + $0xa4] ss:$8 sps:$4 sm:$0xff]  }
  0x5b   : > { %v1400_v38 = vld [vmem:[%s1735_s5 + $0x194] ss:$8 sps:$4 sm:$0xff]   ;;  %v1403_v40 = vld [vmem:[%s1735_s5 + $0x190] ss:$8 sps:$4 sm:$0xff]   ;;  %v1406_v42 = vld [vmem:[%s1735_s5 + $0x1a4] ss:$8 sps:$4 sm:$0xff]  }
  0x5c   : > { %965 = vmatpush1.bf16.msra.mxu0 %v1366_v15  ;;  %v1408_v43 = vld [vmem:[%s1735_s5 + $0xa0] ss:$8 sps:$4 sm:$0xff]   ;;  %v1410_v45 = vld [vmem:[%s1735_s5 + $0xb4] ss:$8 sps:$4 sm:$0xff]   ;;  %v1414_v50 = vld [vmem:[%s1735_s5 + $0xb0] ss:$8 sps:$4 sm:$0xff]  }
  0x5d   : > { %1006 = vmatpush1.bf16.msra.mxu1 %v1367_v16  ;;  %966 = vmatprep.subr.bf16.mxu0 %v1368_v17  ;;  %v1409_v44 = vld [vmem:[%s1735_s5 + $0x1a0] ss:$8 sps:$4 sm:$0xff]   ;;  %v1412_v46 = vld [vmem:[%s1735_s5 + $0x1b4] ss:$8 sps:$4 sm:$0xff]   ;;  %v1415_v51 = vld [vmem:[%s1735_s5 + $0x1b0] ss:$8 sps:$4 sm:$0xff]  }
  0x5e   : > { %1007 = vmatprep.subr.bf16.mxu1 %v1370_v18  ;;  %v558_v47 = vld [vmem:[%s1721_s26] sm:$0xff]  ;;  %v559_v49 = vld [vmem:[%s1721_s26 + $0x8] sm:$0xff]  ;;  %v1416_v53 = vld [vmem:[%s1735_s5 + $0xc4] ss:$8 sps:$4 sm:$0xff]   ;;  %p1281_p13 = scmp.ne.s32.totalorder %s1482_s14, 7 }
  0x5f   : > { %v1214_v48 = vcombine.high %v558_v47, %v558_v47  ;;  %v1216_v52 = vcombine.high %v559_v49, %v559_v49  ;;  %v1418_v54 = vld [vmem:[%s1735_s5 + $0x1c4] ss:$8 sps:$4 sm:$0xff]   ;;  %v1420_v55 = vld [vmem:[%s1735_s5 + $0xc0] ss:$8 sps:$4 sm:$0xff]   ;;  %v1422_v57 = vld [vmem:[%s1735_s5 + $0xd4] ss:$8 sps:$4 sm:$0xff]   ;;  %v1213_v5 = vcombine.low %v558_v47, %v558_v47  ;;  %v1215_v6 = vcombine.low %v559_v49, %v559_v49 }
  0x60   : > { %967 = vmatpush1.bf16.msra.mxu0 %v1372_v19  ;;  %v1421_v56 = vld [vmem:[%s1735_s5 + $0x1c0] ss:$8 sps:$4 sm:$0xff]   ;;  %v1424_v58 = vld [vmem:[%s1735_s5 + $0x1d4] ss:$8 sps:$4 sm:$0xff]   ;;  %v1426_v59 = vld [vmem:[%s1735_s5 + $0xd0] ss:$8 sps:$4 sm:$0xff]  }
  0x61   : > { %1008 = vmatpush1.bf16.msra.mxu1 %v1373_v20  ;;  %968 = vmatprep.subr.bf16.mxu0 %v1374_v21  ;;  %v1427_v60 = vld [vmem:[%s1735_s5 + $0x1d0] ss:$8 sps:$4 sm:$0xff]   ;;  %v1428_v61 = vld [vmem:[%s1735_s5 + $0xe4] ss:$8 sps:$4 sm:$0xff]   ;;  %v1432_v63 = vld [vmem:[%s1735_s5 + $0xe0] ss:$8 sps:$4 sm:$0xff]   ;;  %v1052_v21 = vlaneseq (!%p1281_p13) }
  0x62   : > { %1009 = vmatprep.subr.bf16.mxu1 %v1376_v22  ;;  %990 = vmatprep.mubr.bf16.mxu0 %v1214_v48  ;;  %v1430_v62 = vld [vmem:[%s1735_s5 + $0x1e4] ss:$8 sps:$4 sm:$0xff]   ;;  %v1433_v0 = vld [vmem:[%s1735_s5 + $0x1e0] ss:$8 sps:$4 sm:$0xff]   ;;  %v1434_v1 = vld [vmem:[%s1735_s5 + $0xf4] ss:$8 sps:$4 sm:$0xff]  }
  0x63   : > { %1031 = vmatprep.mubr.bf16.mxu1 %v1216_v52  ;;  %v1436_v2 = vld [vmem:[%s1735_s5 + $0x1f4] ss:$8 sps:$4 sm:$0xff]   ;;  %v1438_v3 = vld [vmem:[%s1735_s5 + $0xf0] ss:$8 sps:$4 sm:$0xff]   ;;  %v1053_v22 = vshrl.u32 (!%p1281_p13), %v1052_v21, 7 }
  0x64   : > { %969 = vmatpush1.bf16.msra.mxu0 %v1378_v23  ;;  %v1439_v4 = vld [vmem:[%s1735_s5 + $0x1f0] ss:$8 sps:$4 sm:$0xff]  }
  0x65   : > { %1010 = vmatpush1.bf16.msra.mxu1 %v1379_v24  ;;  %970 = vmatprep.subr.bf16.mxu0 %v1380_v25  ;;  %v556_v8 = vld [vmem:[#allocation2] sm:$0xff]  ;;  %v557_v12 = vld [vmem:[#allocation2 + $0x8] sm:$0xff]  ;;  %v1054_v24 = vsub.s32 (!%p1281_p13), 0, %v1053_v22  ;;  %v1058_v25 = vsub.s32 (!%p1281_p13), 1, %v1053_v22 }
  0x66   : > { %1011 = vmatprep.subr.bf16.mxu1 %v1382_v26  ;;  %v1050_v23 = vld [vmem:[%s538_s12] sm:$0x3] (!%p1281_p13) }
  0x68   : > { %971 = vmatpush1.bf16.msra.mxu0 %v1384_v27 }
  0x69   : > { %1012 = vmatpush1.bf16.msra.mxu1 %v1385_v28  ;;  %972 = vmatprep.subr.bf16.mxu0 %v1386_v29  ;;  %v1055_v28 = vrot.slane (!%p1281_p13), %v1050_v23, %v1054_v24  ;;  %v1059_v29 = vrot.slane (!%p1281_p13), %v1050_v23, %v1058_v25 }
  0x6a   : > { %1013 = vmatprep.subr.bf16.mxu1 %v1388_v30 }
  0x6c   : > { %973 = vmatpush1.bf16.msra.mxu0 %v1390_v31 }
  0x6d   : > { %1014 = vmatpush1.bf16.msra.mxu1 %v1391_v32  ;;  %974 = vmatprep.subr.bf16.mxu0 %v1392_v33 }
  0x6e   : > { %1015 = vmatprep.subr.bf16.mxu1 %v1394_v34 }
  0x70   : > { %975 = vmatpush1.bf16.msra.mxu0 %v1396_v35 }
  0x71   : > { %1016 = vmatpush1.bf16.msra.mxu1 %v1397_v36  ;;  %976 = vmatprep.subr.bf16.mxu0 %v1398_v37 }
  0x72   : > { %1017 = vmatprep.subr.bf16.mxu1 %v1400_v38 }
  0x74   : > { %977 = vmatpush1.bf16.msra.mxu0 %v1402_v39 }
  0x75   : > { %1018 = vmatpush1.bf16.msra.mxu1 %v1403_v40  ;;  %978 = vmatprep.subr.bf16.mxu0 %v1404_v41 }
  0x76   : > { %1019 = vmatprep.subr.bf16.mxu1 %v1406_v42 }
  0x78   : > { %979 = vmatpush1.bf16.msra.mxu0 %v1408_v43 }
  0x79   : > { %1020 = vmatpush1.bf16.msra.mxu1 %v1409_v44  ;;  %980 = vmatprep.subr.bf16.mxu0 %v1410_v45 }
  0x7a   : > { %1021 = vmatprep.subr.bf16.mxu1 %v1412_v46 }
  0x7c   : > { %981 = vmatpush1.bf16.msra.mxu0 %v1414_v50 }
  0x7d   : > { %1022 = vmatpush1.bf16.msra.mxu1 %v1415_v51  ;;  %982 = vmatprep.subr.bf16.mxu0 %v1416_v53 }
  0x7e   : > { %1023 = vmatprep.subr.bf16.mxu1 %v1418_v54 }
  0x80   : > { %983 = vmatpush1.bf16.msra.mxu0 %v1420_v55 }
  0x81   : > { %1024 = vmatpush1.bf16.msra.mxu1 %v1421_v56  ;;  %984 = vmatprep.subr.bf16.mxu0 %v1422_v57 }
  0x82   : > { %1025 = vmatprep.subr.bf16.mxu1 %v1424_v58 }
  0x84   : > { %985 = vmatpush1.bf16.msra.mxu0 %v1426_v59 }
  0x85   : > { %1026 = vmatpush1.bf16.msra.mxu1 %v1427_v60  ;;  %986 = vmatprep.subr.bf16.mxu0 %v1428_v61 }
  0x86   : > { %1027 = vmatprep.subr.bf16.mxu1 %v1430_v62 }
  0x88   : > { %987 = vmatpush1.bf16.msra.mxu0 %v1432_v63 }
  0x89   : > { %1028 = vmatpush1.bf16.msra.mxu1 %v1433_v0  ;;  %988 = vmatprep.subr.bf16.mxu0 %v1434_v1 }
  0x8a   : > { %1029 = vmatprep.subr.bf16.mxu1 %v1436_v2 }
  0x8c   : > { %989 = vmatpush1.bf16.msra.mxu0 %v1438_v3 }
  0x8d   : > { %1030 = vmatpush1.bf16.msra.mxu1 %v1439_v4 }
  0x8f   : > { %991 = vmatmul.mubr.bf16.vlgmr.msra.gmra.mrb[0].mxu0 %v1213_v5 }
  0x90   : > { %1032 = vmatmul.mubr.bf16.vlgmr.msra.gmra.mrb[0].mxu1 %v1215_v6 }
 0x162   : > { %v992_v7 = vpop.f32.mrb[0].mxu0 }
 0x163   : > { %v1033_v9 = vpop.f32.mrb[0].mxu1  ;;  %v994_v11 = vpop.f32.mrb[1].mxu0  ;;  %1047 = sbr.rel (%p1281_p13) target bundleno = 374 (0x176), region = 78 }
 0x164   : > { %v1034_v10 = vadd.f32 %v1033_v9, %v992_v7  ;;  %v1035_v13 = vpop.f32.mrb[1].mxu1  ;;  %v996_v15 = vpop.f32.mrb[2].mxu0 }
 0x165   : > { %v1036_v14 = vadd.f32 %v1035_v13, %v994_v11  ;;  %v1037_v16 = vpop.f32.mrb[2].mxu1  ;;  %v997_v18 = vpop.f32.mrb[3].mxu0 }
 0x166   : > { %v1040_v17 = vadd.f32 %v1034_v10, %v556_v8  ;;  %v1038_v19 = vpop.f32.mrb[3].mxu1 }
 0x167   : > { %v1041_v20 = vadd.f32 %v1036_v14, %v557_v12 }
 0x168   : > { %1042 = vst [vmem:[#allocation2] sm:$0xff] %v1040_v17 }
 0x169   : > { %1043 = vst [vmem:[#allocation2 + $0x8] sm:$0xff] %v1041_v20 }
 0x16f   : > { %v1048_v26 = vld [vmem:[#allocation2] sm:$0xff] }
 0x170   : > { %v1049_v27 = vld [vmem:[#allocation2 + $0x8] sm:$0xff]  ;;  %v1062_v30 = vadd.f32 %v1055_v28, %v1048_v26 }
 0x171   : > { %v1063_v31 = vadd.f32 %v1059_v29, %v1049_v27 }
 0x173   : > { %v1286_v32 = vpack.c.bf16 %v1063_v31, %v1062_v30 }
 0x175   : > { %1072 = vst [vmem:[%s1733_s15] sm:$0xff] %v1286_v32 }
 0x176 PF: > { %s13_s18 = sadd.s32 1, %s1498_s18   ;;  %s1836_s12 = smov %s1478_s13 }
 0x177   : > { %p10_p0 = scmp.ge.s32.totalorder %s13_s18, 18   ;;  %s1837_s13 = smov %s1572_s25 }
 0x178   : > { %s1838_s14 = smov %s1490_s16  ;;  %s1839_s15 = smov %s1494_s17 }
 0x179   : > { %s1840_s16 = smov %s1843_s19  ;;  %s1841_s17 = smov %s1847_s20 }
 0x17a   :  { %12 = sbr.rel (!%p10_p0) target bundleno = 4 (0x4), region = 119 }

// kernel: discriminator_forward.15
= control target key start
LH: loop header
LB: loop body
LE: loop exit
PB: predicated region body
PF: predicated region fallthrough
CT: control target
= control target key end

     0   :  { %s940_s12 = smov 0   ;;  %s942_s13 = smov 0   ;;  %s1023_s0 = inlined_call_operand.vmem [shape: bf16[8,8192], index: 0, kind: input, shape index: {}]   ;;  %s1024_s1 = inlined_call_operand.vmem [shape: bf16[8192,128], index: 1, kind: input, shape index: {}]   ;;  %s1025_s2 = inlined_call_operand.vmem [shape: f32[1,128], index: 2, kind: input, shape index: {}]   ;;  %s1026_s3 = inlined_call_operand.vmem [shape: f32[8,128], index: 3, kind: output, shape index: {}]  }
   0x1   :  { %s944_s14 = smov 0  }
   0x2 LB: > { %s25_s15 = sadd.s32 1, %s913_s13  ;;  %p743_p0 = scmp.ge.s32.totalorder %s917_s14, 1  ;;  %s917_s14 = sphi %s944_s14, %s13_s14   ;;  %s913_s13 = sphi %s942_s13, %s1028_s13   ;;  %s909_s12 = sphi %s940_s12, %s1027_s12  }
   0x3   : > { %p26_p1 = scmp.ge.s32.totalorder %s25_s15, 16  ;;  %p189_p2 = scmp.lt.s32.totalorder %s917_s14, 17 }
   0x5   : > { %s1030_s15 = smov (%p26_p1, %s25_s15), 0  ;;  %p190_p3 = pnand %p743_p0, %p189_p2 }
   0x6   : > { %s744_s16 = sshll.u32 (!%p190_p3), %s909_s12, 2  ;;  %s746_s17 = sshll.u32 (!%p190_p3), %s909_s12, 6 }
   0x7   : > { %193 = sbr.rel (%p190_p3) target bundleno = 289 (0x121), region = 32  ;;  %p233_p4 = scmp.lt.s32.totalorder (!%p190_p3), %s744_s16, 63 }
   0x8   : > { %p241_p5 = scmp.lt.s32.totalorder (!%p190_p3), %s746_s17, 1023  ;;  %p748_p6 = scmp.ne.s32.totalorder (!%p190_p3), %s909_s12, 0 }
   0xe   : > { %s1032_s16 = smov (!%p233_p4, %s744_s16), 63  ;;  %s1034_s17 = smov (!%p241_p5, %s746_s17), 1023 }
   0xf   : > { %s745_s18 = sshll.u32 %s1032_s16, 2  ;;  %s747_s22 = sshll.u32 %s1034_s17, 2  ;;  %v919_v0 = vmov (!%p748_p6), 0.0  }
  0x10   : > { %s965_s21 = scalar_lea.vmem %s1023_s0, %s745_s18  ;;  %s970_s25 = scalar_lea.vmem %s1024_s1, %s747_s22  ;;  %264 = vst [vmem:[#allocation2] sm:$0xff] (!%p748_p6), %v919_v0 }
  0x11   : > { %263 = sbr.rel (%p748_p6) target bundleno = 24 (0x18), region = 36 }
  0x18 PF: > { %v859_v1 = vld [vmem:[%s970_s25 + $0x40] sm:$0xff]   ;;  %v863_v5 = vld [vmem:[%s970_s25 + $0x48] sm:$0xff]   ;;  %v867_v9 = vld [vmem:[%s970_s25 + $0x50] sm:$0xff]   ;;  %p785_p7 = scmp.ne.s32.totalorder %s909_s12, 15 }
  0x19   : > { %v860_v2 = vld [vmem:[%s970_s25 + $0xc0] sm:$0xff]   ;;  %790 = vmatprep.subr.bf16.mxu0 %v859_v1  ;;  %v864_v6 = vld [vmem:[%s970_s25 + $0xc8] sm:$0xff]   ;;  %v868_v10 = vld [vmem:[%s970_s25 + $0xd0] sm:$0xff]  }
  0x1a   : > { %v861_v3 = vld [vmem:[%s970_s25] sm:$0xff]   ;;  %812 = vmatprep.subr.bf16.mxu1 %v860_v2  ;;  %v865_v7 = vld [vmem:[%s970_s25 + $0x8] sm:$0xff]   ;;  %v869_v11 = vld [vmem:[%s970_s25 + $0x10] sm:$0xff]  }
  0x1b   : > { %v862_v4 = vld [vmem:[%s970_s25 + $0x80] sm:$0xff]   ;;  %791 = vmatpush3.bf16.msra.mxu0 %v861_v3  ;;  %v866_v8 = vld [vmem:[%s970_s25 + $0x88] sm:$0xff]   ;;  %v870_v12 = vld [vmem:[%s970_s25 + $0x90] sm:$0xff]  }
  0x1c   : > { %813 = vmatpush3.bf16.msra.mxu1 %v862_v4  ;;  %792 = vmatprep.subr.bf16.mxu0 %v863_v5  ;;  %v871_v13 = vld [vmem:[%s970_s25 + $0x58] sm:$0xff]   ;;  %v875_v17 = vld [vmem:[%s970_s25 + $0x60] sm:$0xff]   ;;  %v879_v21 = vld [vmem:[%s970_s25 + $0x68] sm:$0xff]  }
  0x1d   : > { %814 = vmatprep.subr.bf16.mxu1 %v864_v6  ;;  %v872_v14 = vld [vmem:[%s970_s25 + $0xd8] sm:$0xff]   ;;  %v876_v18 = vld [vmem:[%s970_s25 + $0xe0] sm:$0xff]   ;;  %v880_v22 = vld [vmem:[%s970_s25 + $0xe8] sm:$0xff]  }
  0x1e   : > { %v873_v15 = vld [vmem:[%s970_s25 + $0x18] sm:$0xff]   ;;  %v877_v19 = vld [vmem:[%s970_s25 + $0x20] sm:$0xff]   ;;  %v881_v23 = vld [vmem:[%s970_s25 + $0x28] sm:$0xff]  }
  0x1f   : > { %793 = vmatpush3.bf16.msra.mxu0 %v865_v7  ;;  %v874_v16 = vld [vmem:[%s970_s25 + $0x98] sm:$0xff]   ;;  %v878_v20 = vld [vmem:[%s970_s25 + $0xa0] sm:$0xff]   ;;  %v882_v24 = vld [vmem:[%s970_s25 + $0xa8] sm:$0xff]  }
  0x20   : > { %815 = vmatpush3.bf16.msra.mxu1 %v866_v8  ;;  %794 = vmatprep.subr.bf16.mxu0 %v867_v9  ;;  %v883_v25 = vld [vmem:[%s970_s25 + $0x70] sm:$0xff]   ;;  %v887_v29 = vld [vmem:[%s970_s25 + $0x78] sm:$0xff]   ;;  %v266_v33 = vld [vmem:[%s965_s21] sm:$0xff] }
  0x21   : > { %816 = vmatprep.subr.bf16.mxu1 %v868_v10  ;;  %v884_v26 = vld [vmem:[%s970_s25 + $0xf0] sm:$0xff]   ;;  %v888_v30 = vld [vmem:[%s970_s25 + $0xf8] sm:$0xff]   ;;  %v267_v34 = vld [vmem:[%s965_s21 + $0x8] sm:$0xff]  ;;  %v749_v35 = vcombine.low %v266_v33, %v266_v33  ;;  %v750_v36 = vcombine.high %v266_v33, %v266_v33 }
  0x22   : > { %v885_v27 = vld [vmem:[%s970_s25 + $0x30] sm:$0xff]   ;;  %v889_v31 = vld [vmem:[%s970_s25 + $0x38] sm:$0xff]   ;;  %v751_v37 = vcombine.low %v267_v34, %v267_v34  ;;  %v752_v38 = vcombine.high %v267_v34, %v267_v34  ;;  %v265_v47 = vld [vmem:[#allocation2] sm:$0xff] }
  0x23   : > { %795 = vmatpush3.bf16.msra.mxu0 %v869_v11  ;;  %v886_v28 = vld [vmem:[%s970_s25 + $0xb0] sm:$0xff]   ;;  %v890_v32 = vld [vmem:[%s970_s25 + $0xb8] sm:$0xff]   ;;  %570 = vmatprep.mubr.bf16.mxu0 %v750_v36  ;;  %v786_v53 = vld [vmem:[%s1025_s2] ss:$0 sm:$0xff] (!%p785_p7) }
  0x24   : > { %817 = vmatpush3.bf16.msra.mxu1 %v870_v12  ;;  %796 = vmatprep.subr.bf16.mxu0 %v871_v13 }
  0x25   : > { %818 = vmatprep.subr.bf16.mxu1 %v872_v14  ;;  %610 = vmatprep.mubr.bf16.mxu1 %v752_v38 }
  0x27   : > { %797 = vmatpush3.bf16.msra.mxu0 %v873_v15 }
  0x28   : > { %819 = vmatpush3.bf16.msra.mxu1 %v874_v16  ;;  %798 = vmatprep.subr.bf16.mxu0 %v875_v17 }
  0x29   : > { %820 = vmatprep.subr.bf16.mxu1 %v876_v18 }
  0x2b   : > { %799 = vmatpush3.bf16.msra.mxu0 %v877_v19 }
  0x2c   : > { %821 = vmatpush3.bf16.msra.mxu1 %v878_v20  ;;  %800 = vmatprep.subr.bf16.mxu0 %v879_v21 }
  0x2d   : > { %822 = vmatprep.subr.bf16.mxu1 %v880_v22 }
  0x2f   : > { %801 = vmatpush3.bf16.msra.mxu0 %v881_v23 }
  0x30   : > { %823 = vmatpush3.bf16.msra.mxu1 %v882_v24  ;;  %802 = vmatprep.subr.bf16.mxu0 %v883_v25 }
  0x31   : > { %824 = vmatprep.subr.bf16.mxu1 %v884_v26 }
  0x33   : > { %803 = vmatpush3.bf16.msra.mxu0 %v885_v27 }
  0x34   : > { %825 = vmatpush3.bf16.msra.mxu1 %v886_v28  ;;  %804 = vmatprep.subr.bf16.mxu0 %v887_v29 }
  0x35   : > { %826 = vmatprep.subr.bf16.mxu1 %v888_v30 }
  0x37   : > { %805 = vmatpush3.bf16.msra.mxu0 %v889_v31 }
  0x38   : > { %827 = vmatpush3.bf16.msra.mxu1 %v890_v32 }
  0x3a   : > { %571 = vmatmul.mubr.bf16.vlgmr.msra.gmra.mrb[0].mxu0 %v749_v35 }
  0x3b   : > { %611 = vmatmul.mubr.bf16.vlgmr.msra.gmra.mrb[0].mxu1 %v751_v37 }
 0x10d   : > { %v806_v39 = vpop.f32.mrb[0].mxu0 }
 0x10e   : > { %v828_v40 = vpop.f32.mrb[0].mxu1  ;;  %v807_v41 = vpop.f32.mrb[1].mxu0 }
 0x10f   : > { %v829_v42 = vpop.f32.mrb[1].mxu1  ;;  %v808_v43 = vadd.f32 %v807_v41, %v806_v39  ;;  %v809_v45 = vpop.f32.mrb[2].mxu0 }
 0x110   : > { %v830_v44 = vadd.f32 %v829_v42, %v828_v40  ;;  %v831_v46 = vpop.f32.mrb[2].mxu1  ;;  %v810_v48 = vpop.f32.mrb[3].mxu0  ;;  %623 = sbr.rel (%p785_p7) target bundleno = 289 (0x121), region = 40 }
 0x111   : > { %v832_v49 = vpop.f32.mrb[3].mxu1 }
 0x112   : > { %v613_v50 = vadd.f32 %v830_v44, %v808_v43 }
 0x114   : > { %v618_v51 = vadd.f32 %v613_v50, %v265_v47 }
 0x116   : > { %619 = vst [vmem:[#allocation2] sm:$0xff] %v618_v51 }
 0x11d   : > { %v624_v52 = vld [vmem:[#allocation2] sm:$0xff] }
 0x11e   : > { %v632_v54 = vadd.f32 %v786_v53, %v624_v52 }
 0x120   : > { %633 = vst [vmem:[%s1026_s3] sm:$0xff] %v632_v54 }
 0x121 PF: > { %s13_s14 = sadd.s32 1, %s917_s14   ;;  %s1027_s12 = smov %s913_s13 }
 0x122   : > { %p10_p8 = scmp.ge.s32.totalorder %s13_s14, 18   ;;  %s1028_s13 = smov %s1030_s15 }
 0x124   :  { %12 = sbr.rel (!%p10_p8) target bundleno = 2 (0x2), region = 76 }

</bundles_post_ra>
